<compile_context>
chip_gen: v5e
topology: v5e:2x2
jax: 0.10.0
libtpu: 0.0.40
codegen_flags: <defaults>
</compile_context>

<pallas_src>
import functools

import jax
import jax.numpy as jnp
import numpy as np
from jax.experimental import pallas as pl
from jax.experimental.pallas import tpu as pltpu


def _round_up(x, m):
    return ((x + m - 1) // m) * m


def _lstm_fused_kernel(x_ref, wih_ref, whh_ref, b_ref, wfc_ref, bfc_ref,
                       out_ref, hn_ref, cn_ref,
                       pre_ref, hseq_ref, *, seq_len, batch_pad, hidden_pad):
    """Fused LSTM + FC kernel, single grid step.

    x_ref    : (T*Bp, Ep)   time-major embedded input, flattened over (t, b)
    wih_ref  : (Ep, 4Hp)    W_ih^T, per-gate padded, PyTorch gate order i,f,g,o
    whh_ref  : (Hp, 4Hp)    W_hh^T, per-gate padded
    b_ref    : (1, 4Hp)     b_ih + b_hh, per-gate padded
    wfc_ref  : (Hp, Op)     fc.weight^T padded
    bfc_ref  : (1, Op)      fc.bias padded
    out_ref  : (T*Bp, Op)   fc(h_t) for every timestep (lane-dense stores)
    hn_ref   : (Bp, Hp)     final hidden state
    cn_ref   : (Bp, Hp)     final cell state
    pre_ref  : VMEM scratch (T*Bp, 4Hp)  precomputed input pre-gates
    hseq_ref : VMEM scratch (T*Bp, Hp)   h_t for every timestep
    """
    T, Bp, Hp = seq_len, batch_pad, hidden_pad

    # ---- Phase 1: input projection for ALL timesteps as one MXU GEMM ----
    pre_ref[...] = (
        jnp.dot(x_ref[...], wih_ref[...], preferred_element_type=jnp.float32)
        + b_ref[...])

    # ---- Phase 2: serial recurrence; only h_prev @ W_hh per step ----
    w_hh = whh_ref[...]  # hoist the weight load out of the loop

    def step(t, carry):
        h_prev, c_prev = carry
        row = pl.multiple_of(t * Bp, Bp)          # sublane-aligned offset
        gates = pre_ref[pl.ds(row, Bp), :] + jnp.dot(
            h_prev, w_hh, preferred_element_type=jnp.float32)
        # Hp == 128 -> every gate slice is a full lane-aligned vreg slab.
        i_g = jax.nn.sigmoid(gates[:, 0:Hp])
        f_g = jax.nn.sigmoid(gates[:, Hp:2 * Hp])
        g_g = jnp.tanh(gates[:, 2 * Hp:3 * Hp])
        o_g = jax.nn.sigmoid(gates[:, 3 * Hp:4 * Hp])
        c_new = f_g * c_prev + i_g * g_g
        h_new = o_g * jnp.tanh(c_new)
        hseq_ref[pl.ds(row, Bp), :] = h_new
        return h_new, c_new

    h0 = jnp.zeros((Bp, Hp), jnp.float32)
    c0 = jnp.zeros((Bp, Hp), jnp.float32)
    h_n, c_n = jax.lax.fori_loop(0, T, step, (h0, c0), unroll=True)

    hn_ref[...] = h_n
    cn_ref[...] = c_n

    # ---- Phase 3: FC projection hoisted out of the loop: one GEMM ----
    out_ref[...] = (
        jnp.dot(hseq_ref[...], wfc_ref[...], preferred_element_type=jnp.float32)
        + bfc_ref[...])


def lstm_fc_pallas(x_flat, w_ih_t, w_hh_t, bias, w_fc_t, b_fc, *,
                   seq_len, batch_pad, hidden_pad):
    """x_flat: (T*Bp, Ep) f32. Returns padded (out, h_n, c_n)."""
    T, Bp, Hp = seq_len, batch_pad, hidden_pad
    Ep = x_flat.shape[1]
    Op = w_fc_t.shape[1]

    kernel = functools.partial(_lstm_fused_kernel, seq_len=T,
                               batch_pad=Bp, hidden_pad=Hp)

    grid_spec = pltpu.PrefetchScalarGridSpec(
        num_scalar_prefetch=0,
        grid=(1,),
        in_specs=[
            pl.BlockSpec((T * Bp, Ep), lambda i: (0, 0)),
            pl.BlockSpec((Ep, 4 * Hp), lambda i: (0, 0)),
            pl.BlockSpec((Hp, 4 * Hp), lambda i: (0, 0)),
            pl.BlockSpec((1, 4 * Hp), lambda i: (0, 0)),
            pl.BlockSpec((Hp, Op), lambda i: (0, 0)),
            pl.BlockSpec((1, Op), lambda i: (0, 0)),
        ],
        out_specs=[
            pl.BlockSpec((T * Bp, Op), lambda i: (0, 0)),
            pl.BlockSpec((Bp, Hp), lambda i: (0, 0)),
            pl.BlockSpec((Bp, Hp), lambda i: (0, 0)),
        ],
        scratch_shapes=[
            pltpu.VMEM((T * Bp, 4 * Hp), jnp.float32),
            pltpu.VMEM((T * Bp, Hp), jnp.float32),
        ],
    )

    return pl.pallas_call(
        kernel,
        out_shape=(
            jax.ShapeDtypeStruct((T * Bp, Op), jnp.float32),
            jax.ShapeDtypeStruct((Bp, Hp), jnp.float32),
            jax.ShapeDtypeStruct((Bp, Hp), jnp.float32),
        ),
        grid_spec=grid_spec,
        compiler_params=pltpu.CompilerParams(
            dimension_semantics=("arbitrary",)),
    )(x_flat, w_ih_t, w_hh_t, bias, w_fc_t, b_fc)


class PallasModel:
    """JAX/Pallas equivalent of PytorchModel with rnn_type='LSTM',
    bidirectional=False, num_layers=1."""

    def __init__(self, vocab_size, embedding_dim, hidden_size, output_size,
                 key):
        self.hidden_size = hidden_size
        self.embedding_dim = embedding_dim
        self.output_size = output_size
        self.num_layers = 1
        self.num_direction = 1

        H, E, O = hidden_size, embedding_dim, output_size
        k = jax.random.split(key, 7)
        s = 1.0 / np.sqrt(H)

        # Embedding (padding_idx=0 -> row 0 zeroed, like nn.Embedding).
        emb = jax.random.normal(k[0], (vocab_size, E), jnp.float32)
        self.embedding = emb.at[0].set(0.0)

        # LSTM parameters, PyTorch layout: weight_ih (4H, E), weight_hh (4H, H).
        self.w_ih = jax.random.uniform(k[1], (4 * H, E), jnp.float32, -s, s)
        self.w_hh = jax.random.uniform(k[2], (4 * H, H), jnp.float32, -s, s)
        self.b_ih = jax.random.uniform(k[3], (4 * H,), jnp.float32, -s, s)
        self.b_hh = jax.random.uniform(k[4], (4 * H,), jnp.float32, -s, s)

        # fc: weight (O, H), bias (O,)
        self.w_fc = jax.random.uniform(k[5], (O, H), jnp.float32, -s, s)
        self.b_fc = jax.random.uniform(k[6], (O,), jnp.float32, -s, s)

        # ---- Padded / transposed parameters for the TPU kernel ----
        self.Ep = _round_up(E, 128)
        self.Hp = _round_up(H, 128)
        self.Op = _round_up(O, 128)
        Ep, Hp, Op = self.Ep, self.Hp, self.Op

        def pad_gate_w(w, in_dim, in_pad):
            # (4H, in) -> per-gate pad -> (in_pad, 4Hp), gate order preserved.
            w4 = w.reshape(4, H, in_dim)
            w4 = jnp.pad(w4, ((0, 0), (0, Hp - H), (0, in_pad - in_dim)))
            return jnp.transpose(w4.reshape(4 * Hp, in_pad))

        self.w_ih_t = pad_gate_w(self.w_ih, E, Ep)        # (Ep, 4Hp)
        self.w_hh_t = pad_gate_w(self.w_hh, H, Hp)        # (Hp, 4Hp)

        b = (self.b_ih + self.b_hh).reshape(4, H)
        self.bias_p = jnp.pad(b, ((0, 0), (0, Hp - H))).reshape(1, 4 * Hp)

        self.w_fc_t = jnp.pad(jnp.transpose(self.w_fc),
                              ((0, Hp - H), (0, Op - O)))  # (Hp, Op)
        self.b_fc_p = jnp.pad(self.b_fc, (0, Op - O)).reshape(1, Op)

        # Embedding table padded along features so the gather is lane-aligned.
        self.embedding_p = jnp.pad(self.embedding, ((0, 0), (0, Ep - E)))

    def __call__(self, token_ids):
        # token_ids: (B, T) int32
        B, T = token_ids.shape
        H, O = self.hidden_size, self.output_size
        Bp = _round_up(B, 8)
        Hp, Op = self.Hp, self.Op

        # Embedding lookup (plain JAX glue) -> time-major, pad batch, flatten.
        emb = jnp.take(self.embedding_p, token_ids, axis=0)   # (B, T, Ep)
        x = jnp.transpose(emb, (1, 0, 2))                     # (T, B, Ep)
        x = jnp.pad(x, ((0, 0), (0, Bp - B), (0, 0)))         # (T, Bp, Ep)
        x_flat = x.reshape(T * Bp, self.Ep).astype(jnp.float32)

        out_p, hn_p, cn_p = lstm_fc_pallas(
            x_flat, self.w_ih_t, self.w_hh_t, self.bias_p,
            self.w_fc_t, self.b_fc_p,
            seq_len=T, batch_pad=Bp, hidden_pad=Hp)

        out = out_p.reshape(T, Bp, Op)[:, :B, :O]
        out = jnp.transpose(out, (1, 0, 2))                   # (B, T, O)
        h_n = hn_p[:B, :H][None]                              # (1, B, H)
        c_n = cn_p[:B, :H][None]
        return out, (h_n, c_n)


def _reference_forward(model, token_ids):
    """Pure-JAX reference (lax.scan LSTM) for correctness check."""
    embedded = jnp.take(model.embedding, token_ids, axis=0)   # (B, T, E)
    B, T, E = embedded.shape
    H = model.hidden_size

    def step(carry, x_t):
        h, c = carry
        gates = x_t @ model.w_ih.T + model.b_ih + h @ model.w_hh.T + model.b_hh
        i = jax.nn.sigmoid(gates[:, 0:H])
        f = jax.nn.sigmoid(gates[:, H:2 * H])
        g = jnp.tanh(gates[:, 2 * H:3 * H])
        o = jax.nn.sigmoid(gates[:, 3 * H:4 * H])
        c = f * c + i * g
        h = o * jnp.tanh(c)
        return (h, c), h

    h0 = jnp.zeros((B, H), jnp.float32)
    c0 = jnp.zeros((B, H), jnp.float32)
    (h_n, c_n), hs = jax.lax.scan(step, (h0, c0),
                                  jnp.transpose(embedded, (1, 0, 2)))
    out = jnp.einsum('tbh,oh->bto', hs, model.w_fc) + model.b_fc
    return out, (h_n[None], c_n[None])


if __name__ == "__main__":
    key = jax.random.PRNGKey(0)
    k_param, k_tok = jax.random.split(key)

    vocab_size, embedding_dim, hidden_size, output_size = 16, 32, 32, 8
    B, T = 2, 8

    model = PallasModel(vocab_size, embedding_dim, hidden_size, output_size,
                        k_param)

    token_ids = jax.random.randint(k_tok, (B, T), 0, vocab_size, jnp.int32)

    out, (h_n, c_n) = model(token_ids)
    out = jax.block_until_ready(out)
    h_n = jax.block_until_ready(h_n)
    c_n = jax.block_until_ready(c_n)

    ref_out, (ref_h, ref_c) = _reference_forward(model, token_ids)
    np.testing.assert_allclose(np.asarray(out), np.asarray(ref_out),
                               rtol=1e-5, atol=1e-5)
    np.testing.assert_allclose(np.asarray(h_n), np.asarray(ref_h),
                               rtol=1e-5, atol=1e-5)
    np.testing.assert_allclose(np.asarray(c_n), np.asarray(ref_c),
                               rtol=1e-5, atol=1e-5)

    print("KERNEL_OK")
</pallas_src>

<mosaic_0001>
module attributes {stable_mosaic.version = 11 : i64} {
  func.func @_lstm_fused_kernel(%arg0: i32, %arg1: memref<64x128xf32, #tpu.memory_space<vmem>>, %arg2: memref<128x512xf32, #tpu.memory_space<vmem>>, %arg3: memref<128x512xf32, #tpu.memory_space<vmem>>, %arg4: memref<1x512xf32, #tpu.memory_space<vmem>>, %arg5: memref<128x128xf32, #tpu.memory_space<vmem>>, %arg6: memref<1x128xf32, #tpu.memory_space<vmem>>, %arg7: memref<64x128xf32, #tpu.memory_space<vmem>>, %arg8: memref<8x128xf32, #tpu.memory_space<vmem>>, %arg9: memref<8x128xf32, #tpu.memory_space<vmem>>, %arg10: memref<64x512xf32, #tpu.memory_space<vmem>>, %arg11: memref<64x128xf32, #tpu.memory_space<vmem>>) attributes {dimension_semantics = [#tpu.dimension_semantics<arbitrary>], iteration_bounds = array<i64: 1>, scalar_prefetch = 0 : i64, scratch_operands = 2 : i64, tpu.core_type = #tpu.core_type<tc>, window_params = [{pipeline_mode = #tpu.pipeline_mode<synchronous>, transform_indices = @transform_0, window_bounds = array<i64: 64, 128>}, {pipeline_mode = #tpu.pipeline_mode<synchronous>, transform_indices = @transform_1, window_bounds = array<i64: 128, 512>}, {pipeline_mode = #tpu.pipeline_mode<synchronous>, transform_indices = @transform_2, window_bounds = array<i64: 128, 512>}, {pipeline_mode = #tpu.pipeline_mode<synchronous>, transform_indices = @transform_3, window_bounds = array<i64: 1, 512>}, {pipeline_mode = #tpu.pipeline_mode<synchronous>, transform_indices = @transform_4, window_bounds = array<i64: 128, 128>}, {pipeline_mode = #tpu.pipeline_mode<synchronous>, transform_indices = @transform_5, window_bounds = array<i64: 1, 128>}, {pipeline_mode = #tpu.pipeline_mode<synchronous>, transform_indices = @transform_6, window_bounds = array<i64: 64, 128>}, {pipeline_mode = #tpu.pipeline_mode<synchronous>, transform_indices = @transform_7, window_bounds = array<i64: 8, 128>}, {pipeline_mode = #tpu.pipeline_mode<synchronous>, transform_indices = @transform_8, window_bounds = array<i64: 8, 128>}]} {
    %c0 = arith.constant 0 : index
    %c0_0 = arith.constant 0 : index
    %0 = vector.load %arg1[%c0, %c0_0] : memref<64x128xf32, #tpu.memory_space<vmem>>, vector<64x128xf32>
    %c0_1 = arith.constant 0 : index
    %c0_2 = arith.constant 0 : index
    %1 = vector.load %arg2[%c0_1, %c0_2] : memref<128x512xf32, #tpu.memory_space<vmem>>, vector<128x512xf32>
    %cst = arith.constant dense<0.000000e+00> : vector<64x512xf32>
    %2 = tpu.matmul %0, %1, %cst {dimension_numbers = #tpu.dot_dimension_numbers<[1], [0], [0], [1], [0, 0, 1, 1], [], []>} : vector<64x128xf32>, vector<128x512xf32>, vector<64x512xf32> -> vector<64x512xf32>
    %c0_3 = arith.constant 0 : index
    %c0_4 = arith.constant 0 : index
    %3 = vector.load %arg4[%c0_3, %c0_4] : memref<1x512xf32, #tpu.memory_space<vmem>>, vector<1x512xf32>
    %4 = vector.broadcast %3 : vector<1x512xf32> to vector<64x512xf32>
    %5 = arith.addf %2, %4 : vector<64x512xf32>
    %c0_5 = arith.constant 0 : index
    %c0_6 = arith.constant 0 : index
    %6 = vector.load %arg10[%c0_5, %c0_6] : memref<64x512xf32, #tpu.memory_space<vmem>>, vector<64x512xf32>
    tpu.vector_store %arg10[%c0_5, %c0_6], %5 {strides = array<i32>} : memref<64x512xf32, #tpu.memory_space<vmem>>, vector<64x512xf32>,
    %c0_7 = arith.constant 0 : index
    %c0_8 = arith.constant 0 : index
    %7 = vector.load %arg3[%c0_7, %c0_8] : memref<128x512xf32, #tpu.memory_space<vmem>>, vector<128x512xf32>
    %cst_9 = arith.constant 0.000000e+00 : f32
    %8 = vector.broadcast %cst_9 : f32 to vector<8x128xf32>
    %cst_10 = arith.constant 0.000000e+00 : f32
    %9 = vector.broadcast %cst_10 : f32 to vector<8x128xf32>
    %c0_i32 = arith.constant 0 : i32
    %c8_i32 = arith.constant 8 : i32
    %10 = arith.muli %c0_i32, %c8_i32 : i32
    %11 = tpu.assume_multiple %10, 8 : i32
    %12 = arith.index_cast %11 : i32 to index
    %c0_11 = arith.constant 0 : index
    %13 = vector.load %arg10[%12, %c0_11] : memref<64x512xf32, #tpu.memory_space<vmem>>, vector<8x512xf32>
    %cst_12 = arith.constant dense<0.000000e+00> : vector<8x512xf32>
    %14 = tpu.matmul %8, %7, %cst_12 {dimension_numbers = #tpu.dot_dimension_numbers<[1], [0], [0], [1], [0, 0, 1, 1], [], []>} : vector<8x128xf32>, vector<128x512xf32>, vector<8x512xf32> -> vector<8x512xf32>
    %15 = arith.addf %13, %14 : vector<8x512xf32>
    %16 = vector.extract_strided_slice %15 {offsets = [0, 0], sizes = [8, 128], strides = [1, 1]} : vector<8x512xf32> to vector<8x128xf32>
    %17 = arith.negf %16 : vector<8x128xf32>
    %18 = math.exp %17 : vector<8x128xf32>
    %cst_13 = arith.constant 1.000000e+00 : f32
    %19 = vector.broadcast %cst_13 : f32 to vector<8x128xf32>
    %20 = arith.addf %19, %18 : vector<8x128xf32>
    %21 = arith.divf %19, %20 : vector<8x128xf32>
    %22 = vector.extract_strided_slice %15 {offsets = [0, 128], sizes = [8, 128], strides = [1, 1]} : vector<8x512xf32> to vector<8x128xf32>
    %23 = arith.negf %22 : vector<8x128xf32>
    %24 = math.exp %23 : vector<8x128xf32>
    %cst_14 = arith.constant 1.000000e+00 : f32
    %25 = vector.broadcast %cst_14 : f32 to vector<8x128xf32>
    %26 = arith.addf %25, %24 : vector<8x128xf32>
    %27 = arith.divf %25, %26 : vector<8x128xf32>
    %28 = vector.extract_strided_slice %15 {offsets = [0, 256], sizes = [8, 128], strides = [1, 1]} : vector<8x512xf32> to vector<8x128xf32>
    %29 = math.tanh %28 : vector<8x128xf32>
    %30 = vector.extract_strided_slice %15 {offsets = [0, 384], sizes = [8, 128], strides = [1, 1]} : vector<8x512xf32> to vector<8x128xf32>
    %31 = arith.negf %30 : vector<8x128xf32>
    %32 = math.exp %31 : vector<8x128xf32>
    %cst_15 = arith.constant 1.000000e+00 : f32
    %33 = vector.broadcast %cst_15 : f32 to vector<8x128xf32>
    %34 = arith.addf %33, %32 : vector<8x128xf32>
    %35 = arith.divf %33, %34 : vector<8x128xf32>
    %36 = arith.mulf %27, %9 : vector<8x128xf32>
    %37 = arith.mulf %21, %29 : vector<8x128xf32>
    %38 = arith.addf %36, %37 : vector<8x128xf32>
    %39 = math.tanh %38 : vector<8x128xf32>
    %40 = arith.mulf %35, %39 : vector<8x128xf32>
    %41 = arith.index_cast %11 : i32 to index
    %c0_16 = arith.constant 0 : index
    %42 = vector.load %arg11[%41, %c0_16] : memref<64x128xf32, #tpu.memory_space<vmem>>, vector<8x128xf32>
    tpu.vector_store %arg11[%41, %c0_16], %40 {strides = array<i32>} : memref<64x128xf32, #tpu.memory_space<vmem>>, vector<8x128xf32>,
    %c1_i32 = arith.constant 1 : i32
    %c8_i32_17 = arith.constant 8 : i32
    %43 = arith.muli %c1_i32, %c8_i32_17 : i32
    %44 = tpu.assume_multiple %43, 8 : i32
    %45 = arith.index_cast %44 : i32 to index
    %c0_18 = arith.constant 0 : index
    %46 = vector.load %arg10[%45, %c0_18] : memref<64x512xf32, #tpu.memory_space<vmem>>, vector<8x512xf32>
    %cst_19 = arith.constant dense<0.000000e+00> : vector<8x512xf32>
    %47 = tpu.matmul %40, %7, %cst_19 {dimension_numbers = #tpu.dot_dimension_numbers<[1], [0], [0], [1], [0, 0, 1, 1], [], []>} : vector<8x128xf32>, vector<128x512xf32>, vector<8x512xf32> -> vector<8x512xf32>
    %48 = arith.addf %46, %47 : vector<8x512xf32>
    %49 = vector.extract_strided_slice %48 {offsets = [0, 0], sizes = [8, 128], strides = [1, 1]} : vector<8x512xf32> to vector<8x128xf32>
    %50 = arith.negf %49 : vector<8x128xf32>
    %51 = math.exp %50 : vector<8x128xf32>
    %cst_20 = arith.constant 1.000000e+00 : f32
    %52 = vector.broadcast %cst_20 : f32 to vector<8x128xf32>
    %53 = arith.addf %52, %51 : vector<8x128xf32>
    %54 = arith.divf %52, %53 : vector<8x128xf32>
    %55 = vector.extract_strided_slice %48 {offsets = [0, 128], sizes = [8, 128], strides = [1, 1]} : vector<8x512xf32> to vector<8x128xf32>
    %56 = arith.negf %55 : vector<8x128xf32>
    %57 = math.exp %56 : vector<8x128xf32>
    %cst_21 = arith.constant 1.000000e+00 : f32
    %58 = vector.broadcast %cst_21 : f32 to vector<8x128xf32>
    %59 = arith.addf %58, %57 : vector<8x128xf32>
    %60 = arith.divf %58, %59 : vector<8x128xf32>
    %61 = vector.extract_strided_slice %48 {offsets = [0, 256], sizes = [8, 128], strides = [1, 1]} : vector<8x512xf32> to vector<8x128xf32>
    %62 = math.tanh %61 : vector<8x128xf32>
    %63 = vector.extract_strided_slice %48 {offsets = [0, 384], sizes = [8, 128], strides = [1, 1]} : vector<8x512xf32> to vector<8x128xf32>
    %64 = arith.negf %63 : vector<8x128xf32>
    %65 = math.exp %64 : vector<8x128xf32>
    %cst_22 = arith.constant 1.000000e+00 : f32
    %66 = vector.broadcast %cst_22 : f32 to vector<8x128xf32>
    %67 = arith.addf %66, %65 : vector<8x128xf32>
    %68 = arith.divf %66, %67 : vector<8x128xf32>
    %69 = arith.mulf %60, %38 : vector<8x128xf32>
    %70 = arith.mulf %54, %62 : vector<8x128xf32>
    %71 = arith.addf %69, %70 : vector<8x128xf32>
    %72 = math.tanh %71 : vector<8x128xf32>
    %73 = arith.mulf %68, %72 : vector<8x128xf32>
    %74 = arith.index_cast %44 : i32 to index
    %c0_23 = arith.constant 0 : index
    %75 = vector.load %arg11[%74, %c0_23] : memref<64x128xf32, #tpu.memory_space<vmem>>, vector<8x128xf32>
    tpu.vector_store %arg11[%74, %c0_23], %73 {strides = array<i32>} : memref<64x128xf32, #tpu.memory_space<vmem>>, vector<8x128xf32>,
    %c2_i32 = arith.constant 2 : i32
    %c8_i32_24 = arith.constant 8 : i32
    %76 = arith.muli %c2_i32, %c8_i32_24 : i32
    %77 = tpu.assume_multiple %76, 8 : i32
    %78 = arith.index_cast %77 : i32 to index
    %c0_25 = arith.constant 0 : index
    %79 = vector.load %arg10[%78, %c0_25] : memref<64x512xf32, #tpu.memory_space<vmem>>, vector<8x512xf32>
    %cst_26 = arith.constant dense<0.000000e+00> : vector<8x512xf32>
    %80 = tpu.matmul %73, %7, %cst_26 {dimension_numbers = #tpu.dot_dimension_numbers<[1], [0], [0], [1], [0, 0, 1, 1], [], []>} : vector<8x128xf32>, vector<128x512xf32>, vector<8x512xf32> -> vector<8x512xf32>
    %81 = arith.addf %79, %80 : vector<8x512xf32>
    %82 = vector.extract_strided_slice %81 {offsets = [0, 0], sizes = [8, 128], strides = [1, 1]} : vector<8x512xf32> to vector<8x128xf32>
    %83 = arith.negf %82 : vector<8x128xf32>
    %84 = math.exp %83 : vector<8x128xf32>
    %cst_27 = arith.constant 1.000000e+00 : f32
    %85 = vector.broadcast %cst_27 : f32 to vector<8x128xf32>
    %86 = arith.addf %85, %84 : vector<8x128xf32>
    %87 = arith.divf %85, %86 : vector<8x128xf32>
    %88 = vector.extract_strided_slice %81 {offsets = [0, 128], sizes = [8, 128], strides = [1, 1]} : vector<8x512xf32> to vector<8x128xf32>
    %89 = arith.negf %88 : vector<8x128xf32>
    %90 = math.exp %89 : vector<8x128xf32>
    %cst_28 = arith.constant 1.000000e+00 : f32
    %91 = vector.broadcast %cst_28 : f32 to vector<8x128xf32>
    %92 = arith.addf %91, %90 : vector<8x128xf32>
    %93 = arith.divf %91, %92 : vector<8x128xf32>
    %94 = vector.extract_strided_slice %81 {offsets = [0, 256], sizes = [8, 128], strides = [1, 1]} : vector<8x512xf32> to vector<8x128xf32>
    %95 = math.tanh %94 : vector<8x128xf32>
    %96 = vector.extract_strided_slice %81 {offsets = [0, 384], sizes = [8, 128], strides = [1, 1]} : vector<8x512xf32> to vector<8x128xf32>
    %97 = arith.negf %96 : vector<8x128xf32>
    %98 = math.exp %97 : vector<8x128xf32>
    %cst_29 = arith.constant 1.000000e+00 : f32
    %99 = vector.broadcast %cst_29 : f32 to vector<8x128xf32>
    %100 = arith.addf %99, %98 : vector<8x128xf32>
    %101 = arith.divf %99, %100 : vector<8x128xf32>
    %102 = arith.mulf %93, %71 : vector<8x128xf32>
    %103 = arith.mulf %87, %95 : vector<8x128xf32>
    %104 = arith.addf %102, %103 : vector<8x128xf32>
    %105 = math.tanh %104 : vector<8x128xf32>
    %106 = arith.mulf %101, %105 : vector<8x128xf32>
    %107 = arith.index_cast %77 : i32 to index
    %c0_30 = arith.constant 0 : index
    %108 = vector.load %arg11[%107, %c0_30] : memref<64x128xf32, #tpu.memory_space<vmem>>, vector<8x128xf32>
    tpu.vector_store %arg11[%107, %c0_30], %106 {strides = array<i32>} : memref<64x128xf32, #tpu.memory_space<vmem>>, vector<8x128xf32>,
    %c3_i32 = arith.constant 3 : i32
    %c8_i32_31 = arith.constant 8 : i32
    %109 = arith.muli %c3_i32, %c8_i32_31 : i32
    %110 = tpu.assume_multiple %109, 8 : i32
    %111 = arith.index_cast %110 : i32 to index
    %c0_32 = arith.constant 0 : index
    %112 = vector.load %arg10[%111, %c0_32] : memref<64x512xf32, #tpu.memory_space<vmem>>, vector<8x512xf32>
    %cst_33 = arith.constant dense<0.000000e+00> : vector<8x512xf32>
    %113 = tpu.matmul %106, %7, %cst_33 {dimension_numbers = #tpu.dot_dimension_numbers<[1], [0], [0], [1], [0, 0, 1, 1], [], []>} : vector<8x128xf32>, vector<128x512xf32>, vector<8x512xf32> -> vector<8x512xf32>
    %114 = arith.addf %112, %113 : vector<8x512xf32>
    %115 = vector.extract_strided_slice %114 {offsets = [0, 0], sizes = [8, 128], strides = [1, 1]} : vector<8x512xf32> to vector<8x128xf32>
    %116 = arith.negf %115 : vector<8x128xf32>
    %117 = math.exp %116 : vector<8x128xf32>
    %cst_34 = arith.constant 1.000000e+00 : f32
    %118 = vector.broadcast %cst_34 : f32 to vector<8x128xf32>
    %119 = arith.addf %118, %117 : vector<8x128xf32>
    %120 = arith.divf %118, %119 : vector<8x128xf32>
    %121 = vector.extract_strided_slice %114 {offsets = [0, 128], sizes = [8, 128], strides = [1, 1]} : vector<8x512xf32> to vector<8x128xf32>
    %122 = arith.negf %121 : vector<8x128xf32>
    %123 = math.exp %122 : vector<8x128xf32>
    %cst_35 = arith.constant 1.000000e+00 : f32
    %124 = vector.broadcast %cst_35 : f32 to vector<8x128xf32>
    %125 = arith.addf %124, %123 : vector<8x128xf32>
    %126 = arith.divf %124, %125 : vector<8x128xf32>
    %127 = vector.extract_strided_slice %114 {offsets = [0, 256], sizes = [8, 128], strides = [1, 1]} : vector<8x512xf32> to vector<8x128xf32>
    %128 = math.tanh %127 : vector<8x128xf32>
    %129 = vector.extract_strided_slice %114 {offsets = [0, 384], sizes = [8, 128], strides = [1, 1]} : vector<8x512xf32> to vector<8x128xf32>
    %130 = arith.negf %129 : vector<8x128xf32>
    %131 = math.exp %130 : vector<8x128xf32>
    %cst_36 = arith.constant 1.000000e+00 : f32
    %132 = vector.broadcast %cst_36 : f32 to vector<8x128xf32>
    %133 = arith.addf %132, %131 : vector<8x128xf32>
    %134 = arith.divf %132, %133 : vector<8x128xf32>
    %135 = arith.mulf %126, %104 : vector<8x128xf32>
    %136 = arith.mulf %120, %128 : vector<8x128xf32>
    %137 = arith.addf %135, %136 : vector<8x128xf32>
    %138 = math.tanh %137 : vector<8x128xf32>
    %139 = arith.mulf %134, %138 : vector<8x128xf32>
    %140 = arith.index_cast %110 : i32 to index
    %c0_37 = arith.constant 0 : index
    %141 = vector.load %arg11[%140, %c0_37] : memref<64x128xf32, #tpu.memory_space<vmem>>, vector<8x128xf32>
    tpu.vector_store %arg11[%140, %c0_37], %139 {strides = array<i32>} : memref<64x128xf32, #tpu.memory_space<vmem>>, vector<8x128xf32>,
    %c4_i32 = arith.constant 4 : i32
    %c8_i32_38 = arith.constant 8 : i32
    %142 = arith.muli %c4_i32, %c8_i32_38 : i32
    %143 = tpu.assume_multiple %142, 8 : i32
    %144 = arith.index_cast %143 : i32 to index
    %c0_39 = arith.constant 0 : index
    %145 = vector.load %arg10[%144, %c0_39] : memref<64x512xf32, #tpu.memory_space<vmem>>, vector<8x512xf32>
    %cst_40 = arith.constant dense<0.000000e+00> : vector<8x512xf32>
    %146 = tpu.matmul %139, %7, %cst_40 {dimension_numbers = #tpu.dot_dimension_numbers<[1], [0], [0], [1], [0, 0, 1, 1], [], []>} : vector<8x128xf32>, vector<128x512xf32>, vector<8x512xf32> -> vector<8x512xf32>
    %147 = arith.addf %145, %146 : vector<8x512xf32>
    %148 = vector.extract_strided_slice %147 {offsets = [0, 0], sizes = [8, 128], strides = [1, 1]} : vector<8x512xf32> to vector<8x128xf32>
    %149 = arith.negf %148 : vector<8x128xf32>
    %150 = math.exp %149 : vector<8x128xf32>
    %cst_41 = arith.constant 1.000000e+00 : f32
    %151 = vector.broadcast %cst_41 : f32 to vector<8x128xf32>
    %152 = arith.addf %151, %150 : vector<8x128xf32>
    %153 = arith.divf %151, %152 : vector<8x128xf32>
    %154 = vector.extract_strided_slice %147 {offsets = [0, 128], sizes = [8, 128], strides = [1, 1]} : vector<8x512xf32> to vector<8x128xf32>
    %155 = arith.negf %154 : vector<8x128xf32>
    %156 = math.exp %155 : vector<8x128xf32>
    %cst_42 = arith.constant 1.000000e+00 : f32
    %157 = vector.broadcast %cst_42 : f32 to vector<8x128xf32>
    %158 = arith.addf %157, %156 : vector<8x128xf32>
    %159 = arith.divf %157, %158 : vector<8x128xf32>
    %160 = vector.extract_strided_slice %147 {offsets = [0, 256], sizes = [8, 128], strides = [1, 1]} : vector<8x512xf32> to vector<8x128xf32>
    %161 = math.tanh %160 : vector<8x128xf32>
    %162 = vector.extract_strided_slice %147 {offsets = [0, 384], sizes = [8, 128], strides = [1, 1]} : vector<8x512xf32> to vector<8x128xf32>
    %163 = arith.negf %162 : vector<8x128xf32>
    %164 = math.exp %163 : vector<8x128xf32>
    %cst_43 = arith.constant 1.000000e+00 : f32
    %165 = vector.broadcast %cst_43 : f32 to vector<8x128xf32>
    %166 = arith.addf %165, %164 : vector<8x128xf32>
    %167 = arith.divf %165, %166 : vector<8x128xf32>
    %168 = arith.mulf %159, %137 : vector<8x128xf32>
    %169 = arith.mulf %153, %161 : vector<8x128xf32>
    %170 = arith.addf %168, %169 : vector<8x128xf32>
    %171 = math.tanh %170 : vector<8x128xf32>
    %172 = arith.mulf %167, %171 : vector<8x128xf32>
    %173 = arith.index_cast %143 : i32 to index
    %c0_44 = arith.constant 0 : index
    %174 = vector.load %arg11[%173, %c0_44] : memref<64x128xf32, #tpu.memory_space<vmem>>, vector<8x128xf32>
    tpu.vector_store %arg11[%173, %c0_44], %172 {strides = array<i32>} : memref<64x128xf32, #tpu.memory_space<vmem>>, vector<8x128xf32>,
    %c5_i32 = arith.constant 5 : i32
    %c8_i32_45 = arith.constant 8 : i32
    %175 = arith.muli %c5_i32, %c8_i32_45 : i32
    %176 = tpu.assume_multiple %175, 8 : i32
    %177 = arith.index_cast %176 : i32 to index
    %c0_46 = arith.constant 0 : index
    %178 = vector.load %arg10[%177, %c0_46] : memref<64x512xf32, #tpu.memory_space<vmem>>, vector<8x512xf32>
    %cst_47 = arith.constant dense<0.000000e+00> : vector<8x512xf32>
    %179 = tpu.matmul %172, %7, %cst_47 {dimension_numbers = #tpu.dot_dimension_numbers<[1], [0], [0], [1], [0, 0, 1, 1], [], []>} : vector<8x128xf32>, vector<128x512xf32>, vector<8x512xf32> -> vector<8x512xf32>
    %180 = arith.addf %178, %179 : vector<8x512xf32>
    %181 = vector.extract_strided_slice %180 {offsets = [0, 0], sizes = [8, 128], strides = [1, 1]} : vector<8x512xf32> to vector<8x128xf32>
    %182 = arith.negf %181 : vector<8x128xf32>
    %183 = math.exp %182 : vector<8x128xf32>
    %cst_48 = arith.constant 1.000000e+00 : f32
    %184 = vector.broadcast %cst_48 : f32 to vector<8x128xf32>
    %185 = arith.addf %184, %183 : vector<8x128xf32>
    %186 = arith.divf %184, %185 : vector<8x128xf32>
    %187 = vector.extract_strided_slice %180 {offsets = [0, 128], sizes = [8, 128], strides = [1, 1]} : vector<8x512xf32> to vector<8x128xf32>
    %188 = arith.negf %187 : vector<8x128xf32>
    %189 = math.exp %188 : vector<8x128xf32>
    %cst_49 = arith.constant 1.000000e+00 : f32
    %190 = vector.broadcast %cst_49 : f32 to vector<8x128xf32>
    %191 = arith.addf %190, %189 : vector<8x128xf32>
    %192 = arith.divf %190, %191 : vector<8x128xf32>
    %193 = vector.extract_strided_slice %180 {offsets = [0, 256], sizes = [8, 128], strides = [1, 1]} : vector<8x512xf32> to vector<8x128xf32>
    %194 = math.tanh %193 : vector<8x128xf32>
    %195 = vector.extract_strided_slice %180 {offsets = [0, 384], sizes = [8, 128], strides = [1, 1]} : vector<8x512xf32> to vector<8x128xf32>
    %196 = arith.negf %195 : vector<8x128xf32>
    %197 = math.exp %196 : vector<8x128xf32>
    %cst_50 = arith.constant 1.000000e+00 : f32
    %198 = vector.broadcast %cst_50 : f32 to vector<8x128xf32>
    %199 = arith.addf %198, %197 : vector<8x128xf32>
    %200 = arith.divf %198, %199 : vector<8x128xf32>
    %201 = arith.mulf %192, %170 : vector<8x128xf32>
    %202 = arith.mulf %186, %194 : vector<8x128xf32>
    %203 = arith.addf %201, %202 : vector<8x128xf32>
    %204 = math.tanh %203 : vector<8x128xf32>
    %205 = arith.mulf %200, %204 : vector<8x128xf32>
    %206 = arith.index_cast %176 : i32 to index
    %c0_51 = arith.constant 0 : index
    %207 = vector.load %arg11[%206, %c0_51] : memref<64x128xf32, #tpu.memory_space<vmem>>, vector<8x128xf32>
    tpu.vector_store %arg11[%206, %c0_51], %205 {strides = array<i32>} : memref<64x128xf32, #tpu.memory_space<vmem>>, vector<8x128xf32>,
    %c6_i32 = arith.constant 6 : i32
    %c8_i32_52 = arith.constant 8 : i32
    %208 = arith.muli %c6_i32, %c8_i32_52 : i32
    %209 = tpu.assume_multiple %208, 8 : i32
    %210 = arith.index_cast %209 : i32 to index
    %c0_53 = arith.constant 0 : index
    %211 = vector.load %arg10[%210, %c0_53] : memref<64x512xf32, #tpu.memory_space<vmem>>, vector<8x512xf32>
    %cst_54 = arith.constant dense<0.000000e+00> : vector<8x512xf32>
    %212 = tpu.matmul %205, %7, %cst_54 {dimension_numbers = #tpu.dot_dimension_numbers<[1], [0], [0], [1], [0, 0, 1, 1], [], []>} : vector<8x128xf32>, vector<128x512xf32>, vector<8x512xf32> -> vector<8x512xf32>
    %213 = arith.addf %211, %212 : vector<8x512xf32>
    %214 = vector.extract_strided_slice %213 {offsets = [0, 0], sizes = [8, 128], strides = [1, 1]} : vector<8x512xf32> to vector<8x128xf32>
    %215 = arith.negf %214 : vector<8x128xf32>
    %216 = math.exp %215 : vector<8x128xf32>
    %cst_55 = arith.constant 1.000000e+00 : f32
    %217 = vector.broadcast %cst_55 : f32 to vector<8x128xf32>
    %218 = arith.addf %217, %216 : vector<8x128xf32>
    %219 = arith.divf %217, %218 : vector<8x128xf32>
    %220 = vector.extract_strided_slice %213 {offsets = [0, 128], sizes = [8, 128], strides = [1, 1]} : vector<8x512xf32> to vector<8x128xf32>
    %221 = arith.negf %220 : vector<8x128xf32>
    %222 = math.exp %221 : vector<8x128xf32>
    %cst_56 = arith.constant 1.000000e+00 : f32
    %223 = vector.broadcast %cst_56 : f32 to vector<8x128xf32>
    %224 = arith.addf %223, %222 : vector<8x128xf32>
    %225 = arith.divf %223, %224 : vector<8x128xf32>
    %226 = vector.extract_strided_slice %213 {offsets = [0, 256], sizes = [8, 128], strides = [1, 1]} : vector<8x512xf32> to vector<8x128xf32>
    %227 = math.tanh %226 : vector<8x128xf32>
    %228 = vector.extract_strided_slice %213 {offsets = [0, 384], sizes = [8, 128], strides = [1, 1]} : vector<8x512xf32> to vector<8x128xf32>
    %229 = arith.negf %228 : vector<8x128xf32>
    %230 = math.exp %229 : vector<8x128xf32>
    %cst_57 = arith.constant 1.000000e+00 : f32
    %231 = vector.broadcast %cst_57 : f32 to vector<8x128xf32>
    %232 = arith.addf %231, %230 : vector<8x128xf32>
    %233 = arith.divf %231, %232 : vector<8x128xf32>
    %234 = arith.mulf %225, %203 : vector<8x128xf32>
    %235 = arith.mulf %219, %227 : vector<8x128xf32>
    %236 = arith.addf %234, %235 : vector<8x128xf32>
    %237 = math.tanh %236 : vector<8x128xf32>
    %238 = arith.mulf %233, %237 : vector<8x128xf32>
    %239 = arith.index_cast %209 : i32 to index
    %c0_58 = arith.constant 0 : index
    %240 = vector.load %arg11[%239, %c0_58] : memref<64x128xf32, #tpu.memory_space<vmem>>, vector<8x128xf32>
    tpu.vector_store %arg11[%239, %c0_58], %238 {strides = array<i32>} : memref<64x128xf32, #tpu.memory_space<vmem>>, vector<8x128xf32>,
    %c7_i32 = arith.constant 7 : i32
    %c8_i32_59 = arith.constant 8 : i32
    %241 = arith.muli %c7_i32, %c8_i32_59 : i32
    %242 = tpu.assume_multiple %241, 8 : i32
    %243 = arith.index_cast %242 : i32 to index
    %c0_60 = arith.constant 0 : index
    %244 = vector.load %arg10[%243, %c0_60] : memref<64x512xf32, #tpu.memory_space<vmem>>, vector<8x512xf32>
    %cst_61 = arith.constant dense<0.000000e+00> : vector<8x512xf32>
    %245 = tpu.matmul %238, %7, %cst_61 {dimension_numbers = #tpu.dot_dimension_numbers<[1], [0], [0], [1], [0, 0, 1, 1], [], []>} : vector<8x128xf32>, vector<128x512xf32>, vector<8x512xf32> -> vector<8x512xf32>
    %246 = arith.addf %244, %245 : vector<8x512xf32>
    %247 = vector.extract_strided_slice %246 {offsets = [0, 0], sizes = [8, 128], strides = [1, 1]} : vector<8x512xf32> to vector<8x128xf32>
    %248 = arith.negf %247 : vector<8x128xf32>
    %249 = math.exp %248 : vector<8x128xf32>
    %cst_62 = arith.constant 1.000000e+00 : f32
    %250 = vector.broadcast %cst_62 : f32 to vector<8x128xf32>
    %251 = arith.addf %250, %249 : vector<8x128xf32>
    %252 = arith.divf %250, %251 : vector<8x128xf32>
    %253 = vector.extract_strided_slice %246 {offsets = [0, 128], sizes = [8, 128], strides = [1, 1]} : vector<8x512xf32> to vector<8x128xf32>
    %254 = arith.negf %253 : vector<8x128xf32>
    %255 = math.exp %254 : vector<8x128xf32>
    %cst_63 = arith.constant 1.000000e+00 : f32
    %256 = vector.broadcast %cst_63 : f32 to vector<8x128xf32>
    %257 = arith.addf %256, %255 : vector<8x128xf32>
    %258 = arith.divf %256, %257 : vector<8x128xf32>
    %259 = vector.extract_strided_slice %246 {offsets = [0, 256], sizes = [8, 128], strides = [1, 1]} : vector<8x512xf32> to vector<8x128xf32>
    %260 = math.tanh %259 : vector<8x128xf32>
    %261 = vector.extract_strided_slice %246 {offsets = [0, 384], sizes = [8, 128], strides = [1, 1]} : vector<8x512xf32> to vector<8x128xf32>
    %262 = arith.negf %261 : vector<8x128xf32>
    %263 = math.exp %262 : vector<8x128xf32>
    %cst_64 = arith.constant 1.000000e+00 : f32
    %264 = vector.broadcast %cst_64 : f32 to vector<8x128xf32>
    %265 = arith.addf %264, %263 : vector<8x128xf32>
    %266 = arith.divf %264, %265 : vector<8x128xf32>
    %267 = arith.mulf %258, %236 : vector<8x128xf32>
    %268 = arith.mulf %252, %260 : vector<8x128xf32>
    %269 = arith.addf %267, %268 : vector<8x128xf32>
    %270 = math.tanh %269 : vector<8x128xf32>
    %271 = arith.mulf %266, %270 : vector<8x128xf32>
    %272 = arith.index_cast %242 : i32 to index
    %c0_65 = arith.constant 0 : index
    %273 = vector.load %arg11[%272, %c0_65] : memref<64x128xf32, #tpu.memory_space<vmem>>, vector<8x128xf32>
    tpu.vector_store %arg11[%272, %c0_65], %271 {strides = array<i32>} : memref<64x128xf32, #tpu.memory_space<vmem>>, vector<8x128xf32>,
    %c8_i32_66 = arith.constant 8 : i32
    %c0_67 = arith.constant 0 : index
    %c0_68 = arith.constant 0 : index
    %274 = vector.load %arg8[%c0_67, %c0_68] : memref<8x128xf32, #tpu.memory_space<vmem>>, vector<8x128xf32>
    tpu.vector_store %arg8[%c0_67, %c0_68], %271 {strides = array<i32>} : memref<8x128xf32, #tpu.memory_space<vmem>>, vector<8x128xf32>,
    %c0_69 = arith.constant 0 : index
    %c0_70 = arith.constant 0 : index
    %275 = vector.load %arg9[%c0_69, %c0_70] : memref<8x128xf32, #tpu.memory_space<vmem>>, vector<8x128xf32>
    tpu.vector_store %arg9[%c0_69, %c0_70], %269 {strides = array<i32>} : memref<8x128xf32, #tpu.memory_space<vmem>>, vector<8x128xf32>,
    %c0_71 = arith.constant 0 : index
    %c0_72 = arith.constant 0 : index
    %276 = vector.load %arg11[%c0_71, %c0_72] : memref<64x128xf32, #tpu.memory_space<vmem>>, vector<64x128xf32>
    %c0_73 = arith.constant 0 : index
    %c0_74 = arith.constant 0 : index
    %277 = vector.load %arg5[%c0_73, %c0_74] : memref<128x128xf32, #tpu.memory_space<vmem>>, vector<128x128xf32>
    %cst_75 = arith.constant dense<0.000000e+00> : vector<64x128xf32>
    %278 = tpu.matmul %276, %277, %cst_75 {dimension_numbers = #tpu.dot_dimension_numbers<[1], [0], [0], [1], [0, 0, 1, 1], [], []>} : vector<64x128xf32>, vector<128x128xf32>, vector<64x128xf32> -> vector<64x128xf32>
    %c0_76 = arith.constant 0 : index
    %c0_77 = arith.constant 0 : index
    %279 = vector.load %arg6[%c0_76, %c0_77] : memref<1x128xf32, #tpu.memory_space<vmem>>, vector<1x128xf32>
    %280 = vector.broadcast %279 : vector<1x128xf32> to vector<64x128xf32>
    %281 = arith.addf %278, %280 : vector<64x128xf32>
    %c0_78 = arith.constant 0 : index
    %c0_79 = arith.constant 0 : index
    %282 = vector.load %arg7[%c0_78, %c0_79] : memref<64x128xf32, #tpu.memory_space<vmem>>, vector<64x128xf32>
    tpu.vector_store %arg7[%c0_78, %c0_79], %281 {strides = array<i32>} : memref<64x128xf32, #tpu.memory_space<vmem>>, vector<64x128xf32>,
    return
  }
  func.func @transform_0(%arg0: i32) -> (i32, i32) {
    %c0_i32 = arith.constant 0 : i32
    %c0_i32_0 = arith.constant 0 : i32
    %c0_i32_1 = arith.constant 0 : i32
    return %c0_i32, %c0_i32_0 : i32, i32
  }
  func.func @transform_1(%arg0: i32) -> (i32, i32) {
    %c0_i32 = arith.constant 0 : i32
    %c0_i32_0 = arith.constant 0 : i32
    %c0_i32_1 = arith.constant 0 : i32
    return %c0_i32, %c0_i32_0 : i32, i32
  }
  func.func @transform_2(%arg0: i32) -> (i32, i32) {
    %c0_i32 = arith.constant 0 : i32
    %c0_i32_0 = arith.constant 0 : i32
    %c0_i32_1 = arith.constant 0 : i32
    return %c0_i32, %c0_i32_0 : i32, i32
  }
  func.func @transform_3(%arg0: i32) -> (i32, i32) {
    %c0_i32 = arith.constant 0 : i32
    %c0_i32_0 = arith.constant 0 : i32
    %c0_i32_1 = arith.constant 0 : i32
    return %c0_i32, %c0_i32_0 : i32, i32
  }
  func.func @transform_4(%arg0: i32) -> (i32, i32) {
    %c0_i32 = arith.constant 0 : i32
    %c0_i32_0 = arith.constant 0 : i32
    %c0_i32_1 = arith.constant 0 : i32
    return %c0_i32, %c0_i32_0 : i32, i32
  }
  func.func @transform_5(%arg0: i32) -> (i32, i32) {
    %c0_i32 = arith.constant 0 : i32
    %c0_i32_0 = arith.constant 0 : i32
    %c0_i32_1 = arith.constant 0 : i32
    return %c0_i32, %c0_i32_0 : i32, i32
  }
  func.func @transform_6(%arg0: i32) -> (i32, i32) {
    %c0_i32 = arith.constant 0 : i32
    %c0_i32_0 = arith.constant 0 : i32
    %c0_i32_1 = arith.constant 0 : i32
    return %c0_i32, %c0_i32_0 : i32, i32
  }
  func.func @transform_7(%arg0: i32) -> (i32, i32) {
    %c0_i32 = arith.constant 0 : i32
    %c0_i32_0 = arith.constant 0 : i32
    %c0_i32_1 = arith.constant 0 : i32
    return %c0_i32, %c0_i32_0 : i32, i32
  }
  func.func @transform_8(%arg0: i32) -> (i32, i32) {
    %c0_i32 = arith.constant 0 : i32
    %c0_i32_0 = arith.constant 0 : i32
    %c0_i32_1 = arith.constant 0 : i32
    return %c0_i32, %c0_i32_0 : i32, i32
  }
}

</mosaic_0001>

<bundles_post_ra>
// kernel: tpu_custom_call.1
= control target key start
LH: loop header
LB: loop body
LE: loop exit
PB: predicated region body
PF: predicated region fallthrough
CT: control target
= control target key end

     0   :  { %14 = vsyncpa [#allocation5], 0  ;;  %s3360_s0 = inlined_call_operand.hbm [shape: f32[64,128], index: 0, kind: input, shape index: {}]   ;;  %s3361_s1 = inlined_call_operand.hbm [shape: f32[128,512], index: 1, kind: input, shape index: {}]   ;;  %s3362_s2 = inlined_call_operand.hbm [shape: f32[128,512], index: 2, kind: input, shape index: {}]   ;;  %s3363_s3 = inlined_call_operand.hbm [shape: f32[1,512], index: 3, kind: input, shape index: {}]   ;;  %s3364_s4 = inlined_call_operand.hbm [shape: f32[128,128], index: 4, kind: input, shape index: {}]   ;;  %s3365_s5 = inlined_call_operand.vmem [shape: f32[1,128], index: 5, kind: input, shape index: {}]   ;;  %s3366_s6 = inlined_call_operand.hbm [shape: f32[64,128], index: 6, kind: output, shape index: {0}]   ;;  %s3367_s7 = inlined_call_operand.hbm [shape: f32[8,128], index: 7, kind: output, shape index: {1}]   ;;  %s3368_s8 = inlined_call_operand.hbm [shape: f32[8,128], index: 8, kind: output, shape index: {2}]  }
   0x1   :  { %15 = vsyncpa [#allocation8], 0 }
   0x2   :  { %16 = vsyncpa [#allocation11], 0 }
   0x3   :  { %17 = vsyncpa [#allocation6], 0  ;;  %s36_s29 = sshll.u32 %s3361_s1, 4  ;;  %s37_s29 = int_to_ptr.hbm [resolvable:$true] %s36_s29 }
   0x4   :  { %18 = vsyncpa [#allocation15], 0  ;;  %s2295_s30 = smov [#allocation7]   ;;  %s63_s12 = sshll.u32 %s3363_s3, 4  ;;  %s64_s12 = int_to_ptr.hbm [resolvable:$true] %s63_s12 }
   0x5   :  { %s38_s9 = sshll.u32 %s2295_s30, 4  ;;  %s2296_s13 = smov 512   ;;  %s39_s9 = int_to_ptr.vmem [resolvable:$true] %s38_s9 }
   0x6   :  { %s2297_s14 = smov 32   ;;  %s2298_s15 = smov [#allocation10]  }
   0x7   :  { %44 = dma.hbm_to_vmem [thread:$0]  %s37_s29, 8192, %s39_s9, [#allocation8], %s2296_s13, %s2296_s13, %s2297_s14  }
   0x8   :  { %s65_s16 = sshll.u32 %s2298_s15, 4  ;;  %s23_s19 = sshll.u32 %s3360_s0, 4  ;;  %s66_s16 = int_to_ptr.vmem [resolvable:$true] %s65_s16  ;;  %s24_s19 = int_to_ptr.hbm [resolvable:$true] %s23_s19 }
   0x9   :  { %68 = dma.hbm_to_vmem [thread:$0]  %s64_s12, 64, %s66_s16, [#allocation11]  }
   0xa   :  { %s2299_s1 = smov [#allocation4]   ;;  %s49_s3 = sshll.u32 %s3362_s2, 4  ;;  %s50_s3 = int_to_ptr.hbm [resolvable:$true] %s49_s3 }
   0xb   :  { %s25_s20 = sshll.u32 %s2299_s1, 4  ;;  %s2300_s23 = smov 128   ;;  %s26_s20 = int_to_ptr.vmem [resolvable:$true] %s25_s20 }
   0xc   :  { %s2301_s24 = smov 8   ;;  %s2302_s25 = smov [#allocation9]  }
   0xd   :  { %31 = dma.hbm_to_vmem [thread:$0]  %s24_s19, 1024, %s26_s20, [#allocation5], %s2300_s23, %s2300_s23, %s2301_s24  }
   0xe   :  { %s51_s26 = sshll.u32 %s2302_s25, 4  ;;  %s73_s28 = sshll.u32 %s3364_s4, 4  ;;  %s52_s26 = int_to_ptr.vmem [resolvable:$true] %s51_s26  ;;  %s74_s28 = int_to_ptr.hbm [resolvable:$true] %s73_s28 }
   0xf   :  { %57 = dma.hbm_to_vmem [thread:$0]  %s50_s3, 8192, %s52_s26, [#allocation8], %s2296_s13, %s2296_s13, %s2297_s14  }
  0x10   :  { %s2303_s29 = smov [#allocation12]  }
  0x11   :  { %s75_s30 = sshll.u32 %s2303_s29, 4  ;;  %s76_s30 = int_to_ptr.vmem [resolvable:$true] %s75_s30 }
  0x12   :  { %81 = dma.hbm_to_vmem [thread:$0]  %s74_s28, 2048, %s76_s30, [#allocation11], %s2300_s23, %s2300_s23, %s2301_s24  }
  0x13   :  { %2285 = dma.done.wait [#allocation5], 1024  }
  0x14   :  { %2286 = vsyncadd [#allocation5], 4294966272 }
  0x15   :  { %2287 = dma.done.wait [#allocation8], 16384  }
  0x16   :  { %2288 = vsyncadd [#allocation8], 4294950912 }
  0x17   :  { %2289 = dma.done.wait [#allocation11], 2112  }
  0x18   :  { %2290 = vsyncadd [#allocation11], 4294965184  ;;  %v172_v0 = vld [vmem:[#allocation7 + $0x1e0] sm:$0xff]  ;;  %v175_v1 = vld [vmem:[#allocation7 + $0x1f8] sm:$0xff]  ;;  %v3369_v57 = vmov 0.0   ;;  %s1792_s12 = sshll.u32 %s3367_s7, 4  ;;  %s1793_s12 = int_to_ptr.hbm [resolvable:$true] %s1792_s12 }
  0x19   :  { %v168_v2 = vld [vmem:[#allocation7 + $0x1c0] sm:$0xff]  ;;  %186 = vmatpush.msra.mxu1 %v172_v0  ;;  %1855 = vmatpush.msra.mxu2 %v172_v0  ;;  %v171_v3 = vld [vmem:[#allocation7 + $0x1d8] sm:$0xff]  ;;  %v173_v49 = vld [vmem:[#allocation7 + $0x1e8] sm:$0xff]  ;;  %s2306_s13 = smov [#allocation16]   ;;  %s1803_s17 = sshll.u32 %s3368_s8, 4  ;;  %s1804_s17 = int_to_ptr.hbm [resolvable:$true] %s1803_s17 }
  0x1a   :  { %v2374_v4 = vld [vmem:[#allocation9 + $0x1e0] sm:$0xff]  ;;  %309 = vmatpush.msra.mxu3 %v175_v1  ;;  %v167_v7 = vld [vmem:[#allocation7 + $0x1b8] sm:$0xff]  ;;  %v174_v50 = vld [vmem:[#allocation7 + $0x1f0] sm:$0xff]  ;;  %s1801_s14 = sshll.u32 %s2306_s13, 4  ;;  %s2307_s7 = smov [#allocation13]   ;;  %s1802_s14 = int_to_ptr.vmem [resolvable:$true] %s1801_s14 }
  0x1b   :  { %453 = vmatpush.msra.mxu0 %v2374_v4  ;;  %v164_v5 = vld [vmem:[#allocation7 + $0x1a0] sm:$0xff]  ;;  %187 = vmatpush.msra.mxu1 %v168_v2  ;;  %v163_v10 = vld [vmem:[#allocation7 + $0x198] sm:$0xff]  ;;  %v169_v52 = vld [vmem:[#allocation7 + $0x1c8] sm:$0xff]  ;;  %s1776_s18 = sshll.u32 %s2307_s7, 4  ;;  %s1778_s20 = sshll.u32 %s3366_s6, 4  ;;  %s1777_s18 = int_to_ptr.vmem [resolvable:$true] %s1776_s18  ;;  %s1779_s20 = int_to_ptr.hbm [resolvable:$true] %s1778_s20 }
  0x1c   :  { %v2377_v6 = vld [vmem:[#allocation9 + $0x1c0] sm:$0xff]  ;;  %1856 = vmatpush.msra.mxu2 %v168_v2  ;;  %310 = vmatpush.msra.mxu3 %v171_v3  ;;  %v159_v13 = vld [vmem:[#allocation7 + $0x178] sm:$0xff]  ;;  %v170_v53 = vld [vmem:[#allocation7 + $0x1d0] sm:$0xff] }
  0x1d   :  { %v2379_v8 = vld [vmem:[#allocation9 + $0x1a0] sm:$0xff]  ;;  %454 = vmatpush.msra.mxu0 %v2377_v6  ;;  %188 = vmatpush.msra.mxu1 %v164_v5  ;;  %v155_v16 = vld [vmem:[#allocation7 + $0x158] sm:$0xff]  ;;  %v165_v54 = vld [vmem:[#allocation7 + $0x1a8] sm:$0xff] }
  0x1e   :  { %v160_v9 = vld [vmem:[#allocation7 + $0x180] sm:$0xff]  ;;  %1857 = vmatpush.msra.mxu2 %v164_v5  ;;  %311 = vmatpush.msra.mxu3 %v167_v7  ;;  %v151_v19 = vld [vmem:[#allocation7 + $0x138] sm:$0xff]  ;;  %v166_v56 = vld [vmem:[#allocation7 + $0x1b0] sm:$0xff] }
  0x1f   :  { %v2382_v11 = vld [vmem:[#allocation9 + $0x180] sm:$0xff]  ;;  %455 = vmatpush.msra.mxu0 %v2379_v8  ;;  %189 = vmatpush.msra.mxu1 %v160_v9  ;;  %v147_v22 = vld [vmem:[#allocation7 + $0x118] sm:$0xff]  ;;  %v161_v58 = vld [vmem:[#allocation7 + $0x188] sm:$0xff] }
  0x20   :  { %v156_v12 = vld [vmem:[#allocation7 + $0x160] sm:$0xff]  ;;  %1858 = vmatpush.msra.mxu2 %v160_v9  ;;  %312 = vmatpush.msra.mxu3 %v163_v10  ;;  %v143_v25 = vld [vmem:[#allocation7 + $0xf8] sm:$0xff]  ;;  %v162_v60 = vld [vmem:[#allocation7 + $0x190] sm:$0xff] }
  0x21   :  { %v2385_v14 = vld [vmem:[#allocation9 + $0x160] sm:$0xff]  ;;  %456 = vmatpush.msra.mxu0 %v2382_v11  ;;  %190 = vmatpush.msra.mxu1 %v156_v12  ;;  %v139_v28 = vld [vmem:[#allocation7 + $0xd8] sm:$0xff]  ;;  %v2434_v61 = vld [vmem:[#allocation4 + $0x8] sm:$0xff] }
  0x22   :  { %v152_v15 = vld [vmem:[#allocation7 + $0x140] sm:$0xff]  ;;  %1859 = vmatpush.msra.mxu2 %v156_v12  ;;  %313 = vmatpush.msra.mxu3 %v159_v13  ;;  %v135_v31 = vld [vmem:[#allocation7 + $0xb8] sm:$0xff]  ;;  %v2437_v62 = vld [vmem:[#allocation4 + $0x28] sm:$0xff] }
  0x23   :  { %v2388_v17 = vld [vmem:[#allocation9 + $0x140] sm:$0xff]  ;;  %457 = vmatpush.msra.mxu0 %v2385_v14  ;;  %191 = vmatpush.msra.mxu1 %v152_v15  ;;  %v131_v34 = vld [vmem:[#allocation7 + $0x98] sm:$0xff]  ;;  %v157_v63 = vld [vmem:[#allocation7 + $0x168] sm:$0xff] }
  0x24   :  { %v148_v18 = vld [vmem:[#allocation7 + $0x120] sm:$0xff]  ;;  %1860 = vmatpush.msra.mxu2 %v152_v15  ;;  %314 = vmatpush.msra.mxu3 %v155_v16  ;;  %v127_v37 = vld [vmem:[#allocation7 + $0x78] sm:$0xff]  ;;  %v158_v0 = vld [vmem:[#allocation7 + $0x170] sm:$0xff] }
  0x25   :  { %v2391_v20 = vld [vmem:[#allocation9 + $0x120] sm:$0xff]  ;;  %458 = vmatpush.msra.mxu0 %v2388_v17  ;;  %192 = vmatpush.msra.mxu1 %v148_v18  ;;  %v123_v40 = vld [vmem:[#allocation7 + $0x58] sm:$0xff]  ;;  %v153_v1 = vld [vmem:[#allocation7 + $0x148] sm:$0xff] }
  0x26   :  { %v144_v21 = vld [vmem:[#allocation7 + $0x100] sm:$0xff]  ;;  %1861 = vmatpush.msra.mxu2 %v148_v18  ;;  %315 = vmatpush.msra.mxu3 %v151_v19  ;;  %v119_v43 = vld [vmem:[#allocation7 + $0x38] sm:$0xff]  ;;  %v154_v3 = vld [vmem:[#allocation7 + $0x150] sm:$0xff] }
  0x27   :  { %v2394_v23 = vld [vmem:[#allocation9 + $0x100] sm:$0xff]  ;;  %459 = vmatpush.msra.mxu0 %v2391_v20  ;;  %193 = vmatpush.msra.mxu1 %v144_v21  ;;  %v115_v46 = vld [vmem:[#allocation7 + $0x18] sm:$0xff]  ;;  %v149_v5 = vld [vmem:[#allocation7 + $0x128] sm:$0xff] }
  0x28   :  { %v140_v24 = vld [vmem:[#allocation7 + $0xe0] sm:$0xff]  ;;  %1862 = vmatpush.msra.mxu2 %v144_v21  ;;  %316 = vmatpush.msra.mxu3 %v147_v22  ;;  %v2428_v55 = vld [vmem:[#allocation9 + $0x1f8] sm:$0xff]  ;;  %v150_v9 = vld [vmem:[#allocation7 + $0x130] sm:$0xff] }
  0x29   :  { %v2397_v26 = vld [vmem:[#allocation9 + $0xe0] sm:$0xff]  ;;  %460 = vmatpush.msra.mxu0 %v2394_v23  ;;  %194 = vmatpush.msra.mxu1 %v140_v24  ;;  %v2432_v59 = vld [vmem:[#allocation9 + $0x1d8] sm:$0xff]  ;;  %v145_v10 = vld [vmem:[#allocation7 + $0x108] sm:$0xff] }
  0x2a   :  { %v136_v27 = vld [vmem:[#allocation7 + $0xc0] sm:$0xff]  ;;  %1863 = vmatpush.msra.mxu2 %v140_v24  ;;  %317 = vmatpush.msra.mxu3 %v143_v25  ;;  %v2442_v2 = vld [vmem:[#allocation9 + $0x1b8] sm:$0xff]  ;;  %v146_v13 = vld [vmem:[#allocation7 + $0x110] sm:$0xff] }
  0x2b   :  { %v2400_v29 = vld [vmem:[#allocation9 + $0xc0] sm:$0xff]  ;;  %461 = vmatpush.msra.mxu0 %v2397_v26  ;;  %195 = vmatpush.msra.mxu1 %v136_v27  ;;  %v2446_v7 = vld [vmem:[#allocation9 + $0x198] sm:$0xff]  ;;  %v2452_v15 = vld [vmem:[#allocation4 + $0x10] sm:$0xff] }
  0x2c   :  { %3449 = vst [vmem:[#allocation22_spill] sm:$0xff] %v2400_v29  ;;  %v132_v30 = vld [vmem:[#allocation7 + $0xa0] sm:$0xff]  ;;  %1864 = vmatpush.msra.mxu2 %v136_v27  ;;  %318 = vmatpush.msra.mxu3 %v139_v28  ;;  %v2449_v12 = vld [vmem:[#allocation9 + $0x178] sm:$0xff]  ;;  %v2455_v16 = vld [vmem:[#allocation4 + $0x30] sm:$0xff] }
  0x2d   :  { %v2403_v32 = vld [vmem:[#allocation9 + $0xa0] sm:$0xff]  ;;  %462 = vmatpush.msra.mxu0 %v2400_v29  ;;  %196 = vmatpush.msra.mxu1 %v132_v30  ;;  %v141_v18 = vld [vmem:[#allocation7 + $0xe8] sm:$0xff]  ;;  %v142_v19 = vld [vmem:[#allocation7 + $0xf0] sm:$0xff] }
  0x2e   :  { %3450 = vst [vmem:[#allocation23_spill] sm:$0xff] %v2403_v32  ;;  %v128_v33 = vld [vmem:[#allocation7 + $0x80] sm:$0xff]  ;;  %1865 = vmatpush.msra.mxu2 %v132_v30  ;;  %319 = vmatpush.msra.mxu3 %v135_v31  ;;  %v137_v21 = vld [vmem:[#allocation7 + $0xc8] sm:$0xff]  ;;  %v2460_v22 = vld [vmem:[#allocation9 + $0x158] sm:$0xff] }
  0x2f   :  { %v2406_v35 = vld [vmem:[#allocation9 + $0x80] sm:$0xff]  ;;  %463 = vmatpush.msra.mxu0 %v2403_v32  ;;  %197 = vmatpush.msra.mxu1 %v128_v33  ;;  %v138_v24 = vld [vmem:[#allocation7 + $0xd0] sm:$0xff]  ;;  %v133_v25 = vld [vmem:[#allocation7 + $0xa8] sm:$0xff] }
  0x30   :  { %3451 = vst [vmem:[#allocation24_spill] sm:$0xff] %v2406_v35  ;;  %v124_v36 = vld [vmem:[#allocation7 + $0x60] sm:$0xff]  ;;  %1866 = vmatpush.msra.mxu2 %v128_v33  ;;  %320 = vmatpush.msra.mxu3 %v131_v34  ;;  %v2464_v27 = vld [vmem:[#allocation9 + $0x138] sm:$0xff]  ;;  %v134_v28 = vld [vmem:[#allocation7 + $0xb0] sm:$0xff] }
  0x31   :  { %v2409_v38 = vld [vmem:[#allocation9 + $0x60] sm:$0xff]  ;;  %464 = vmatpush.msra.mxu0 %v2406_v35  ;;  %198 = vmatpush.msra.mxu1 %v124_v36  ;;  %v129_v30 = vld [vmem:[#allocation7 + $0x88] sm:$0xff]  ;;  %v2467_v31 = vld [vmem:[#allocation9 + $0x118] sm:$0xff] }
  0x32   :  { %3452 = vst [vmem:[#allocation25_spill] sm:$0xff] %v2409_v38  ;;  %v120_v39 = vld [vmem:[#allocation7 + $0x40] sm:$0xff]  ;;  %1867 = vmatpush.msra.mxu2 %v124_v36  ;;  %321 = vmatpush.msra.mxu3 %v127_v37  ;;  %v130_v33 = vld [vmem:[#allocation7 + $0x90] sm:$0xff]  ;;  %v2470_v34 = vld [vmem:[#allocation4 + $0x18] sm:$0xff] }
  0x33   :  { %v2412_v41 = vld [vmem:[#allocation9 + $0x40] sm:$0xff]  ;;  %465 = vmatpush.msra.mxu0 %v2409_v38  ;;  %199 = vmatpush.msra.mxu1 %v120_v39  ;;  %v2473_v36 = vld [vmem:[#allocation4 + $0x38] sm:$0xff]  ;;  %v125_v37 = vld [vmem:[#allocation7 + $0x68] sm:$0xff] }
  0x34   :  { %3453 = vst [vmem:[#allocation26_spill] sm:$0xff] %v2412_v41  ;;  %v116_v42 = vld [vmem:[#allocation7 + $0x20] sm:$0xff]  ;;  %1868 = vmatpush.msra.mxu2 %v120_v39  ;;  %322 = vmatpush.msra.mxu3 %v123_v40  ;;  %v126_v39 = vld [vmem:[#allocation7 + $0x70] sm:$0xff]  ;;  %v121_v40 = vld [vmem:[#allocation7 + $0x48] sm:$0xff] }
  0x35   :  { %v2415_v44 = vld [vmem:[#allocation9 + $0x20] sm:$0xff]  ;;  %466 = vmatpush.msra.mxu0 %v2412_v41  ;;  %200 = vmatpush.msra.mxu1 %v116_v42 }
  0x36   :  { %v112_v45 = vld [vmem:[#allocation7] sm:$0xff]  ;;  %1869 = vmatpush.msra.mxu2 %v116_v42  ;;  %323 = vmatpush.msra.mxu3 %v119_v43  ;;  %v2478_v42 = vld [vmem:[#allocation9 + $0xf8] sm:$0xff]  ;;  %v122_v43 = vld [vmem:[#allocation7 + $0x50] sm:$0xff] }
  0x37   :  { %v2418_v47 = vld [vmem:[#allocation4] sm:$0xff]  ;;  %467 = vmatpush.msra.mxu0 %v2415_v44  ;;  %201 = vmatpush.msra.mxu1 %v112_v45 }
  0x38   :  { %v2421_v48 = vld [vmem:[#allocation4 + $0x20] sm:$0xff]  ;;  %1870 = vmatpush.msra.mxu2 %v112_v45  ;;  %324 = vmatpush.msra.mxu3 %v115_v46  ;;  %v117_v45 = vld [vmem:[#allocation7 + $0x28] sm:$0xff]  ;;  %v2482_v46 = vld [vmem:[#allocation9 + $0xd8] sm:$0xff] }
  0x39   :  { %202 = vmatmul.f32.vlgmr.msra.gmra.mxu1 %v2418_v47  ;;  %v2424_v51 = vld [vmem:[#allocation9] sm:$0xff]  ;;  %214 = vmatmul.f32.vlgmr.msra.gmra.mxu2 %v2421_v48 }
  0x3a   :  { %227 = vmatpush.msrb.mxu1 %v173_v49  ;;  %325 = vmatmul.f32.vlgmr.msra.gmra.mxu3 %v2418_v47  ;;  %v118_v49 = vld [vmem:[#allocation7 + $0x30] sm:$0xff] }
  0x3b   :  { %268 = vmatpush.msrb.mxu2 %v174_v50  ;;  %468 = vmatpush.msra.mxu0 %v2424_v51  ;;  %v113_v50 = vld [vmem:[#allocation7 + $0x8] sm:$0xff] }
  0x3c   :  { %228 = vmatpush.msrb.mxu1 %v169_v52  ;;  %469 = vmatmul.f32.vlgmr.msra.gmra.mxu0 %v3369_v57  ;;  %v2485_v52 = vld [vmem:[#allocation9 + $0xb8] sm:$0xff]  ;;  %v2604_v57 = vld [vmem:[#allocation9 + $0x70] sm:$0xff] }
  0x3d   :  { %269 = vmatpush.msrb.mxu2 %v170_v53  ;;  %513 = vmatpush.msrb.mxu3 %v2428_v55  ;;  %v114_v53 = vld [vmem:[#allocation7 + $0x10] sm:$0xff]  ;;  %3459 = vst [vmem:[#allocation32_spill] sm:$0xff] %v2604_v57 }
  0x3e   :  { %229 = vmatpush.msrb.mxu1 %v165_v54  ;;  %608 = vmatpush.msrb.mxu0 %v2374_v4  ;;  %v2489_v54 = vld [vmem:[#allocation9 + $0x1e8] sm:$0xff] }
  0x3f   :  { %270 = vmatpush.msrb.mxu2 %v166_v56  ;;  %514 = vmatpush.msrb.mxu3 %v2432_v59  ;;  %v2492_v56 = vld [vmem:[#allocation9 + $0x1f0] sm:$0xff] }
  0x40   :  { %230 = vmatpush.msrb.mxu1 %v161_v58  ;;  %609 = vmatpush.msrb.mxu0 %v2377_v6  ;;  %v2496_v58 = vld [vmem:[#allocation9 + $0x1c8] sm:$0xff] }
  0x41   :  { %271 = vmatpush.msrb.mxu2 %v162_v60  ;;  %205 = vmatmul.f32.gmra.mxu1 %v2434_v61  ;;  %v2498_v60 = vld [vmem:[#allocation9 + $0x98] sm:$0xff] }
  0x42   :  { %217 = vmatmul.f32.gmra.mxu2 %v2437_v62  ;;  %231 = vmatpush.msrb.mxu1 %v157_v63  ;;  %v2502_v63 = vld [vmem:[#allocation9 + $0x1d0] sm:$0xff] }
  0x43   :  { %328 = vmatmul.f32.gmra.mxu3 %v2434_v61  ;;  %272 = vmatpush.msrb.mxu2 %v158_v0  ;;  %v2505_v0 = vld [vmem:[#allocation9 + $0x1a8] sm:$0xff] }
  0x44   :  { %232 = vmatpush.msrb.mxu1 %v153_v1  ;;  %515 = vmatpush.msrb.mxu3 %v2442_v2  ;;  %v2508_v1 = vld [vmem:[#allocation9 + $0x78] sm:$0xff] }
  0x45   :  { %273 = vmatpush.msrb.mxu2 %v154_v3  ;;  %610 = vmatpush.msrb.mxu0 %v2379_v8  ;;  %3454 = vst [vmem:[#allocation27_spill] sm:$0xff] %v2508_v1  ;;  %v2511_v3 = vld [vmem:[#allocation9 + $0x1b0] sm:$0xff] }
  0x46   :  { %233 = vmatpush.msrb.mxu1 %v149_v5  ;;  %516 = vmatpush.msrb.mxu3 %v2446_v7  ;;  %v2514_v5 = vld [vmem:[#allocation9 + $0x188] sm:$0xff] }
  0x47   :  { %274 = vmatpush.msrb.mxu2 %v150_v9  ;;  %611 = vmatpush.msrb.mxu0 %v2382_v11  ;;  %v2522_v9 = vld [vmem:[#allocation9 + $0x190] sm:$0xff] }
  0x48   :  { %234 = vmatpush.msrb.mxu1 %v145_v10  ;;  %517 = vmatpush.msrb.mxu3 %v2449_v12  ;;  %v2524_v10 = vld [vmem:[#allocation9 + $0x168] sm:$0xff] }
  0x49   :  { %275 = vmatpush.msrb.mxu2 %v146_v13  ;;  %208 = vmatmul.f32.gmra.mxu1 %v2452_v15  ;;  %v2530_v13 = vld [vmem:[#allocation9 + $0x170] sm:$0xff] }
  0x4a   :  { %220 = vmatmul.f32.gmra.mxu2 %v2455_v16  ;;  %235 = vmatpush.msrb.mxu1 %v141_v18  ;;  %v2533_v18 = vld [vmem:[#allocation9 + $0x148] sm:$0xff] }
  0x4b   :  { %331 = vmatmul.f32.gmra.mxu3 %v2452_v15  ;;  %276 = vmatpush.msrb.mxu2 %v142_v19  ;;  %v2536_v19 = vld [vmem:[#allocation9 + $0x38] sm:$0xff] }
  0x4c   :  { %236 = vmatpush.msrb.mxu1 %v137_v21  ;;  %518 = vmatpush.msrb.mxu3 %v2460_v22  ;;  %3456 = vst [vmem:[#allocation29_spill] sm:$0xff] %v2536_v19  ;;  %v2540_v21 = vld [vmem:[#allocation9 + $0x150] sm:$0xff] }
  0x4d   :  { %277 = vmatpush.msrb.mxu2 %v138_v24  ;;  %612 = vmatpush.msrb.mxu0 %v2385_v14  ;;  %v2543_v24 = vld [vmem:[#allocation9 + $0x128] sm:$0xff] }
  0x4e   :  { %237 = vmatpush.msrb.mxu1 %v133_v25  ;;  %519 = vmatpush.msrb.mxu3 %v2464_v27  ;;  %v2546_v25 = vld [vmem:[#allocation9 + $0x18] sm:$0xff] }
  0x4f   :  { %278 = vmatpush.msrb.mxu2 %v134_v28  ;;  %613 = vmatpush.msrb.mxu0 %v2388_v17  ;;  %3457 = vst [vmem:[#allocation30_spill] sm:$0xff] %v2546_v25  ;;  %v2550_v28 = vld [vmem:[#allocation9 + $0x130] sm:$0xff] }
  0x50   :  { %238 = vmatpush.msrb.mxu1 %v129_v30  ;;  %520 = vmatpush.msrb.mxu3 %v2467_v31  ;;  %v2552_v30 = vld [vmem:[#allocation9 + $0x108] sm:$0xff] }
  0x51   :  { %279 = vmatpush.msrb.mxu2 %v130_v33  ;;  %211 = vmatmul.f32.gmra.mxu1 %v2470_v34  ;;  %v2560_v33 = vld [vmem:[#allocation9 + $0xe8] sm:$0xff] }
  0x52   :  { %223 = vmatmul.f32.gmra.mxu2 %v2473_v36  ;;  %239 = vmatpush.msrb.mxu1 %v125_v37  ;;  %v2565_v37 = vld [vmem:[#allocation9 + $0xf0] sm:$0xff] }
  0x53   :  { %334 = vmatmul.f32.gmra.mxu3 %v2470_v34  ;;  %280 = vmatpush.msrb.mxu2 %v126_v39  ;;  %v2569_v39 = vld [vmem:[#allocation9 + $0xc8] sm:$0xff] }
  0x54   :  { %240 = vmatpush.msrb.mxu1 %v121_v40  ;;  %521 = vmatpush.msrb.mxu3 %v2478_v42  ;;  %v2574_v40 = vld [vmem:[#allocation9 + $0xd0] sm:$0xff] }
  0x55   :  { %281 = vmatpush.msrb.mxu2 %v122_v43  ;;  %614 = vmatpush.msrb.mxu0 %v2391_v20  ;;  %v2577_v43 = vld [vmem:[#allocation9 + $0xa8] sm:$0xff] }
  0x56   :  { %241 = vmatpush.msrb.mxu1 %v117_v45  ;;  %522 = vmatpush.msrb.mxu3 %v2482_v46  ;;  %v2581_v45 = vld [vmem:[#allocation9 + $0xb0] sm:$0xff] }
  0x57   :  { %282 = vmatpush.msrb.mxu2 %v118_v49  ;;  %615 = vmatpush.msrb.mxu0 %v2394_v23  ;;  %v2584_v49 = vld [vmem:[#allocation9 + $0x88] sm:$0xff] }
  0x58   :  { %242 = vmatpush.msrb.mxu1 %v113_v50  ;;  %523 = vmatpush.msrb.mxu3 %v2485_v52  ;;  %v2592_v50 = vld [vmem:[#allocation9 + $0x68] sm:$0xff] }
  0x59   :  { %283 = vmatpush.msrb.mxu2 %v114_v53  ;;  %243 = vmatmul.f32.vlgmr.msrb.gmra.mxu1 %v2418_v47  ;;  %v2599_v53 = vld [vmem:[#allocation9 + $0x48] sm:$0xff] }
  0x5a   :  { %284 = vmatmul.f32.vlgmr.msrb.gmra.mxu2 %v2418_v47  ;;  %473 = vmatpush.msra.mxu1 %v2489_v54  ;;  %v2517_v47 = vld [vmem:[#allocation9 + $0x58] sm:$0xff]  ;;  %3458 = vst [vmem:[#allocation31_spill] sm:$0xff] %v2599_v53 }
  0x5b   :  { %337 = vmatmul.f32.gmra.mxu3 %v2421_v48  ;;  %493 = vmatpush.msra.mxu2 %v2492_v56  ;;  %3455 = vst [vmem:[#allocation28_spill] sm:$0xff] %v2517_v47 }
  0x5c   :  { %474 = vmatpush.msra.mxu1 %v2496_v58  ;;  %524 = vmatpush.msrb.mxu3 %v2498_v60 }
  0x5d   :  { %494 = vmatpush.msra.mxu2 %v2502_v63  ;;  %616 = vmatpush.msrb.mxu0 %v2397_v26 }
  0x5e   :  { %475 = vmatpush.msra.mxu1 %v2505_v0  ;;  %525 = vmatpush.msrb.mxu3 %v2508_v1 }
  0x5f   :  { %495 = vmatpush.msra.mxu2 %v2511_v3  ;;  %617 = vmatpush.msrb.mxu0 %v2400_v29  ;;  %v2621_v29 = vld [vmem:[#allocation9 + $0x10] sm:$0xff] }
  0x60   :  { %476 = vmatpush.msra.mxu1 %v2514_v5  ;;  %526 = vmatpush.msrb.mxu3 %v2517_v47  ;;  %3464 = vst [vmem:[#allocation37_spill] sm:$0xff] %v2621_v29 }
  0x61   :  { %246 = vmatmul.f32.gmra.mxu1 %v2434_v61  ;;  %496 = vmatpush.msra.mxu2 %v2522_v9 }
  0x62   :  { %287 = vmatmul.f32.gmra.mxu2 %v2434_v61  ;;  %477 = vmatpush.msra.mxu1 %v2524_v10  ;;  %v2558_v61 = vld [vmem:[#allocation9 + $0x110] sm:$0xff] }
  0x63   :  { %340 = vmatmul.f32.gmra.mxu3 %v2437_v62  ;;  %497 = vmatpush.msra.mxu2 %v2530_v13 }
  0x64   :  { %478 = vmatpush.msra.mxu1 %v2533_v18  ;;  %527 = vmatpush.msrb.mxu3 %v2536_v19 }
  0x65   :  { %498 = vmatpush.msra.mxu2 %v2540_v21  ;;  %618 = vmatpush.msrb.mxu0 %v2403_v32  ;;  %v2613_v32 = vld [vmem:[#allocation9 + $0x30] sm:$0xff] }
  0x66   :  { %479 = vmatpush.msra.mxu1 %v2543_v24  ;;  %528 = vmatpush.msrb.mxu3 %v2546_v25  ;;  %3462 = vst [vmem:[#allocation35_spill] sm:$0xff] %v2613_v32 }
  0x67   :  { %499 = vmatpush.msra.mxu2 %v2550_v28  ;;  %619 = vmatpush.msrb.mxu0 %v2406_v35  ;;  %v2606_v35 = vld [vmem:[#allocation9 + $0x50] sm:$0xff] }
  0x68   :  { %668 = vmatpush.msra.mxu3 %v2428_v55  ;;  %480 = vmatpush.msra.mxu1 %v2552_v30  ;;  %3460 = vst [vmem:[#allocation33_spill] sm:$0xff] %v2606_v35 }
  0x69   :  { %249 = vmatmul.f32.gmra.mxu1 %v2452_v15  ;;  %500 = vmatpush.msra.mxu2 %v2558_v61 }
  0x6a   :  { %290 = vmatmul.f32.gmra.mxu2 %v2452_v15  ;;  %481 = vmatpush.msra.mxu1 %v2560_v33  ;;  %v2589_v15 = vld [vmem:[#allocation9 + $0x90] sm:$0xff] }
  0x6b   :  { %343 = vmatmul.f32.gmra.mxu3 %v2455_v16  ;;  %501 = vmatpush.msra.mxu2 %v2565_v37 }
  0x6c   :  { %482 = vmatpush.msra.mxu1 %v2569_v39  ;;  %669 = vmatpush.msra.mxu3 %v2432_v59 }
  0x6d   :  { %502 = vmatpush.msra.mxu2 %v2574_v40  ;;  %620 = vmatpush.msrb.mxu0 %v2409_v38  ;;  %v2609_v38 = vld [vmem:[#allocation9 + $0x28] sm:$0xff] }
  0x6e   :  { %483 = vmatpush.msra.mxu1 %v2577_v43  ;;  %670 = vmatpush.msra.mxu3 %v2442_v2  ;;  %3461 = vst [vmem:[#allocation34_spill] sm:$0xff] %v2609_v38 }
  0x6f   :  { %503 = vmatpush.msra.mxu2 %v2581_v45  ;;  %621 = vmatpush.msrb.mxu0 %v2412_v41  ;;  %v3465_v41 = vmov 0.0  }
  0x70   :  { %484 = vmatpush.msra.mxu1 %v2584_v49  ;;  %671 = vmatpush.msra.mxu3 %v2446_v7 }
  0x71   :  { %252 = vmatmul.f32.gmra.mxu1 %v2470_v34  ;;  %504 = vmatpush.msra.mxu2 %v2589_v15 }
  0x72   :  { %293 = vmatmul.f32.gmra.mxu2 %v2470_v34  ;;  %485 = vmatpush.msra.mxu1 %v2592_v50  ;;  %v2617_v34 = vld [vmem:[#allocation9 + $0x8] sm:$0xff] }
  0x73   :  { %346 = vmatmul.f32.gmra.mxu3 %v2473_v36  ;;  %505 = vmatpush.msra.mxu2 %v2604_v57  ;;  %3463 = vst [vmem:[#allocation36_spill] sm:$0xff] %v2617_v34 }
  0x74   :  { %486 = vmatpush.msra.mxu1 %v2599_v53  ;;  %672 = vmatpush.msra.mxu3 %v2449_v12 }
  0x75   :  { %506 = vmatpush.msra.mxu2 %v2606_v35  ;;  %622 = vmatpush.msrb.mxu0 %v2415_v44 }
  0x76   :  { %487 = vmatpush.msra.mxu1 %v2609_v38  ;;  %673 = vmatpush.msra.mxu3 %v2460_v22 }
  0x77   :  { %507 = vmatpush.msra.mxu2 %v2613_v32  ;;  %623 = vmatpush.msrb.mxu0 %v2424_v51 }
  0x78   :  { %488 = vmatpush.msra.mxu1 %v2617_v34  ;;  %674 = vmatpush.msra.mxu3 %v2464_v27 }
  0x79   :  { %255 = vmatmul.f32.gmra.mxu1 %v2421_v48  ;;  %508 = vmatpush.msra.mxu2 %v2621_v29 }
  0x7a   :  { %296 = vmatmul.f32.gmra.mxu2 %v2421_v48  ;;  %628 = vmatpush.msrb.mxu1 %v2489_v54 }
  0x7b   :  { %529 = vmatmul.f32.vlgmr.msrb.gmra.mxu3 %v3465_v41  ;;  %648 = vmatpush.msrb.mxu2 %v2492_v56 }
  0x7c   :  { %629 = vmatpush.msrb.mxu1 %v2496_v58  ;;  %675 = vmatpush.msra.mxu3 %v2467_v31 }
  0x7d   :  { %649 = vmatpush.msrb.mxu2 %v2502_v63  ;;  %764 = vmatpush.msra.mxu0 %v2374_v4  ;;  %v3466_v4 = vld [vmem:[#allocation22_spill] sm:$0xff] }
  0x7e   :  { %630 = vmatpush.msrb.mxu1 %v2505_v0  ;;  %676 = vmatpush.msra.mxu3 %v2478_v42 }
  0x7f   :  { %650 = vmatpush.msrb.mxu2 %v2511_v3  ;;  %765 = vmatpush.msra.mxu0 %v2377_v6  ;;  %v3467_v6 = vld [vmem:[#allocation23_spill] sm:$0xff] }
  0x80   :  { %631 = vmatpush.msrb.mxu1 %v2514_v5  ;;  %677 = vmatpush.msra.mxu3 %v2482_v46 }
  0x81   :  { %258 = vmatmul.f32.gmra.mxu1 %v2437_v62  ;;  %651 = vmatpush.msrb.mxu2 %v2522_v9 }
  0x82   :  { %299 = vmatmul.f32.gmra.mxu2 %v2437_v62  ;;  %632 = vmatpush.msrb.mxu1 %v2524_v10 }
  0x83   :  { %652 = vmatpush.msrb.mxu2 %v2530_v13  ;;  %678 = vmatpush.msra.mxu3 %v2485_v52 }
  0x84   :  { %633 = vmatpush.msrb.mxu1 %v2533_v18  ;;  %766 = vmatpush.msra.mxu0 %v2379_v8  ;;  %v3468_v8 = vld [vmem:[#allocation24_spill] sm:$0xff] }
  0x85   :  { %653 = vmatpush.msrb.mxu2 %v2540_v21  ;;  %679 = vmatpush.msra.mxu3 %v2498_v60 }
  0x86   :  { %634 = vmatpush.msrb.mxu1 %v2543_v24  ;;  %767 = vmatpush.msra.mxu0 %v2382_v11  ;;  %v3469_v11 = vld [vmem:[#allocation25_spill] sm:$0xff] }
  0x87   :  { %654 = vmatpush.msrb.mxu2 %v2550_v28  ;;  %680 = vmatpush.msra.mxu3 %v2508_v1 }
  0x88   :  { %635 = vmatpush.msrb.mxu1 %v2552_v30  ;;  %768 = vmatpush.msra.mxu0 %v2385_v14  ;;  %v3470_v14 = vld [vmem:[#allocation26_spill] sm:$0xff] }
  0x89   :  { %261 = vmatmul.f32.gmra.mxu1 %v2455_v16  ;;  %655 = vmatpush.msrb.mxu2 %v2558_v61 }
  0x8a   :  { %302 = vmatmul.f32.gmra.mxu2 %v2455_v16  ;;  %636 = vmatpush.msrb.mxu1 %v2560_v33 }
  0x8b   :  { %656 = vmatpush.msrb.mxu2 %v2565_v37  ;;  %681 = vmatpush.msra.mxu3 %v2517_v47 }
  0x8c   :  { %637 = vmatpush.msrb.mxu1 %v2569_v39  ;;  %769 = vmatpush.msra.mxu0 %v2388_v17 }
  0x8d   :  { %657 = vmatpush.msrb.mxu2 %v2574_v40  ;;  %682 = vmatpush.msra.mxu3 %v2536_v19 }
  0x8e   :  { %638 = vmatpush.msrb.mxu1 %v2577_v43  ;;  %770 = vmatpush.msra.mxu0 %v2391_v20  ;;  %v176_v20 = vld [vmem:[#allocation10] sm:$0xf] }
  0x8f   :  { %658 = vmatpush.msrb.mxu2 %v2581_v45  ;;  %683 = vmatpush.msra.mxu3 %v2546_v25  ;;  %v181_v62 = vperm.slane %v176_v20, 3 }
  0x90   :  { %639 = vmatpush.msrb.mxu1 %v2584_v49  ;;  %771 = vmatpush.msra.mxu0 %v2394_v23  ;;  %v178_v23 = vperm.slane %v176_v20, 0 }
  0x91   :  { %824 = vmatpush.msrb.mxu3 %v2428_v55  ;;  %264 = vmatmul.f32.gmra.mxu1 %v2473_v36 }
  0x92   :  { %659 = vmatpush.msrb.mxu2 %v2589_v15  ;;  %640 = vmatpush.msrb.mxu1 %v2592_v50 }
  0x93   :  { %305 = vmatmul.f32.gmra.mxu2 %v2473_v36  ;;  %825 = vmatpush.msrb.mxu3 %v2432_v59 }
  0x94   :  { %660 = vmatpush.msrb.mxu2 %v2604_v57  ;;  %641 = vmatpush.msrb.mxu1 %v2599_v53 }
  0x95   :  { %826 = vmatpush.msrb.mxu3 %v2442_v2  ;;  %772 = vmatpush.msra.mxu0 %v2397_v26 }
  0x96   :  { %661 = vmatpush.msrb.mxu2 %v2606_v35  ;;  %642 = vmatpush.msrb.mxu1 %v2609_v38 }
  0x97   :  { %827 = vmatpush.msrb.mxu3 %v2446_v7  ;;  %773 = vmatpush.msra.mxu0 %v3466_v4 }
  0x98   :  { %662 = vmatpush.msrb.mxu2 %v2613_v32  ;;  %643 = vmatpush.msrb.mxu1 %v2617_v34 }
  0x99   :  { %489 = vmatmul.f32.vlgmr.msra.gmra.mxu1 %v3465_v41  ;;  %828 = vmatpush.msrb.mxu3 %v2449_v12 }
  0x9a   :  { %663 = vmatpush.msrb.mxu2 %v2621_v29  ;;  %784 = vmatpush.msra.mxu1 %v2489_v54 }
  0x9b   :  { %509 = vmatmul.f32.vlgmr.msra.gmra.mxu2 %v3465_v41  ;;  %829 = vmatpush.msrb.mxu3 %v2460_v22 }
  0x9c   :  { %804 = vmatpush.msra.mxu2 %v2492_v56  ;;  %785 = vmatpush.msra.mxu1 %v2496_v58 }
  0x9d   :  { %774 = vmatpush.msra.mxu0 %v3467_v6  ;;  %830 = vmatpush.msrb.mxu3 %v2464_v27 }
  0x9e   :  { %805 = vmatpush.msra.mxu2 %v2502_v63  ;;  %786 = vmatpush.msra.mxu1 %v2505_v0 }
  0x9f   :  { %775 = vmatpush.msra.mxu0 %v3468_v8  ;;  %831 = vmatpush.msrb.mxu3 %v2467_v31 }
  0xa0   :  { %806 = vmatpush.msra.mxu2 %v2511_v3  ;;  %787 = vmatpush.msra.mxu1 %v2514_v5 }
  0xa1   :  { %776 = vmatpush.msra.mxu0 %v3469_v11  ;;  %832 = vmatpush.msrb.mxu3 %v2478_v42 }
  0xa2   :  { %807 = vmatpush.msra.mxu2 %v2522_v9  ;;  %788 = vmatpush.msra.mxu1 %v2524_v10 }
  0xa3   :  { %777 = vmatpush.msra.mxu0 %v3470_v14  ;;  %833 = vmatpush.msrb.mxu3 %v2482_v46 }
  0xa4   :  { %808 = vmatpush.msra.mxu2 %v2530_v13  ;;  %789 = vmatpush.msra.mxu1 %v2533_v18 }
  0xa5   :  { %778 = vmatpush.msra.mxu0 %v2415_v44  ;;  %834 = vmatpush.msrb.mxu3 %v2485_v52 }
  0xa6   :  { %809 = vmatpush.msra.mxu2 %v2540_v21  ;;  %790 = vmatpush.msra.mxu1 %v2543_v24 }
  0xa7   :  { %779 = vmatpush.msra.mxu0 %v2424_v51  ;;  %835 = vmatpush.msrb.mxu3 %v2498_v60 }
  0xa8   :  { %810 = vmatpush.msra.mxu2 %v2550_v28  ;;  %791 = vmatpush.msra.mxu1 %v2552_v30 }
  0xa9   :  { %836 = vmatpush.msrb.mxu3 %v2508_v1 }
  0xaa   :  { %811 = vmatpush.msra.mxu2 %v2558_v61  ;;  %792 = vmatpush.msra.mxu1 %v2560_v33 }
  0xab   :  { %837 = vmatpush.msrb.mxu3 %v2517_v47 }
  0xac   :  { %812 = vmatpush.msra.mxu2 %v2565_v37  ;;  %793 = vmatpush.msra.mxu1 %v2569_v39 }
  0xad   :  { %838 = vmatpush.msrb.mxu3 %v2536_v19 }
  0xae   :  { %813 = vmatpush.msra.mxu2 %v2574_v40  ;;  %794 = vmatpush.msra.mxu1 %v2577_v43 }
  0xaf   :  { %839 = vmatpush.msrb.mxu3 %v2546_v25 }
  0xb0   :  { %814 = vmatpush.msra.mxu2 %v2581_v45  ;;  %795 = vmatpush.msra.mxu1 %v2584_v49 }
  0xb2   :  { %815 = vmatpush.msra.mxu2 %v2589_v15  ;;  %796 = vmatpush.msra.mxu1 %v2592_v50 }
  0xb4   :  { %816 = vmatpush.msra.mxu2 %v2604_v57  ;;  %797 = vmatpush.msra.mxu1 %v2599_v53 }
  0xb6   :  { %817 = vmatpush.msra.mxu2 %v2606_v35  ;;  %v203_v17 = vpop.f32.mrf.mxu1  ;;  %798 = vmatpush.msra.mxu1 %v2609_v38 }
  0xb8   :  { %818 = vmatpush.msra.mxu2 %v2613_v32  ;;  %799 = vmatpush.msra.mxu1 %v2617_v34 }
  0xba   :  { %819 = vmatpush.msra.mxu2 %v2621_v29 }
  0xbc   :  { %v215_v26 = vpop.f32.mrf.mxu2 }
  0xbd   :  { %v2746_v41 = vadd.f32 %v215_v26, %v178_v23  ;;  %v326_v44 = vpop.f32.mrf.mxu3 }
  0xbe   :  { %v206_v48 = vpop.f32.mrf.mxu1 }
  0xbf   :  { %3471 = vst [vmem:[#allocation22_spill] sm:$0xff] %v2746_v41  ;;  %v2748_v51 = vadd.f32 %v206_v48, %v178_v23 }
  0xc1   :  { %3472 = vst [vmem:[#allocation23_spill] sm:$0xff] %v2748_v51 }
  0xc5   :  { %v218_v16 = vpop.f32.mrf.mxu2 }
  0xc6   :  { %v2750_v36 = vadd.f32 %v218_v16, %v178_v23  ;;  %v329_v4 = vpop.f32.mrf.mxu3  ;;  %v209_v6 = vpop.f32.mrf.mxu1 }
  0xc7   :  { %v2752_v8 = vadd.f32 %v329_v4, %v181_v62  ;;  %v2754_v11 = vadd.f32 %v209_v6, %v178_v23  ;;  %v179_v4 = vperm.slane %v176_v20, 1 }
  0xc8   :  { %3473 = vst [vmem:[#allocation24_spill] sm:$0xff] %v2750_v36 }
  0xc9   :  { %3474 = vst [vmem:[#allocation25_spill] sm:$0xff] %v2752_v8 }
  0xca   :  { %3475 = vst [vmem:[#allocation26_spill] sm:$0xff] %v2754_v11 }
  0xcd   :  { %v221_v14 = vpop.f32.mrf.mxu2 }
  0xce   :  { %v2756_v25 = vadd.f32 %v221_v14, %v178_v23  ;;  %v332_v29 = vpop.f32.mrf.mxu3  ;;  %v212_v26 = vpop.f32.mrf.mxu1 }
  0xcf   :  { %v2758_v41 = vadd.f32 %v332_v29, %v181_v62  ;;  %v2760_v34 = vadd.f32 %v212_v26, %v178_v23  ;;  %v180_v29 = vperm.slane %v176_v20, 2 }
  0xd0   :  { %3476 = vst [vmem:[#allocation38_spill] sm:$0xff] %v2756_v25 }
  0xd1   :  { %3477 = vst [vmem:[#allocation39_spill] sm:$0xff] %v2758_v41 }
  0xd2   :  { %3478 = vst [vmem:[#allocation40_spill] sm:$0xff] %v2760_v34 }
  0xd5   :  { %v224_v48 = vpop.f32.mrf.mxu2 }
  0xd6   :  { %v2762_v51 = vadd.f32 %v224_v48, %v178_v23  ;;  %v335_v16 = vpop.f32.mrf.mxu3  ;;  %v244_v36 = vpop.f32.mrf.mxu1 }
  0xd7   :  { %v2764_v19 = vadd.f32 %v335_v16, %v181_v62 }
  0xd8   :  { %3479 = vst [vmem:[#allocation41_spill] sm:$0xff] %v2762_v51 }
  0xd9   :  { %3480 = vst [vmem:[#allocation42_spill] sm:$0xff] %v2764_v19 }
  0xdd   :  { %v2766_v8 = vpop.f32.mrf.mxu2 }
  0xde   :  { %v338_v6 = vpop.f32.mrf.mxu3  ;;  %v247_v11 = vpop.f32.mrf.mxu1 }
  0xdf   :  { %v2768_v14 = vadd.f32 %v338_v6, %v181_v62  ;;  %v2770_v25 = vadd.f32 %v247_v11, %v179_v4 }
  0xe1   :  { %3481 = vst [vmem:[#allocation43_spill] sm:$0xff] %v2768_v14 }
  0xe2   :  { %3482 = vst [vmem:[#allocation44_spill] sm:$0xff] %v2770_v25 }
  0xe5   :  { %v288_v41 = vpop.f32.mrf.mxu2 }
  0xe6   :  { %v2772_v26 = vadd.f32 %v288_v41, %v180_v29  ;;  %v341_v34 = vpop.f32.mrf.mxu3  ;;  %v250_v48 = vpop.f32.mrf.mxu1 }
  0xe7   :  { %v2774_v51 = vadd.f32 %v341_v34, %v181_v62  ;;  %v2776_v32 = vadd.f32 %v250_v48, %v179_v4 }
  0xe8   :  { %3483 = vst [vmem:[#allocation45_spill] sm:$0xff] %v2772_v26 }
  0xe9   :  { %3484 = vst [vmem:[#allocation46_spill] sm:$0xff] %v2774_v51 }
  0xea   :  { %3485 = vst [vmem:[#allocation47_spill] sm:$0xff] %v2776_v32 }
  0xed   :  { %v291_v16 = vpop.f32.mrf.mxu2 }
  0xee   :  { %v2778_v19 = vadd.f32 %v291_v16, %v180_v29  ;;  %v344_v38 = vpop.f32.mrf.mxu3  ;;  %v253_v47 = vpop.f32.mrf.mxu1 }
  0xef   :  { %v2780_v35 = vadd.f32 %v344_v38, %v181_v62  ;;  %v2782_v6 = vadd.f32 %v253_v47, %v179_v4  ;;  %v470_v38 = vpop.f32.mrf.mxu0 }
  0xf0   :  { %3486 = vst [vmem:[#allocation48_spill] sm:$0xff] %v2778_v19  ;;  %v204_v19 = vadd.f32 %v203_v17, %v178_v23 }
  0xf1   :  { %3487 = vst [vmem:[#allocation49_spill] sm:$0xff] %v2780_v35 }
  0xf2   :  { %3488 = vst [vmem:[#allocation50_spill] sm:$0xff] %v2782_v6  ;;  %v533_v35 = vadd.f32 %v470_v38, %v204_v19  ;;  %v245_v38 = vadd.f32 %v244_v36, %v179_v4  ;;  %v286_v36 = vadd.f32 %v2766_v8, %v180_v29 }
  0xf5   :  { %v294_v11 = vpop.f32.mrf.mxu2 }
  0xf6   :  { %v2784_v20 = vadd.f32 %v294_v11, %v180_v29  ;;  %v347_v41 = vpop.f32.mrf.mxu3  ;;  %v256_v14 = vpop.f32.mrf.mxu1 }
  0xf7   :  { %v2786_v26 = vadd.f32 %v347_v41, %v181_v62  ;;  %v2788_v34 = vadd.f32 %v256_v14, %v179_v4  ;;  %v327_v14 = vadd.f32 %v326_v44, %v181_v62 }
  0xf8   :  { %3489 = vst [vmem:[#allocation51_spill] sm:$0xff] %v2784_v20  ;;  %v1831_v20 = vmul.f32 -1.442695, %v533_v35 }
  0xf9   :  { %3490 = vst [vmem:[#allocation52_spill] sm:$0xff] %v2786_v26 }
  0xfa   :  { %3491 = vst [vmem:[#allocation53_spill] sm:$0xff] %v2788_v34  ;;  %1885 = vpow2.f32 %v1831_v20 }
  0xfd   :  { %v297_v48 = vpop.f32.mrf.mxu2 }
  0xfe   :  { %v2790_v51 = vadd.f32 %v297_v48, %v180_v29  ;;  %v259_v16 = vpop.f32.mrf.mxu1  ;;  %v530_v41 = vpop.f32.mrf.mxu3 }
  0xff   :  { %v2792_v32 = vadd.f32 %v259_v16, %v179_v4  ;;  %v536_v34 = vadd.f32 %v530_v41, %v327_v14 }
 0x100   :  { %3492 = vst [vmem:[#allocation54_spill] sm:$0xff] %v2790_v51  ;;  %v1886_v23 = vpop.eup %1885 }
 0x101   :  { %3493 = vst [vmem:[#allocation55_spill] sm:$0xff] %v2792_v32  ;;  %v1833_v16 = vmul.f32 -1.442695, %v536_v34  ;;  %v540_v19 = vadd.f32 1.0, %v1886_v23 }
 0x103   :  { %1887 = vpow2.f32 %v1833_v16  ;;  %vm546_vm1 = vweird.f32 %v540_v19 }
 0x104   :  { %1889 = vrcp.f32 %v540_v19 }
 0x105   :  { %v300_v47 = vpop.f32.mrf.mxu2 }
 0x106   :  { %v2794_v6 = vadd.f32 %v300_v47, %v180_v29  ;;  %v262_v11 = vpop.f32.mrf.mxu1 }
 0x107   :  { %v2796_v25 = vadd.f32 %v262_v11, %v179_v4 }
 0x108   :  { %3494 = vst [vmem:[#allocation56_spill] sm:$0xff] %v2794_v6 }
 0x109   :  { %3495 = vst [vmem:[#allocation57_spill] sm:$0xff] %v2796_v25  ;;  %v1888_v44 = vpop.eup %1887 }
 0x10a   :  { %v1890_v62 = vpop.eup %1889 }
 0x10b   :  { %v542_v14 = vmul.f32 %v1890_v62, %v540_v19  ;;  %vm547_vm0 = vweird.f32 %v1890_v62 }
 0x10c   :  { %vm548_vm3 = vmor %vm546_vm1, %vm547_vm0 }
 0x10d   :  { %v303_v26 = vpop.f32.mrf.mxu2  ;;  %v543_v34 = vsub.f32 1.0, %v542_v14 }
 0x10e   :  { %v2798_v48 = vadd.f32 %v303_v26, %v180_v29  ;;  %v265_v51 = vpop.f32.mrf.mxu1  ;;  %v579_v26 = vadd.f32 1.0, %v1888_v44 }
 0x10f   :  { %v2800_v17 = vadd.f32 %v265_v51, %v179_v4 }
 0x110   :  { %3496 = vst [vmem:[#allocation58_spill] sm:$0xff] %v2798_v48  ;;  %v550_v48 = vand.u32 2147483647, %v540_v19  ;;  %v591_v1 = vand.u32 2147483648, %v579_v26  ;;  %vm585_vm9 = vweird.f32 %v579_v26 }
 0x111   :  { %3497 = vst [vmem:[#allocation59_spill] sm:$0xff] %v2800_v17  ;;  %v552_v17 = vand.u32 2147483648, %v540_v19 }
 0x112   :  { %vm551_vm6 = vcmp.eq.f32.partialorder %v550_v48, 8.507059e+37 }
 0x116   :  { %v306_v47 = vpop.f32.mrf.mxu2  ;;  %v490_v35 = vpop.f32.mrf.mxu1 }
 0x117   :  { %v2802_v6 = vadd.f32 %v306_v47, %v180_v29  ;;  %v534_v11 = vadd.f32 %v490_v35, %v245_v38  ;;  %v544_v47 = vmul.f32 %v1890_v62, %v543_v34 }
 0x119   :  { %3498 = vst [vmem:[#allocation60_spill] sm:$0xff] %v2802_v6  ;;  %v1832_v20 = vmul.f32 -1.442695, %v534_v11 }
 0x11b   :  { %1891 = vpow2.f32 %v1832_v20  ;;  %v545_v20 = vadd.f32 %v1890_v62, %v544_v47 }
 0x11c   :  { %1893 = vrcp.f32 %v579_v26 }
 0x11d   :  { %v549_v8 = vsel %vm548_vm3, %v1890_v62, %v545_v20  ;;  %v589_v62 = vand.u32 2147483647, %v579_v26  ;;  %v3506_v20 = vld [vmem:[#allocation33_spill] sm:$0xff] }
 0x11e   :  { %v510_v23 = vpop.f32.mrf.mxu2 }
 0x11f   :  { %v535_v4 = vadd.f32 %v510_v23, %v286_v36  ;;  %v553_v36 = vor.u32 1.1754944e-38, %v552_v17  ;;  %vm590_vm11 = vcmp.eq.f32.partialorder %v589_v62, 8.507059e+37 }
 0x121   :  { %v1892_v41 = vpop.eup %1891 }
 0x122   :  { %v559_v51 = vadd.f32 1.0, %v1892_v41  ;;  %v1894_v16 = vpop.eup %1893 }
 0x123   :  { %v581_v35 = vmul.f32 %v1894_v16, %v579_v26  ;;  %vm586_vm8 = vweird.f32 %v1894_v16  ;;  %v3503_v26 = vld [vmem:[#allocation27_spill] sm:$0xff] }
 0x124   :  { %1895 = vrcp.f32 %v559_v51  ;;  %v571_v44 = vand.u32 2147483648, %v559_v51  ;;  %v569_v14 = vand.u32 2147483647, %v559_v51  ;;  %vm565_vm4 = vweird.f32 %v559_v51  ;;  %vm587_vm10 = vmor %vm585_vm9, %vm586_vm8 }
 0x125   :  { %1897 = vtanh.f32 %v535_v4  ;;  %v582_v25 = vsub.f32 1.0, %v581_v35 }
 0x126   :  { %v572_v23 = vor.u32 1.1754944e-38, %v571_v44  ;;  %vm570_vm7 = vcmp.eq.f32.partialorder %v569_v14, 8.507059e+37  ;;  %v3507_v44 = vld [vmem:[#allocation28_spill] sm:$0xff]  ;;  %v3510_v14 = vld [vmem:[#allocation35_spill] sm:$0xff] }
 0x127   :  { %v583_v47 = vmul.f32 %v1894_v16, %v582_v25 }
 0x129   :  { %v584_v35 = vadd.f32 %v1894_v16, %v583_v47 }
 0x12a   :  { %v1896_v6 = vpop.eup %1895 }
 0x12b   :  { %v561_v38 = vmul.f32 %v1896_v6, %v559_v51  ;;  %vm566_vm2 = vweird.f32 %v1896_v6  ;;  %v1898_v34 = vpop.eup %1897  ;;  %v588_v17 = vsel %vm587_vm10, %v1894_v16, %v584_v35  ;;  %v592_v51 = vor.u32 1.1754944e-38, %v591_v1  ;;  %v2820_v1 = vld [vmem:[#allocation9 + $0x1c0] sm:$0xff] }
 0x12c   :  { %vm567_vm5 = vmor %vm565_vm4, %vm566_vm2  ;;  %v3505_v16 = vld [vmem:[#allocation31_spill] sm:$0xff]  ;;  %v3517_v35 = vld [vmem:[#allocation44_spill] sm:$0xff] }
 0x12d   :  { %v562_v11 = vsub.f32 1.0, %v561_v38  ;;  %v554_v38 = vsel %vm551_vm6, %v553_v36, %v549_v8  ;;  %v593_v48 = vsel %vm590_vm11, %v592_v51, %v588_v17  ;;  %v3511_v8 = vld [vmem:[#allocation29_spill] sm:$0xff]  ;;  %v3515_v36 = vld [vmem:[#allocation30_spill] sm:$0xff] }
 0x12f   :  { %v563_v41 = vmul.f32 %v1896_v6, %v562_v11  ;;  %v596_v11 = vmul.f32 %v1898_v34, %v554_v38  ;;  %v3513_v34 = vld [vmem:[#allocation36_spill] sm:$0xff]  ;;  %v3516_v38 = vld [vmem:[#allocation23_spill] sm:$0xff] }
 0x131   :  { %v564_v29 = vadd.f32 %v1896_v6, %v563_v41  ;;  %v3509_v41 = vld [vmem:[#allocation34_spill] sm:$0xff] }
 0x133   :  { %v568_v4 = vsel %vm567_vm5, %v1896_v6, %v564_v29  ;;  %v2904_v29 = vld [vmem:[#allocation9] sm:$0xff] }
 0x134   :  { %v573_v32 = vsel %vm570_vm7, %v572_v23, %v568_v4  ;;  %3512 = vst [vmem:[#allocation29_spill] sm:$0xff] %v2904_v29  ;;  %v3514_v23 = vld [vmem:[#allocation37_spill] sm:$0xff] }
 0x135   :  { %v595_v53 = vmul.f32 0.0, %v573_v32  ;;  %v2814_v32 = vld [vmem:[#allocation9 + $0x1e0] sm:$0xff] }
 0x137   :  { %v2805_v19 = vadd.f32 %v596_v11, %v595_v53  ;;  %v2826_v53 = vld [vmem:[#allocation9 + $0x1a0] sm:$0xff] }
 0x139   :  { %1899 = vtanh.f32 %v2805_v19 }
 0x13f   :  { %v1900_v6 = vpop.eup %1899 }
 0x140   :  { %v2808_v25 = vmul.f32 %v1900_v6, %v593_v48  ;;  %v3518_v48 = vld [vmem:[#allocation25_spill] sm:$0xff] }
 0x142   :  { %3499 = vst [vmem:[#allocation61_spill] sm:$0xff] %v2808_v25  ;;  %624 = vmatmul.f32.vlgmr.msrb.gmra.mxu0 %v2808_v25  ;;  %644 = vmatmul.f32.vlgmr.msrb.gmra.mxu1 %v2808_v25 }
 0x143   :  { %664 = vmatmul.f32.vlgmr.msrb.gmra.mxu2 %v2808_v25  ;;  %684 = vmatmul.f32.vlgmr.msra.gmra.mxu3 %v2808_v25 }
 0x144   :  { %920 = vmatpush.msrb.mxu0 %v2814_v32  ;;  %940 = vmatpush.msrb.mxu1 %v2489_v54 }
 0x145   :  { %960 = vmatpush.msrb.mxu2 %v2492_v56  ;;  %980 = vmatpush.msra.mxu3 %v2428_v55  ;;  %v2832_v55 = vld [vmem:[#allocation9 + $0x180] sm:$0xff] }
 0x146   :  { %921 = vmatpush.msrb.mxu0 %v2820_v1  ;;  %941 = vmatpush.msrb.mxu1 %v2496_v58 }
 0x147   :  { %961 = vmatpush.msrb.mxu2 %v2502_v63  ;;  %981 = vmatpush.msra.mxu3 %v2432_v59  ;;  %v2838_v59 = vld [vmem:[#allocation9 + $0x160] sm:$0xff] }
 0x148   :  { %922 = vmatpush.msrb.mxu0 %v2826_v53  ;;  %942 = vmatpush.msrb.mxu1 %v2505_v0 }
 0x149   :  { %962 = vmatpush.msrb.mxu2 %v2511_v3  ;;  %982 = vmatpush.msra.mxu3 %v2442_v2  ;;  %v2844_v2 = vld [vmem:[#allocation9 + $0x140] sm:$0xff] }
 0x14a   :  { %923 = vmatpush.msrb.mxu0 %v2832_v55  ;;  %943 = vmatpush.msrb.mxu1 %v2514_v5 }
 0x14b   :  { %963 = vmatpush.msrb.mxu2 %v2522_v9  ;;  %983 = vmatpush.msra.mxu3 %v2446_v7  ;;  %v2850_v7 = vld [vmem:[#allocation9 + $0x120] sm:$0xff] }
 0x14c   :  { %924 = vmatpush.msrb.mxu0 %v2838_v59  ;;  %944 = vmatpush.msrb.mxu1 %v2524_v10 }
 0x14d   :  { %964 = vmatpush.msrb.mxu2 %v2530_v13  ;;  %984 = vmatpush.msra.mxu3 %v2449_v12  ;;  %v2856_v12 = vld [vmem:[#allocation9 + $0x100] sm:$0xff] }
 0x14e   :  { %925 = vmatpush.msrb.mxu0 %v2844_v2  ;;  %945 = vmatpush.msrb.mxu1 %v2533_v18 }
 0x14f   :  { %965 = vmatpush.msrb.mxu2 %v2540_v21  ;;  %985 = vmatpush.msra.mxu3 %v2460_v22  ;;  %v2862_v22 = vld [vmem:[#allocation9 + $0xe0] sm:$0xff] }
 0x150   :  { %926 = vmatpush.msrb.mxu0 %v2850_v7  ;;  %946 = vmatpush.msrb.mxu1 %v2543_v24 }
 0x151   :  { %966 = vmatpush.msrb.mxu2 %v2550_v28  ;;  %986 = vmatpush.msra.mxu3 %v2464_v27  ;;  %v2868_v27 = vld [vmem:[#allocation9 + $0xc0] sm:$0xff] }
 0x152   :  { %927 = vmatpush.msrb.mxu0 %v2856_v12  ;;  %947 = vmatpush.msrb.mxu1 %v2552_v30 }
 0x153   :  { %967 = vmatpush.msrb.mxu2 %v2558_v61  ;;  %987 = vmatpush.msra.mxu3 %v2467_v31  ;;  %v2874_v31 = vld [vmem:[#allocation9 + $0xa0] sm:$0xff] }
 0x154   :  { %928 = vmatpush.msrb.mxu0 %v2862_v22  ;;  %948 = vmatpush.msrb.mxu1 %v2560_v33  ;;  %3500 = vst [vmem:[#allocation62_spill] sm:$0xff] %v2874_v31 }
 0x155   :  { %968 = vmatpush.msrb.mxu2 %v2565_v37  ;;  %988 = vmatpush.msra.mxu3 %v2478_v42  ;;  %v2880_v42 = vld [vmem:[#allocation9 + $0x80] sm:$0xff] }
 0x156   :  { %929 = vmatpush.msrb.mxu0 %v2868_v27  ;;  %949 = vmatpush.msrb.mxu1 %v2569_v39  ;;  %3501 = vst [vmem:[#allocation63_spill] sm:$0xff] %v2880_v42 }
 0x157   :  { %969 = vmatpush.msrb.mxu2 %v2574_v40  ;;  %989 = vmatpush.msra.mxu3 %v2482_v46  ;;  %v2886_v46 = vld [vmem:[#allocation9 + $0x60] sm:$0xff] }
 0x158   :  { %930 = vmatpush.msrb.mxu0 %v2874_v31  ;;  %950 = vmatpush.msrb.mxu1 %v2577_v43  ;;  %3502 = vst [vmem:[#allocation64_spill] sm:$0xff] %v2886_v46 }
 0x159   :  { %970 = vmatpush.msrb.mxu2 %v2581_v45  ;;  %990 = vmatpush.msra.mxu3 %v2485_v52  ;;  %v2892_v52 = vld [vmem:[#allocation9 + $0x40] sm:$0xff] }
 0x15a   :  { %931 = vmatpush.msrb.mxu0 %v2880_v42  ;;  %951 = vmatpush.msrb.mxu1 %v2584_v49  ;;  %3504 = vst [vmem:[#allocation27_spill] sm:$0xff] %v2892_v52 }
 0x15b   :  { %971 = vmatpush.msrb.mxu2 %v2589_v15  ;;  %991 = vmatpush.msra.mxu3 %v2498_v60  ;;  %v2898_v60 = vld [vmem:[#allocation9 + $0x20] sm:$0xff] }
 0x15c   :  { %932 = vmatpush.msrb.mxu0 %v2886_v46  ;;  %952 = vmatpush.msrb.mxu1 %v2592_v50  ;;  %3508 = vst [vmem:[#allocation28_spill] sm:$0xff] %v2898_v60 }
 0x15d   :  { %972 = vmatpush.msrb.mxu2 %v2604_v57  ;;  %992 = vmatpush.msra.mxu3 %v3503_v26 }
 0x15e   :  { %933 = vmatpush.msrb.mxu0 %v2892_v52  ;;  %953 = vmatpush.msrb.mxu1 %v3505_v16 }
 0x15f   :  { %973 = vmatpush.msrb.mxu2 %v3506_v20  ;;  %993 = vmatpush.msra.mxu3 %v3507_v44 }
 0x160   :  { %934 = vmatpush.msrb.mxu0 %v2898_v60  ;;  %954 = vmatpush.msrb.mxu1 %v3509_v41 }
 0x161   :  { %974 = vmatpush.msrb.mxu2 %v3510_v14  ;;  %994 = vmatpush.msra.mxu3 %v3511_v8 }
 0x162   :  { %935 = vmatpush.msrb.mxu0 %v2904_v29  ;;  %955 = vmatpush.msrb.mxu1 %v3513_v34 }
 0x163   :  { %975 = vmatpush.msrb.mxu2 %v3514_v23  ;;  %995 = vmatpush.msra.mxu3 %v3515_v36 }
 0x1bf   :  { %v625_v4 = vpop.f32.mrf.mxu0  ;;  %v645_v47 = vpop.f32.mrf.mxu1 }
 0x1c0   :  { %v688_v11 = vadd.f32 %v625_v4, %v3516_v38  ;;  %v689_v62 = vadd.f32 %v645_v47, %v3517_v35  ;;  %v3519_v47 = vld [vmem:[#allocation45_spill] sm:$0xff] }
 0x1c2   :  { %v1834_v17 = vmul.f32 -1.442695, %v688_v11  ;;  %v1835_v51 = vmul.f32 -1.442695, %v689_v62 }
 0x1c4   :  { %1901 = vpow2.f32 %v1834_v17 }
 0x1c5   :  { %1903 = vpow2.f32 %v1835_v51 }
 0x1c6   :  { %v685_v6 = vpop.f32.mrf.mxu3  ;;  %v665_v36 = vpop.f32.mrf.mxu2 }
 0x1c7   :  { %v691_v26 = vadd.f32 %v685_v6, %v3518_v48  ;;  %v690_v11 = vadd.f32 %v665_v36, %v3519_v47 }
 0x1c9   :  { %v1836_v44 = vmul.f32 -1.442695, %v691_v26 }
 0x1ca   :  { %v1902_v8 = vpop.eup %1901 }
 0x1cb   :  { %v1904_v25 = vpop.eup %1903  ;;  %v695_v34 = vadd.f32 1.0, %v1902_v8  ;;  %1905 = vpow2.f32 %v1836_v44 }
 0x1cc   :  { %v714_v23 = vadd.f32 1.0, %v1904_v25 }
 0x1cd   :  { %1907 = vrcp.f32 %v695_v34  ;;  %v707_v48 = vand.u32 2147483648, %v695_v34  ;;  %v705_v25 = vand.u32 2147483647, %v695_v34  ;;  %vm701_vm14 = vweird.f32 %v695_v34 }
 0x1ce   :  { %1909 = vrcp.f32 %v714_v23  ;;  %v726_v26 = vand.u32 2147483648, %v714_v23  ;;  %v724_v14 = vand.u32 2147483647, %v714_v23  ;;  %vm720_vm15 = vweird.f32 %v714_v23 }
 0x1cf   :  { %v708_v36 = vor.u32 1.1754944e-38, %v707_v48  ;;  %vm706_vm2 = vcmp.eq.f32.partialorder %v705_v25, 8.507059e+37 }
 0x1d0   :  { %vm725_vm3 = vcmp.eq.f32.partialorder %v724_v14, 8.507059e+37 }
 0x1d1   :  { %v1906_v29 = vpop.eup %1905 }
 0x1d2   :  { %v734_v4 = vadd.f32 1.0, %v1906_v29 }
 0x1d3   :  { %v1908_v38 = vpop.eup %1907 }
 0x1d4   :  { %v1910_v35 = vpop.eup %1909  ;;  %v697_v62 = vmul.f32 %v1908_v38, %v695_v34  ;;  %1911 = vrcp.f32 %v734_v4  ;;  %vm702_vm12 = vweird.f32 %v1908_v38  ;;  %v746_v48 = vand.u32 2147483648, %v734_v4 }
 0x1d5   :  { %v716_v17 = vmul.f32 %v1910_v35, %v714_v23  ;;  %1913 = vtanh.f32 %v690_v11  ;;  %vm721_vm13 = vweird.f32 %v1910_v35  ;;  %vm703_vm0 = vmor %vm701_vm14, %vm702_vm12  ;;  %vm740_vm5 = vweird.f32 %v734_v4 }
 0x1d6   :  { %v698_v51 = vsub.f32 1.0, %v697_v62  ;;  %vm722_vm1 = vmor %vm720_vm15, %vm721_vm13  ;;  %v727_v62 = vor.u32 1.1754944e-38, %v726_v26  ;;  %v747_v25 = vor.u32 1.1754944e-38, %v746_v48 }
 0x1d7   :  { %v717_v6 = vsub.f32 1.0, %v716_v17 }
 0x1d8   :  { %v699_v8 = vmul.f32 %v1908_v38, %v698_v51 }
 0x1d9   :  { %v718_v44 = vmul.f32 %v1910_v35, %v717_v6 }
 0x1da   :  { %v1912_v41 = vpop.eup %1911  ;;  %v700_v29 = vadd.f32 %v1908_v38, %v699_v8 }
 0x1db   :  { %v719_v47 = vadd.f32 %v1910_v35, %v718_v44  ;;  %v736_v60 = vmul.f32 %v1912_v41, %v734_v4  ;;  %v1914_v11 = vpop.eup %1913  ;;  %vm741_vm4 = vweird.f32 %v1912_v41 }
 0x1dc   :  { %v704_v17 = vsel %vm703_vm0, %v1908_v38, %v700_v29  ;;  %v744_v38 = vand.u32 2147483647, %v734_v4  ;;  %vm742_vm6 = vmor %vm740_vm5, %vm741_vm4 }
 0x1dd   :  { %v709_v20 = vsel %vm706_vm2, %v708_v36, %v704_v17  ;;  %v723_v51 = vsel %vm722_vm1, %v1910_v35, %v719_v47  ;;  %v737_v16 = vsub.f32 1.0, %v736_v60  ;;  %v3540_v47 = vld [vmem:[#allocation39_spill] sm:$0xff] }
 0x1de   :  { %v728_v6 = vsel %vm725_vm3, %v727_v62, %v723_v51  ;;  %v751_v52 = vmul.f32 %v1914_v11, %v709_v20  ;;  %vm745_vm7 = vcmp.eq.f32.partialorder %v744_v38, 8.507059e+37 }
 0x1df   :  { %v750_v57 = vmul.f32 %v728_v6, %v2805_v19  ;;  %v738_v8 = vmul.f32 %v1912_v41, %v737_v16  ;;  %v2933_v19 = vld [vmem:[#allocation9 + $0x1d8] sm:$0xff] }
 0x1e0   :  { %v3538_v16 = vld [vmem:[#allocation26_spill] sm:$0xff] }
 0x1e1   :  { %v2915_v34 = vadd.f32 %v751_v52, %v750_v57  ;;  %v739_v23 = vadd.f32 %v1912_v41, %v738_v8  ;;  %v2927_v57 = vld [vmem:[#allocation9 + $0x1f8] sm:$0xff] }
 0x1e3   :  { %1915 = vtanh.f32 %v2915_v34  ;;  %v743_v26 = vsel %vm742_vm6, %v1912_v41, %v739_v23  ;;  %v3539_v41 = vld [vmem:[#allocation47_spill] sm:$0xff] }
 0x1e4   :  { %v748_v60 = vsel %vm745_vm7, %v747_v25, %v743_v26  ;;  %v3541_v25 = vld [vmem:[#allocation48_spill] sm:$0xff] }
 0x1e9   :  { %v1916_v14 = vpop.eup %1915 }
 0x1ea   :  { %v2918_v35 = vmul.f32 %v1916_v14, %v748_v60 }
 0x1ec   :  { %3520 = vst [vmem:[#allocation30_spill] sm:$0xff] %v2918_v35  ;;  %780 = vmatmul.f32.vlgmr.msra.gmra.mxu0 %v2918_v35  ;;  %800 = vmatmul.f32.vlgmr.msra.gmra.mxu1 %v2918_v35 }
 0x1ed   :  { %820 = vmatmul.f32.vlgmr.msra.gmra.mxu2 %v2918_v35  ;;  %840 = vmatmul.f32.vlgmr.msrb.gmra.mxu3 %v2918_v35  ;;  %v3155_v35 = vld [vmem:[#allocation9 + $0x8] sm:$0xff] }
 0x1ee   :  { %1076 = vmatpush.msra.mxu0 %v2814_v32  ;;  %1096 = vmatpush.msra.mxu1 %v2489_v54  ;;  %v2939_v54 = vld [vmem:[#allocation9 + $0x1b8] sm:$0xff]  ;;  %3554 = vst [vmem:[#allocation69_spill] sm:$0xff] %v3155_v35 }
 0x1ef   :  { %1116 = vmatpush.msra.mxu2 %v2492_v56  ;;  %1136 = vmatpush.msrb.mxu3 %v2927_v57  ;;  %v2945_v56 = vld [vmem:[#allocation9 + $0x198] sm:$0xff] }
 0x1f0   :  { %1077 = vmatpush.msra.mxu0 %v2820_v1  ;;  %1097 = vmatpush.msra.mxu1 %v2496_v58  ;;  %v2951_v58 = vld [vmem:[#allocation9 + $0x178] sm:$0xff] }
 0x1f1   :  { %1117 = vmatpush.msra.mxu2 %v2502_v63  ;;  %1137 = vmatpush.msrb.mxu3 %v2933_v19  ;;  %v2957_v63 = vld [vmem:[#allocation9 + $0x158] sm:$0xff] }
 0x1f2   :  { %1078 = vmatpush.msra.mxu0 %v2826_v53  ;;  %1098 = vmatpush.msra.mxu1 %v2505_v0  ;;  %v2963_v0 = vld [vmem:[#allocation9 + $0x138] sm:$0xff] }
 0x1f3   :  { %1118 = vmatpush.msra.mxu2 %v2511_v3  ;;  %1138 = vmatpush.msrb.mxu3 %v2939_v54  ;;  %v2969_v3 = vld [vmem:[#allocation9 + $0x118] sm:$0xff] }
 0x1f4   :  { %1079 = vmatpush.msra.mxu0 %v2832_v55  ;;  %1099 = vmatpush.msra.mxu1 %v2514_v5  ;;  %v2975_v5 = vld [vmem:[#allocation9 + $0xf8] sm:$0xff] }
 0x1f5   :  { %1119 = vmatpush.msra.mxu2 %v2522_v9  ;;  %1139 = vmatpush.msrb.mxu3 %v2945_v56  ;;  %v2981_v9 = vld [vmem:[#allocation9 + $0xd8] sm:$0xff] }
 0x1f6   :  { %1080 = vmatpush.msra.mxu0 %v2838_v59  ;;  %1100 = vmatpush.msra.mxu1 %v2524_v10  ;;  %3521 = vst [vmem:[#allocation23_spill] sm:$0xff] %v2981_v9  ;;  %v2987_v10 = vld [vmem:[#allocation9 + $0xb8] sm:$0xff] }
 0x1f7   :  { %1120 = vmatpush.msra.mxu2 %v2530_v13  ;;  %1140 = vmatpush.msrb.mxu3 %v2951_v58  ;;  %3522 = vst [vmem:[#allocation44_spill] sm:$0xff] %v2987_v10  ;;  %v2993_v13 = vld [vmem:[#allocation9 + $0x98] sm:$0xff] }
 0x1f8   :  { %1081 = vmatpush.msra.mxu0 %v2844_v2  ;;  %1101 = vmatpush.msra.mxu1 %v2533_v18  ;;  %3523 = vst [vmem:[#allocation25_spill] sm:$0xff] %v2993_v13  ;;  %v3524_v18 = vld [vmem:[#allocation32_spill] sm:$0xff] }
 0x1f9   :  { %1121 = vmatpush.msra.mxu2 %v2540_v21  ;;  %1141 = vmatpush.msrb.mxu3 %v2957_v63  ;;  %v2999_v21 = vld [vmem:[#allocation9 + $0x78] sm:$0xff] }
 0x1fa   :  { %1082 = vmatpush.msra.mxu0 %v2850_v7  ;;  %1102 = vmatpush.msra.mxu1 %v2543_v24  ;;  %3525 = vst [vmem:[#allocation45_spill] sm:$0xff] %v2999_v21  ;;  %v3526_v24 = vld [vmem:[#allocation27_spill] sm:$0xff] }
 0x1fb   :  { %1122 = vmatpush.msra.mxu2 %v2550_v28  ;;  %1142 = vmatpush.msrb.mxu3 %v2963_v0  ;;  %v3527_v28 = vld [vmem:[#allocation31_spill] sm:$0xff] }
 0x1fc   :  { %1083 = vmatpush.msra.mxu0 %v2856_v12  ;;  %1103 = vmatpush.msra.mxu1 %v2552_v30  ;;  %v3528_v30 = vld [vmem:[#allocation33_spill] sm:$0xff] }
 0x1fd   :  { %1123 = vmatpush.msra.mxu2 %v2558_v61  ;;  %1143 = vmatpush.msrb.mxu3 %v2969_v3  ;;  %v3005_v61 = vld [vmem:[#allocation9 + $0x58] sm:$0xff] }
 0x1fe   :  { %1084 = vmatpush.msra.mxu0 %v2862_v22  ;;  %1104 = vmatpush.msra.mxu1 %v2560_v33  ;;  %3529 = vst [vmem:[#allocation32_spill] sm:$0xff] %v3005_v61  ;;  %v3530_v33 = vld [vmem:[#allocation28_spill] sm:$0xff] }
 0x1ff   :  { %1124 = vmatpush.msra.mxu2 %v2565_v37  ;;  %1144 = vmatpush.msrb.mxu3 %v2975_v5  ;;  %v3531_v37 = vld [vmem:[#allocation34_spill] sm:$0xff] }
 0x200   :  { %1085 = vmatpush.msra.mxu0 %v2868_v27  ;;  %1105 = vmatpush.msra.mxu1 %v2569_v39  ;;  %v3532_v39 = vld [vmem:[#allocation35_spill] sm:$0xff] }
 0x201   :  { %1125 = vmatpush.msra.mxu2 %v2574_v40  ;;  %1145 = vmatpush.msrb.mxu3 %v2981_v9  ;;  %v3011_v40 = vld [vmem:[#allocation9 + $0x38] sm:$0xff] }
 0x202   :  { %1086 = vmatpush.msra.mxu0 %v2874_v31  ;;  %1106 = vmatpush.msra.mxu1 %v2577_v43  ;;  %3533 = vst [vmem:[#allocation31_spill] sm:$0xff] %v3011_v40  ;;  %v3534_v43 = vld [vmem:[#allocation29_spill] sm:$0xff] }
 0x203   :  { %1126 = vmatpush.msra.mxu2 %v2581_v45  ;;  %1146 = vmatpush.msrb.mxu3 %v2987_v10  ;;  %v3535_v45 = vld [vmem:[#allocation36_spill] sm:$0xff] }
 0x204   :  { %1087 = vmatpush.msra.mxu0 %v2880_v42  ;;  %1107 = vmatpush.msra.mxu1 %v2584_v49  ;;  %v3536_v49 = vld [vmem:[#allocation37_spill] sm:$0xff] }
 0x205   :  { %1127 = vmatpush.msra.mxu2 %v2589_v15  ;;  %1147 = vmatpush.msrb.mxu3 %v2993_v13  ;;  %v3017_v15 = vld [vmem:[#allocation9 + $0x18] sm:$0xff] }
 0x206   :  { %1088 = vmatpush.msra.mxu0 %v2886_v46  ;;  %1108 = vmatpush.msra.mxu1 %v2592_v50  ;;  %3537 = vst [vmem:[#allocation33_spill] sm:$0xff] %v3017_v15 }
 0x207   :  { %1128 = vmatpush.msra.mxu2 %v3524_v18  ;;  %1148 = vmatpush.msrb.mxu3 %v2999_v21 }
 0x208   :  { %1089 = vmatpush.msra.mxu0 %v3526_v24  ;;  %1109 = vmatpush.msra.mxu1 %v3527_v28 }
 0x209   :  { %1129 = vmatpush.msra.mxu2 %v3528_v30  ;;  %1149 = vmatpush.msrb.mxu3 %v3005_v61 }
 0x20a   :  { %1090 = vmatpush.msra.mxu0 %v3530_v33  ;;  %1110 = vmatpush.msra.mxu1 %v3531_v37 }
 0x20b   :  { %1130 = vmatpush.msra.mxu2 %v3532_v39  ;;  %1150 = vmatpush.msrb.mxu3 %v3011_v40 }
 0x20c   :  { %1091 = vmatpush.msra.mxu0 %v3534_v43  ;;  %1111 = vmatpush.msra.mxu1 %v3535_v45 }
 0x20d   :  { %1131 = vmatpush.msra.mxu2 %v3536_v49  ;;  %1151 = vmatpush.msrb.mxu3 %v3017_v15 }
 0x269   :  { %v781_v50 = vpop.f32.mrf.mxu0  ;;  %v801_v52 = vpop.f32.mrf.mxu1 }
 0x26a   :  { %v844_v20 = vadd.f32 %v781_v50, %v3538_v16  ;;  %v845_v4 = vadd.f32 %v801_v52, %v3539_v41 }
 0x26c   :  { %v1837_v44 = vmul.f32 -1.442695, %v844_v20  ;;  %v1838_v29 = vmul.f32 -1.442695, %v845_v4 }
 0x26e   :  { %1917 = vpow2.f32 %v1837_v44 }
 0x26f   :  { %1919 = vpow2.f32 %v1838_v29 }
 0x270   :  { %v841_v36 = vpop.f32.mrf.mxu3  ;;  %v821_v23 = vpop.f32.mrf.mxu2 }
 0x271   :  { %v847_v62 = vadd.f32 %v841_v36, %v3540_v47  ;;  %v846_v14 = vadd.f32 %v821_v23, %v3541_v25 }
 0x273   :  { %v1839_v17 = vmul.f32 -1.442695, %v847_v62 }
 0x274   :  { %v1918_v11 = vpop.eup %1917 }
 0x275   :  { %v1920_v51 = vpop.eup %1919  ;;  %v851_v6 = vadd.f32 1.0, %v1918_v11  ;;  %1921 = vpow2.f32 %v1839_v17 }
 0x276   :  { %v870_v8 = vadd.f32 1.0, %v1920_v51 }
 0x277   :  { %1923 = vrcp.f32 %v851_v6  ;;  %v863_v39 = vand.u32 2147483648, %v851_v6  ;;  %v861_v50 = vand.u32 2147483647, %v851_v6  ;;  %vm857_vm10 = vweird.f32 %v851_v6 }
 0x278   :  { %1925 = vrcp.f32 %v870_v8  ;;  %v882_v45 = vand.u32 2147483648, %v870_v8  ;;  %v880_v16 = vand.u32 2147483647, %v870_v8  ;;  %vm876_vm11 = vweird.f32 %v870_v8 }
 0x279   :  { %v864_v4 = vor.u32 1.1754944e-38, %v863_v39  ;;  %vm862_vm14 = vcmp.eq.f32.partialorder %v861_v50, 8.507059e+37  ;;  %v3051_v50 = vld [vmem:[#allocation9 + $0x1a8] sm:$0xff] }
 0x27a   :  { %v883_v36 = vor.u32 1.1754944e-38, %v882_v45  ;;  %vm881_vm15 = vcmp.eq.f32.partialorder %v880_v16, 8.507059e+37  ;;  %v3043_v45 = vld [vmem:[#allocation9 + $0x1c8] sm:$0xff] }
 0x27b   :  { %v1922_v48 = vpop.eup %1921  ;;  %v3059_v16 = vld [vmem:[#allocation9 + $0x188] sm:$0xff] }
 0x27c   :  { %v890_v38 = vadd.f32 1.0, %v1922_v48 }
 0x27d   :  { %v1924_v26 = vpop.eup %1923 }
 0x27e   :  { %v1926_v60 = vpop.eup %1925  ;;  %v853_v18 = vmul.f32 %v1924_v26, %v851_v6  ;;  %1927 = vrcp.f32 %v890_v38  ;;  %vm858_vm8 = vweird.f32 %v1924_v26  ;;  %vm896_vm1 = vweird.f32 %v890_v38 }
 0x27f   :  { %v872_v28 = vmul.f32 %v1926_v60, %v870_v8  ;;  %1929 = vtanh.f32 %v846_v14  ;;  %vm877_vm9 = vweird.f32 %v1926_v60  ;;  %vm859_vm12 = vmor %vm857_vm10, %vm858_vm8 }
 0x280   :  { %v854_v30 = vsub.f32 1.0, %v853_v18  ;;  %vm878_vm13 = vmor %vm876_vm11, %vm877_vm9  ;;  %v902_v18 = vand.u32 2147483648, %v890_v38 }
 0x281   :  { %v873_v37 = vsub.f32 1.0, %v872_v28 }
 0x282   :  { %v855_v49 = vmul.f32 %v1924_v26, %v854_v30  ;;  %v903_v30 = vor.u32 1.1754944e-38, %v902_v18  ;;  %v3126_v18 = vld [vmem:[#allocation9 + $0x90] sm:$0xff] }
 0x283   :  { %v874_v52 = vmul.f32 %v1926_v60, %v873_v37  ;;  %3547 = vst [vmem:[#allocation47_spill] sm:$0xff] %v3126_v18 }
 0x284   :  { %v1928_v20 = vpop.eup %1927  ;;  %v856_v41 = vadd.f32 %v1924_v26, %v855_v49  ;;  %v3046_v49 = vld [vmem:[#allocation9 + $0x1d0] sm:$0xff] }
 0x285   :  { %v875_v44 = vadd.f32 %v1926_v60, %v874_v52  ;;  %v892_v29 = vmul.f32 %v1928_v20, %v890_v38  ;;  %v1930_v62 = vpop.eup %1929  ;;  %vm897_vm0 = vweird.f32 %v1928_v20  ;;  %v3054_v52 = vld [vmem:[#allocation9 + $0x1b0] sm:$0xff] }
 0x286   :  { %v860_v47 = vsel %vm859_vm12, %v1924_v26, %v856_v41  ;;  %v900_v26 = vand.u32 2147483647, %v890_v38  ;;  %vm898_vm2 = vmor %vm896_vm1, %vm897_vm0  ;;  %v3038_v38 = vld [vmem:[#allocation9 + $0x1f0] sm:$0xff]  ;;  %v3067_v41 = vld [vmem:[#allocation9 + $0x168] sm:$0xff] }
 0x287   :  { %v865_v17 = vsel %vm862_vm14, %v864_v4, %v860_v47  ;;  %v879_v11 = vsel %vm878_vm13, %v1926_v60, %v875_v44  ;;  %v893_v51 = vsub.f32 1.0, %v892_v29  ;;  %v3070_v4 = vld [vmem:[#allocation9 + $0x170] sm:$0xff]  ;;  %v3075_v44 = vld [vmem:[#allocation9 + $0x148] sm:$0xff] }
 0x288   :  { %v884_v23 = vsel %vm881_vm15, %v883_v36, %v879_v11  ;;  %v907_v48 = vmul.f32 %v1930_v62, %v865_v17  ;;  %vm901_vm3 = vcmp.eq.f32.partialorder %v900_v26, 8.507059e+37  ;;  %v3078_v29 = vld [vmem:[#allocation9 + $0x150] sm:$0xff]  ;;  %v3083_v36 = vld [vmem:[#allocation9 + $0x128] sm:$0xff] }
 0x289   :  { %v906_v25 = vmul.f32 %v884_v23, %v2915_v34  ;;  %v894_v14 = vmul.f32 %v1928_v20, %v893_v51  ;;  %v3035_v34 = vld [vmem:[#allocation9 + $0x1e8] sm:$0xff]  ;;  %v3086_v47 = vld [vmem:[#allocation9 + $0x130] sm:$0xff] }
 0x28a   :  { %v3091_v62 = vld [vmem:[#allocation9 + $0x108] sm:$0xff]  ;;  %v3094_v17 = vld [vmem:[#allocation9 + $0x110] sm:$0xff] }
 0x28b   :  { %v3025_v6 = vadd.f32 %v907_v48, %v906_v25  ;;  %v895_v8 = vadd.f32 %v1928_v20, %v894_v14  ;;  %v3099_v11 = vld [vmem:[#allocation9 + $0xe8] sm:$0xff]  ;;  %v3102_v51 = vld [vmem:[#allocation9 + $0xf0] sm:$0xff] }
 0x28c   :  { %v3107_v23 = vld [vmem:[#allocation9 + $0xc8] sm:$0xff]  ;;  %v3110_v48 = vld [vmem:[#allocation9 + $0xd0] sm:$0xff] }
 0x28d   :  { %1931 = vtanh.f32 %v3025_v6  ;;  %v899_v28 = vsel %vm898_vm2, %v1928_v20, %v895_v8  ;;  %v3062_v20 = vld [vmem:[#allocation9 + $0x190] sm:$0xff]  ;;  %3543 = vst [vmem:[#allocation35_spill] sm:$0xff] %v3110_v48  ;;  %v3115_v25 = vld [vmem:[#allocation9 + $0xa8] sm:$0xff] }
 0x28e   :  { %v904_v37 = vsel %vm901_vm3, %v903_v30, %v899_v28  ;;  %3544 = vst [vmem:[#allocation36_spill] sm:$0xff] %v3115_v25  ;;  %v3118_v14 = vld [vmem:[#allocation9 + $0xb0] sm:$0xff]  ;;  %v3123_v8 = vld [vmem:[#allocation9 + $0x88] sm:$0xff] }
 0x28f   :  { %3545 = vst [vmem:[#allocation37_spill] sm:$0xff] %v3118_v14  ;;  %v3131_v26 = vld [vmem:[#allocation9 + $0x68] sm:$0xff]  ;;  %v3134_v28 = vld [vmem:[#allocation9 + $0x70] sm:$0xff] }
 0x290   :  { %3546 = vst [vmem:[#allocation26_spill] sm:$0xff] %v3123_v8  ;;  %v3139_v30 = vld [vmem:[#allocation9 + $0x48] sm:$0xff] }
 0x291   :  { %3548 = vst [vmem:[#allocation39_spill] sm:$0xff] %v3131_v26 }
 0x292   :  { %3549 = vst [vmem:[#allocation48_spill] sm:$0xff] %v3134_v28 }
 0x293   :  { %v1932_v60 = vpop.eup %1931  ;;  %3550 = vst [vmem:[#allocation65_spill] sm:$0xff] %v3139_v30 }
 0x294   :  { %v3028_v39 = vmul.f32 %v1932_v60, %v904_v37  ;;  %v3142_v60 = vld [vmem:[#allocation9 + $0x50] sm:$0xff]  ;;  %v3147_v37 = vld [vmem:[#allocation9 + $0x28] sm:$0xff] }
 0x295   :  { %3551 = vst [vmem:[#allocation66_spill] sm:$0xff] %v3142_v60 }
 0x296   :  { %3542 = vst [vmem:[#allocation34_spill] sm:$0xff] %v3028_v39  ;;  %936 = vmatmul.f32.vlgmr.msrb.gmra.mxu0 %v3028_v39  ;;  %956 = vmatmul.f32.vlgmr.msrb.gmra.mxu1 %v3028_v39 }
 0x297   :  { %976 = vmatmul.f32.vlgmr.msrb.gmra.mxu2 %v3028_v39  ;;  %996 = vmatmul.f32.vlgmr.msra.gmra.mxu3 %v3028_v39  ;;  %3552 = vst [vmem:[#allocation67_spill] sm:$0xff] %v3147_v37  ;;  %v3150_v39 = vld [vmem:[#allocation9 + $0x30] sm:$0xff] }
 0x298   :  { %1232 = vmatpush.msrb.mxu0 %v2814_v32  ;;  %1252 = vmatpush.msrb.mxu1 %v3035_v34  ;;  %3553 = vst [vmem:[#allocation68_spill] sm:$0xff] %v3150_v39 }
 0x299   :  { %1272 = vmatpush.msrb.mxu2 %v3038_v38  ;;  %1292 = vmatpush.msra.mxu3 %v2927_v57 }
 0x29a   :  { %1233 = vmatpush.msrb.mxu0 %v2820_v1  ;;  %1253 = vmatpush.msrb.mxu1 %v3043_v45 }
 0x29b   :  { %1273 = vmatpush.msrb.mxu2 %v3046_v49  ;;  %1293 = vmatpush.msra.mxu3 %v2933_v19 }
 0x29c   :  { %1234 = vmatpush.msrb.mxu0 %v2826_v53  ;;  %1254 = vmatpush.msrb.mxu1 %v3051_v50 }
 0x29d   :  { %1274 = vmatpush.msrb.mxu2 %v3054_v52  ;;  %1294 = vmatpush.msra.mxu3 %v2939_v54 }
 0x29e   :  { %1235 = vmatpush.msrb.mxu0 %v2832_v55  ;;  %1255 = vmatpush.msrb.mxu1 %v3059_v16 }
 0x29f   :  { %1275 = vmatpush.msrb.mxu2 %v3062_v20  ;;  %1295 = vmatpush.msra.mxu3 %v2945_v56 }
 0x2a0   :  { %1236 = vmatpush.msrb.mxu0 %v2838_v59  ;;  %1256 = vmatpush.msrb.mxu1 %v3067_v41 }
 0x2a1   :  { %1276 = vmatpush.msrb.mxu2 %v3070_v4  ;;  %1296 = vmatpush.msra.mxu3 %v2951_v58 }
 0x2a2   :  { %1237 = vmatpush.msrb.mxu0 %v2844_v2  ;;  %1257 = vmatpush.msrb.mxu1 %v3075_v44 }
 0x2a3   :  { %1277 = vmatpush.msrb.mxu2 %v3078_v29  ;;  %1297 = vmatpush.msra.mxu3 %v2957_v63 }
 0x2a4   :  { %1238 = vmatpush.msrb.mxu0 %v2850_v7  ;;  %1258 = vmatpush.msrb.mxu1 %v3083_v36 }
 0x2a5   :  { %1278 = vmatpush.msrb.mxu2 %v3086_v47  ;;  %1298 = vmatpush.msra.mxu3 %v2963_v0 }
 0x2a6   :  { %1239 = vmatpush.msrb.mxu0 %v2856_v12  ;;  %1259 = vmatpush.msrb.mxu1 %v3091_v62 }
 0x2a7   :  { %1279 = vmatpush.msrb.mxu2 %v3094_v17  ;;  %1299 = vmatpush.msra.mxu3 %v2969_v3 }
 0x2a8   :  { %1240 = vmatpush.msrb.mxu0 %v2862_v22  ;;  %1260 = vmatpush.msrb.mxu1 %v3099_v11 }
 0x2a9   :  { %1280 = vmatpush.msrb.mxu2 %v3102_v51  ;;  %1300 = vmatpush.msra.mxu3 %v2975_v5 }
 0x2aa   :  { %1241 = vmatpush.msrb.mxu0 %v2868_v27  ;;  %1261 = vmatpush.msrb.mxu1 %v3107_v23 }
 0x2ab   :  { %1281 = vmatpush.msrb.mxu2 %v3110_v48  ;;  %1301 = vmatpush.msra.mxu3 %v2981_v9 }
 0x2ac   :  { %1242 = vmatpush.msrb.mxu0 %v2874_v31  ;;  %1262 = vmatpush.msrb.mxu1 %v3115_v25 }
 0x2ad   :  { %1282 = vmatpush.msrb.mxu2 %v3118_v14  ;;  %1302 = vmatpush.msra.mxu3 %v2987_v10 }
 0x2ae   :  { %1243 = vmatpush.msrb.mxu0 %v2880_v42  ;;  %1263 = vmatpush.msrb.mxu1 %v3123_v8 }
 0x2af   :  { %1283 = vmatpush.msrb.mxu2 %v3126_v18  ;;  %1303 = vmatpush.msra.mxu3 %v2993_v13 }
 0x2b0   :  { %1244 = vmatpush.msrb.mxu0 %v2886_v46  ;;  %1264 = vmatpush.msrb.mxu1 %v3131_v26 }
 0x2b1   :  { %1284 = vmatpush.msrb.mxu2 %v3134_v28  ;;  %1304 = vmatpush.msra.mxu3 %v2999_v21  ;;  %v3558_v28 = vld [vmem:[#allocation42_spill] sm:$0xff] }
 0x2b2   :  { %1245 = vmatpush.msrb.mxu0 %v3526_v24  ;;  %1265 = vmatpush.msrb.mxu1 %v3139_v30  ;;  %v3557_v24 = vld [vmem:[#allocation50_spill] sm:$0xff] }
 0x2b3   :  { %1285 = vmatpush.msrb.mxu2 %v3142_v60  ;;  %1305 = vmatpush.msra.mxu3 %v3005_v61  ;;  %v3158_v60 = vld [vmem:[#allocation9 + $0x10] sm:$0xff]  ;;  %v3556_v61 = vld [vmem:[#allocation40_spill] sm:$0xff] }
 0x2b4   :  { %1246 = vmatpush.msrb.mxu0 %v3530_v33  ;;  %1266 = vmatpush.msrb.mxu1 %v3147_v37  ;;  %3555 = vst [vmem:[#allocation70_spill] sm:$0xff] %v3158_v60 }
 0x2b5   :  { %1286 = vmatpush.msrb.mxu2 %v3150_v39  ;;  %1306 = vmatpush.msra.mxu3 %v3011_v40 }
 0x2b6   :  { %1247 = vmatpush.msrb.mxu0 %v3534_v43  ;;  %1267 = vmatpush.msrb.mxu1 %v3155_v35 }
 0x2b7   :  { %1287 = vmatpush.msrb.mxu2 %v3158_v60  ;;  %1307 = vmatpush.msra.mxu3 %v3017_v15 }
 0x313   :  { %v937_v33 = vpop.f32.mrf.mxu0  ;;  %v957_v37 = vpop.f32.mrf.mxu1 }
 0x314   :  { %v1000_v30 = vadd.f32 %v937_v33, %v3556_v61  ;;  %v1001_v39 = vadd.f32 %v957_v37, %v3557_v24  ;;  %v3559_v24 = vld [vmem:[#allocation51_spill] sm:$0xff] }
 0x316   :  { %v1840_v21 = vmul.f32 -1.442695, %v1000_v30  ;;  %v1841_v40 = vmul.f32 -1.442695, %v1001_v39 }
 0x318   :  { %1933 = vpow2.f32 %v1840_v21 }
 0x319   :  { %1935 = vpow2.f32 %v1841_v40 }
 0x31a   :  { %v997_v43 = vpop.f32.mrf.mxu3  ;;  %v977_v15 = vpop.f32.mrf.mxu2 }
 0x31b   :  { %v1003_v26 = vadd.f32 %v997_v43, %v3558_v28  ;;  %v1002_v30 = vadd.f32 %v977_v15, %v3559_v24 }
 0x31d   :  { %v1842_v35 = vmul.f32 -1.442695, %v1003_v26 }
 0x31e   :  { %v1934_v46 = vpop.eup %1933 }
 0x31f   :  { %v1936_v13 = vpop.eup %1935  ;;  %v1007_v18 = vadd.f32 1.0, %v1934_v46  ;;  %1937 = vpow2.f32 %v1842_v35 }
 0x320   :  { %v1026_v60 = vadd.f32 1.0, %v1936_v13 }
 0x321   :  { %1939 = vrcp.f32 %v1007_v18  ;;  %v1019_v26 = vand.u32 2147483648, %v1007_v18  ;;  %v1017_v35 = vand.u32 2147483647, %v1007_v18  ;;  %vm1013_vm6 = vweird.f32 %v1007_v18 }
 0x322   :  { %1941 = vrcp.f32 %v1026_v60  ;;  %v1038_v28 = vand.u32 2147483648, %v1026_v60  ;;  %v1036_v42 = vand.u32 2147483647, %v1026_v60  ;;  %vm1032_vm7 = vweird.f32 %v1026_v60 }
 0x323   :  { %v1020_v15 = vor.u32 1.1754944e-38, %v1019_v26  ;;  %vm1018_vm10 = vcmp.eq.f32.partialorder %v1017_v35, 8.507059e+37 }
 0x324   :  { %vm1037_vm11 = vcmp.eq.f32.partialorder %v1036_v42, 8.507059e+37 }
 0x325   :  { %v1938_v8 = vpop.eup %1937 }
 0x326   :  { %v1046_v61 = vadd.f32 1.0, %v1938_v8 }
 0x327   :  { %v1940_v33 = vpop.eup %1939 }
 0x328   :  { %v1942_v39 = vpop.eup %1941  ;;  %v1009_v21 = vmul.f32 %v1940_v33, %v1007_v18  ;;  %1943 = vrcp.f32 %v1046_v61  ;;  %vm1014_vm4 = vweird.f32 %v1940_v33  ;;  %v1058_v26 = vand.u32 2147483648, %v1046_v61 }
 0x329   :  { %v1028_v40 = vmul.f32 %v1942_v39, %v1026_v60  ;;  %1945 = vtanh.f32 %v1002_v30  ;;  %vm1033_vm5 = vweird.f32 %v1942_v39  ;;  %vm1015_vm8 = vmor %vm1013_vm6, %vm1014_vm4  ;;  %vm1052_vm13 = vweird.f32 %v1046_v61 }
 0x32a   :  { %v1010_v37 = vsub.f32 1.0, %v1009_v21  ;;  %vm1034_vm9 = vmor %vm1032_vm7, %vm1033_vm5  ;;  %v1039_v21 = vor.u32 1.1754944e-38, %v1038_v28  ;;  %v1059_v35 = vor.u32 1.1754944e-38, %v1058_v26  ;;  %v3587_v26 = vld [vmem:[#allocation22_spill] sm:$0xff] }
 0x32b   :  { %v1029_v43 = vsub.f32 1.0, %v1028_v40 }
 0x32c   :  { %v1011_v46 = vmul.f32 %v1940_v33, %v1010_v37 }
 0x32d   :  { %v1030_v13 = vmul.f32 %v1942_v39, %v1029_v43 }
 0x32e   :  { %v1944_v10 = vpop.eup %1943  ;;  %v1012_v8 = vadd.f32 %v1940_v33, %v1011_v46 }
 0x32f   :  { %v1031_v24 = vadd.f32 %v1942_v39, %v1030_v13  ;;  %v1048_v14 = vmul.f32 %v1944_v10, %v1046_v61  ;;  %v1946_v30 = vpop.eup %1945  ;;  %vm1053_vm12 = vweird.f32 %v1944_v10  ;;  %v3578_v13 = vld [vmem:[#allocation32_spill] sm:$0xff] }
 0x330   :  { %v1016_v40 = vsel %vm1015_vm8, %v1940_v33, %v1012_v8  ;;  %v1056_v33 = vand.u32 2147483647, %v1046_v61  ;;  %vm1054_vm14 = vmor %vm1052_vm13, %vm1053_vm12  ;;  %v3577_v61 = vld [vmem:[#allocation66_spill] sm:$0xff]  ;;  %v3579_v8 = vld [vmem:[#allocation28_spill] sm:$0xff] }
 0x331   :  { %v1021_v25 = vsel %vm1018_vm10, %v1020_v15, %v1016_v40  ;;  %v1035_v37 = vsel %vm1034_vm9, %v1942_v39, %v1031_v24  ;;  %v1049_v31 = vsub.f32 1.0, %v1048_v14  ;;  %v3580_v15 = vld [vmem:[#allocation67_spill] sm:$0xff]  ;;  %v3581_v24 = vld [vmem:[#allocation68_spill] sm:$0xff]  ;;  %v3583_v40 = vld [vmem:[#allocation29_spill] sm:$0xff] }
 0x332   :  { %v1040_v43 = vsel %vm1037_vm11, %v1039_v21, %v1035_v37  ;;  %v1063_v9 = vmul.f32 %v1946_v30, %v1021_v25  ;;  %vm1057_vm15 = vcmp.eq.f32.partialorder %v1056_v33, 8.507059e+37  ;;  %v3576_v25 = vld [vmem:[#allocation65_spill] sm:$0xff]  ;;  %v3582_v21 = vld [vmem:[#allocation31_spill] sm:$0xff]  ;;  %v3585_v37 = vld [vmem:[#allocation70_spill] sm:$0xff] }
 0x333   :  { %v1062_v48 = vmul.f32 %v1040_v43, %v3025_v6  ;;  %v1050_v46 = vmul.f32 %v1944_v10, %v1049_v31  ;;  %v3571_v31 = vld [vmem:[#allocation64_spill] sm:$0xff]  ;;  %v3574_v6 = vld [vmem:[#allocation45_spill] sm:$0xff] }
 0x334   :  { %v3584_v30 = vld [vmem:[#allocation69_spill] sm:$0xff] }
 0x335   :  { %v3167_v18 = vadd.f32 %v1063_v9, %v1062_v48  ;;  %v1051_v60 = vadd.f32 %v1944_v10, %v1050_v46  ;;  %v3572_v9 = vld [vmem:[#allocation39_spill] sm:$0xff]  ;;  %v3586_v43 = vld [vmem:[#allocation33_spill] sm:$0xff] }
 0x336   :  { %v3575_v48 = vld [vmem:[#allocation27_spill] sm:$0xff] }
 0x337   :  { %1947 = vtanh.f32 %v3167_v18  ;;  %v1055_v28 = vsel %vm1054_vm14, %v1944_v10, %v1051_v60  ;;  %v3573_v10 = vld [vmem:[#allocation48_spill] sm:$0xff] }
 0x338   :  { %v1060_v14 = vsel %vm1057_vm15, %v1059_v35, %v1055_v28  ;;  %v3588_v28 = vld [vmem:[#allocation53_spill] sm:$0xff] }
 0x33d   :  { %v1948_v42 = vpop.eup %1947 }
 0x33e   :  { %v3170_v39 = vmul.f32 %v1948_v42, %v1060_v14 }
 0x340   :  { %3560 = vst [vmem:[#allocation40_spill] sm:$0xff] %v3170_v39  ;;  %1092 = vmatmul.f32.vlgmr.msra.gmra.mxu0 %v3170_v39  ;;  %1112 = vmatmul.f32.vlgmr.msra.gmra.mxu1 %v3170_v39 }
 0x341   :  { %1132 = vmatmul.f32.vlgmr.msra.gmra.mxu2 %v3170_v39  ;;  %1152 = vmatmul.f32.vlgmr.msrb.gmra.mxu3 %v3170_v39 }
 0x342   :  { %1388 = vmatpush.msra.mxu0 %v2814_v32  ;;  %1408 = vmatpush.msra.mxu1 %v3035_v34  ;;  %v3561_v32 = vld [vmem:[#allocation35_spill] sm:$0xff] }
 0x343   :  { %1428 = vmatpush.msra.mxu2 %v3038_v38  ;;  %1448 = vmatpush.msrb.mxu3 %v2927_v57 }
 0x344   :  { %1389 = vmatpush.msra.mxu0 %v2820_v1  ;;  %1409 = vmatpush.msra.mxu1 %v3043_v45  ;;  %v3562_v1 = vld [vmem:[#allocation23_spill] sm:$0xff] }
 0x345   :  { %1429 = vmatpush.msra.mxu2 %v3046_v49  ;;  %1449 = vmatpush.msrb.mxu3 %v2933_v19 }
 0x346   :  { %1390 = vmatpush.msra.mxu0 %v2826_v53  ;;  %1410 = vmatpush.msra.mxu1 %v3051_v50  ;;  %v3563_v53 = vld [vmem:[#allocation62_spill] sm:$0xff] }
 0x347   :  { %1430 = vmatpush.msra.mxu2 %v3054_v52  ;;  %1450 = vmatpush.msrb.mxu3 %v2939_v54 }
 0x348   :  { %1391 = vmatpush.msra.mxu0 %v2832_v55  ;;  %1411 = vmatpush.msra.mxu1 %v3059_v16  ;;  %v3564_v55 = vld [vmem:[#allocation36_spill] sm:$0xff] }
 0x349   :  { %1431 = vmatpush.msra.mxu2 %v3062_v20  ;;  %1451 = vmatpush.msrb.mxu3 %v2945_v56 }
 0x34a   :  { %1392 = vmatpush.msra.mxu0 %v2838_v59  ;;  %1412 = vmatpush.msra.mxu1 %v3067_v41  ;;  %v3565_v59 = vld [vmem:[#allocation37_spill] sm:$0xff] }
 0x34b   :  { %1432 = vmatpush.msra.mxu2 %v3070_v4  ;;  %1452 = vmatpush.msrb.mxu3 %v2951_v58 }
 0x34c   :  { %1393 = vmatpush.msra.mxu0 %v2844_v2  ;;  %1413 = vmatpush.msra.mxu1 %v3075_v44  ;;  %v3566_v2 = vld [vmem:[#allocation44_spill] sm:$0xff] }
 0x34d   :  { %1433 = vmatpush.msra.mxu2 %v3078_v29  ;;  %1453 = vmatpush.msrb.mxu3 %v2957_v63 }
 0x34e   :  { %1394 = vmatpush.msra.mxu0 %v2850_v7  ;;  %1414 = vmatpush.msra.mxu1 %v3083_v36  ;;  %v3567_v7 = vld [vmem:[#allocation63_spill] sm:$0xff] }
 0x34f   :  { %1434 = vmatpush.msra.mxu2 %v3086_v47  ;;  %1454 = vmatpush.msrb.mxu3 %v2963_v0 }
 0x350   :  { %1395 = vmatpush.msra.mxu0 %v2856_v12  ;;  %1415 = vmatpush.msra.mxu1 %v3091_v62  ;;  %v3568_v12 = vld [vmem:[#allocation26_spill] sm:$0xff] }
 0x351   :  { %1435 = vmatpush.msra.mxu2 %v3094_v17  ;;  %1455 = vmatpush.msrb.mxu3 %v2969_v3 }
 0x352   :  { %1396 = vmatpush.msra.mxu0 %v2862_v22  ;;  %1416 = vmatpush.msra.mxu1 %v3099_v11  ;;  %v3569_v22 = vld [vmem:[#allocation47_spill] sm:$0xff] }
 0x353   :  { %1436 = vmatpush.msra.mxu2 %v3102_v51  ;;  %1456 = vmatpush.msrb.mxu3 %v2975_v5 }
 0x354   :  { %1397 = vmatpush.msra.mxu0 %v2868_v27  ;;  %1417 = vmatpush.msra.mxu1 %v3107_v23  ;;  %v3570_v27 = vld [vmem:[#allocation25_spill] sm:$0xff] }
 0x355   :  { %1437 = vmatpush.msra.mxu2 %v3561_v32  ;;  %1457 = vmatpush.msrb.mxu3 %v3562_v1 }
 0x356   :  { %1398 = vmatpush.msra.mxu0 %v3563_v53  ;;  %1418 = vmatpush.msra.mxu1 %v3564_v55 }
 0x357   :  { %1438 = vmatpush.msra.mxu2 %v3565_v59  ;;  %1458 = vmatpush.msrb.mxu3 %v3566_v2 }
 0x358   :  { %1399 = vmatpush.msra.mxu0 %v3567_v7  ;;  %1419 = vmatpush.msra.mxu1 %v3568_v12  ;;  %v3589_v7 = vld [vmem:[#allocation43_spill] sm:$0xff] }
 0x359   :  { %1439 = vmatpush.msra.mxu2 %v3569_v22  ;;  %1459 = vmatpush.msrb.mxu3 %v3570_v27 }
 0x35a   :  { %1400 = vmatpush.msra.mxu0 %v3571_v31  ;;  %1420 = vmatpush.msra.mxu1 %v3572_v9 }
 0x35b   :  { %1440 = vmatpush.msra.mxu2 %v3573_v10  ;;  %1460 = vmatpush.msrb.mxu3 %v3574_v6 }
 0x35c   :  { %1401 = vmatpush.msra.mxu0 %v3575_v48  ;;  %1421 = vmatpush.msra.mxu1 %v3576_v25 }
 0x35d   :  { %1441 = vmatpush.msra.mxu2 %v3577_v61  ;;  %1461 = vmatpush.msrb.mxu3 %v3578_v13 }
 0x35e   :  { %1402 = vmatpush.msra.mxu0 %v3579_v8  ;;  %1422 = vmatpush.msra.mxu1 %v3580_v15 }
 0x35f   :  { %1442 = vmatpush.msra.mxu2 %v3581_v24  ;;  %1462 = vmatpush.msrb.mxu3 %v3582_v21 }
 0x360   :  { %1403 = vmatpush.msra.mxu0 %v3583_v40  ;;  %1423 = vmatpush.msra.mxu1 %v3584_v30 }
 0x361   :  { %1443 = vmatpush.msra.mxu2 %v3585_v37  ;;  %1463 = vmatpush.msrb.mxu3 %v3586_v43 }
 0x3bd   :  { %v1093_v46 = vpop.f32.mrf.mxu0  ;;  %v1113_v60 = vpop.f32.mrf.mxu1 }
 0x3be   :  { %v1156_v33 = vadd.f32 %v1093_v46, %v3587_v26  ;;  %v1157_v35 = vadd.f32 %v1113_v60, %v3588_v28  ;;  %v3590_v60 = vld [vmem:[#allocation54_spill] sm:$0xff] }
 0x3c0   :  { %v1843_v42 = vmul.f32 -1.442695, %v1156_v33  ;;  %v1844_v14 = vmul.f32 -1.442695, %v1157_v35 }
 0x3c2   :  { %1949 = vpow2.f32 %v1843_v42 }
 0x3c3   :  { %1951 = vpow2.f32 %v1844_v14 }
 0x3c4   :  { %v1153_v53 = vpop.f32.mrf.mxu3  ;;  %v1133_v43 = vpop.f32.mrf.mxu2 }
 0x3c5   :  { %v1159_v31 = vadd.f32 %v1153_v53, %v3589_v7  ;;  %v1158_v33 = vadd.f32 %v1133_v43, %v3590_v60 }
 0x3c7   :  { %v1845_v48 = vmul.f32 -1.442695, %v1159_v31 }
 0x3c8   :  { %v1950_v8 = vpop.eup %1949 }
 0x3c9   :  { %v1952_v40 = vpop.eup %1951  ;;  %v1163_v39 = vadd.f32 1.0, %v1950_v8  ;;  %1953 = vpow2.f32 %v1845_v48 }
 0x3ca   :  { %v1182_v37 = vadd.f32 1.0, %v1952_v40 }
 0x3cb   :  { %1955 = vrcp.f32 %v1163_v39  ;;  %v1175_v7 = vand.u32 2147483648, %v1163_v39  ;;  %v1173_v48 = vand.u32 2147483647, %v1163_v39  ;;  %vm1169_vm2 = vweird.f32 %v1163_v39 }
 0x3cc   :  { %1957 = vrcp.f32 %v1182_v37  ;;  %v1194_v31 = vand.u32 2147483648, %v1182_v37  ;;  %v1192_v21 = vand.u32 2147483647, %v1182_v37  ;;  %vm1188_vm3 = vweird.f32 %v1182_v37 }
 0x3cd   :  { %v1176_v43 = vor.u32 1.1754944e-38, %v1175_v7  ;;  %vm1174_vm6 = vcmp.eq.f32.partialorder %v1173_v48, 8.507059e+37 }
 0x3ce   :  { %vm1193_vm7 = vcmp.eq.f32.partialorder %v1192_v21, 8.507059e+37 }
 0x3cf   :  { %v1954_v30 = vpop.eup %1953 }
 0x3d0   :  { %v1202_v46 = vadd.f32 1.0, %v1954_v30 }
 0x3d1   :  { %v1956_v26 = vpop.eup %1955 }
 0x3d2   :  { %v1958_v28 = vpop.eup %1957  ;;  %v1165_v35 = vmul.f32 %v1956_v26, %v1163_v39  ;;  %1959 = vrcp.f32 %v1202_v46  ;;  %vm1170_vm0 = vweird.f32 %v1956_v26  ;;  %v1214_v7 = vand.u32 2147483648, %v1202_v46 }
 0x3d3   :  { %v1184_v42 = vmul.f32 %v1958_v28, %v1182_v37  ;;  %1961 = vtanh.f32 %v1158_v33  ;;  %vm1189_vm1 = vweird.f32 %v1958_v28  ;;  %vm1171_vm4 = vmor %vm1169_vm2, %vm1170_vm0  ;;  %vm1208_vm9 = vweird.f32 %v1202_v46 }
 0x3d4   :  { %v1166_v14 = vsub.f32 1.0, %v1165_v35  ;;  %vm1190_vm5 = vmor %vm1188_vm3, %vm1189_vm1  ;;  %v1195_v35 = vor.u32 1.1754944e-38, %v1194_v31  ;;  %v1215_v48 = vor.u32 1.1754944e-38, %v1214_v7 }
 0x3d5   :  { %v1185_v53 = vsub.f32 1.0, %v1184_v42 }
 0x3d6   :  { %v1167_v8 = vmul.f32 %v1956_v26, %v1166_v14 }
 0x3d7   :  { %v1186_v40 = vmul.f32 %v1958_v28, %v1185_v53 }
 0x3d8   :  { %v1960_v24 = vpop.eup %1959  ;;  %v1168_v30 = vadd.f32 %v1956_v26, %v1167_v8 }
 0x3d9   :  { %v1187_v60 = vadd.f32 %v1958_v28, %v1186_v40  ;;  %v1204_v15 = vmul.f32 %v1960_v24, %v1202_v46  ;;  %v1962_v33 = vpop.eup %1961  ;;  %vm1209_vm8 = vweird.f32 %v1960_v24 }
 0x3da   :  { %v1172_v42 = vsel %vm1171_vm4, %v1956_v26, %v1168_v30  ;;  %v1212_v26 = vand.u32 2147483647, %v1202_v46  ;;  %vm1210_vm10 = vmor %vm1208_vm9, %vm1209_vm8  ;;  %v3604_v30 = vld [vmem:[#allocation56_spill] sm:$0xff] }
 0x3db   :  { %v1177_v13 = vsel %vm1174_vm6, %v1176_v43, %v1172_v42  ;;  %v1191_v14 = vsel %vm1190_vm5, %v1958_v28, %v1187_v60  ;;  %v1205_v61 = vsub.f32 1.0, %v1204_v15 }
 0x3dc   :  { %v1196_v53 = vsel %vm1193_vm7, %v1195_v35, %v1191_v14  ;;  %v1219_v25 = vmul.f32 %v1962_v33, %v1177_v13  ;;  %vm1213_vm11 = vcmp.eq.f32.partialorder %v1212_v26, 8.507059e+37 }
 0x3dd   :  { %v1218_v6 = vmul.f32 %v1196_v53, %v3167_v18  ;;  %v1206_v8 = vmul.f32 %v1960_v24, %v1205_v61  ;;  %v2077_v18 = vld [vmem:[#allocation9 + $0x1e0] sm:$0xff] }
 0x3df   :  { %v3245_v39 = vadd.f32 %v1219_v25, %v1218_v6  ;;  %v1207_v37 = vadd.f32 %v1960_v24, %v1206_v8  ;;  %v2078_v6 = vld [vmem:[#allocation9 + $0x1c0] sm:$0xff] }
 0x3e0   :  { %v2079_v25 = vld [vmem:[#allocation9 + $0x1a0] sm:$0xff] }
 0x3e1   :  { %1963 = vtanh.f32 %v3245_v39  ;;  %v1211_v31 = vsel %vm1210_vm10, %v1960_v24, %v1207_v37 }
 0x3e2   :  { %v1216_v15 = vsel %vm1213_vm11, %v1215_v48, %v1211_v31 }
 0x3e7   :  { %v1964_v21 = vpop.eup %1963 }
 0x3e8   :  { %v3248_v28 = vmul.f32 %v1964_v21, %v1216_v15 }
 0x3ea   :  { %1248 = vmatmul.f32.vlgmr.msrb.gmra.mxu0 %v3248_v28  ;;  %1268 = vmatmul.f32.vlgmr.msrb.gmra.mxu1 %v3248_v28 }
 0x3eb   :  { %1288 = vmatmul.f32.vlgmr.msrb.gmra.mxu2 %v3248_v28  ;;  %1308 = vmatmul.f32.vlgmr.msra.gmra.mxu3 %v3248_v28 }
 0x3ec   :  { %1544 = vmatpush.msrb.mxu0 %v2077_v18  ;;  %1564 = vmatpush.msrb.mxu1 %v3035_v34  ;;  %v2080_v34 = vld [vmem:[#allocation9 + $0x180] sm:$0xff] }
 0x3ed   :  { %1584 = vmatpush.msrb.mxu2 %v3038_v38  ;;  %1604 = vmatpush.msra.mxu3 %v2927_v57  ;;  %v2081_v57 = vld [vmem:[#allocation9 + $0x160] sm:$0xff]  ;;  %v3591_v38 = vld [vmem:[#allocation45_spill] sm:$0xff] }
 0x3ee   :  { %1545 = vmatpush.msrb.mxu0 %v2078_v6  ;;  %1565 = vmatpush.msrb.mxu1 %v3043_v45  ;;  %v2090_v45 = vld [vmem:[#allocation9 + $0x40] sm:$0xff] }
 0x3ef   :  { %1585 = vmatpush.msrb.mxu2 %v3046_v49  ;;  %1605 = vmatpush.msra.mxu3 %v2933_v19  ;;  %v2082_v19 = vld [vmem:[#allocation9 + $0x140] sm:$0xff]  ;;  %v3592_v49 = vld [vmem:[#allocation65_spill] sm:$0xff] }
 0x3f0   :  { %1546 = vmatpush.msrb.mxu0 %v2079_v25  ;;  %1566 = vmatpush.msrb.mxu1 %v3051_v50  ;;  %v3593_v50 = vld [vmem:[#allocation66_spill] sm:$0xff] }
 0x3f1   :  { %1586 = vmatpush.msrb.mxu2 %v3054_v52  ;;  %1606 = vmatpush.msra.mxu3 %v2939_v54  ;;  %v2083_v54 = vld [vmem:[#allocation9 + $0x120] sm:$0xff] }
 0x3f2   :  { %1547 = vmatpush.msrb.mxu0 %v2080_v34  ;;  %1567 = vmatpush.msrb.mxu1 %v3059_v16  ;;  %v3594_v52 = vld [vmem:[#allocation32_spill] sm:$0xff] }
 0x3f3   :  { %1587 = vmatpush.msrb.mxu2 %v3062_v20  ;;  %1607 = vmatpush.msra.mxu3 %v2945_v56  ;;  %v2084_v56 = vld [vmem:[#allocation9 + $0x100] sm:$0xff] }
 0x3f4   :  { %1548 = vmatpush.msrb.mxu0 %v2081_v57  ;;  %1568 = vmatpush.msrb.mxu1 %v3067_v41  ;;  %v2091_v16 = vld [vmem:[#allocation9 + $0x20] sm:$0xff] }
 0x3f5   :  { %1588 = vmatpush.msrb.mxu2 %v3070_v4  ;;  %1608 = vmatpush.msra.mxu3 %v2951_v58  ;;  %v2085_v58 = vld [vmem:[#allocation9 + $0xe0] sm:$0xff] }
 0x3f6   :  { %1549 = vmatpush.msrb.mxu0 %v2082_v19  ;;  %1569 = vmatpush.msrb.mxu1 %v3075_v44  ;;  %v3595_v20 = vld [vmem:[#allocation67_spill] sm:$0xff]  ;;  %v3596_v41 = vld [vmem:[#allocation68_spill] sm:$0xff] }
 0x3f7   :  { %1589 = vmatpush.msrb.mxu2 %v3078_v29  ;;  %1609 = vmatpush.msra.mxu3 %v2957_v63  ;;  %v2086_v63 = vld [vmem:[#allocation9 + $0xc0] sm:$0xff]  ;;  %v3598_v29 = vld [vmem:[#allocation69_spill] sm:$0xff] }
 0x3f8   :  { %1550 = vmatpush.msrb.mxu0 %v2083_v54  ;;  %1570 = vmatpush.msrb.mxu1 %v3083_v36  ;;  %v3597_v4 = vld [vmem:[#allocation31_spill] sm:$0xff]  ;;  %v3599_v36 = vld [vmem:[#allocation70_spill] sm:$0xff] }
 0x3f9   :  { %1590 = vmatpush.msrb.mxu2 %v3086_v47  ;;  %1610 = vmatpush.msra.mxu3 %v2963_v0  ;;  %v2087_v0 = vld [vmem:[#allocation9 + $0xa0] sm:$0xff]  ;;  %v3600_v47 = vld [vmem:[#allocation33_spill] sm:$0xff] }
 0x3fa   :  { %1551 = vmatpush.msrb.mxu0 %v2084_v56  ;;  %1571 = vmatpush.msrb.mxu1 %v3091_v62  ;;  %v2092_v44 = vld [vmem:[#allocation9] sm:$0xff] }
 0x3fb   :  { %1591 = vmatpush.msrb.mxu2 %v3094_v17  ;;  %1611 = vmatpush.msra.mxu3 %v2969_v3  ;;  %v2088_v3 = vld [vmem:[#allocation9 + $0x80] sm:$0xff] }
 0x3fc   :  { %1552 = vmatpush.msrb.mxu0 %v2085_v58  ;;  %1572 = vmatpush.msrb.mxu1 %v3099_v11  ;;  %v3601_v11 = vld [vmem:[#allocation24_spill] sm:$0xff] }
 0x3fd   :  { %1592 = vmatpush.msrb.mxu2 %v3102_v51  ;;  %1612 = vmatpush.msra.mxu3 %v2975_v5  ;;  %v2089_v5 = vld [vmem:[#allocation9 + $0x60] sm:$0xff] }
 0x3fe   :  { %1553 = vmatpush.msrb.mxu0 %v2086_v63  ;;  %1573 = vmatpush.msrb.mxu1 %v3107_v23  ;;  %v3602_v23 = vld [vmem:[#allocation55_spill] sm:$0xff] }
 0x3ff   :  { %1593 = vmatpush.msrb.mxu2 %v3561_v32  ;;  %1613 = vmatpush.msra.mxu3 %v3562_v1 }
 0x400   :  { %1554 = vmatpush.msrb.mxu0 %v2087_v0  ;;  %1574 = vmatpush.msrb.mxu1 %v3564_v55 }
 0x401   :  { %1594 = vmatpush.msrb.mxu2 %v3565_v59  ;;  %1614 = vmatpush.msra.mxu3 %v3566_v2  ;;  %v3603_v2 = vld [vmem:[#allocation46_spill] sm:$0xff] }
 0x402   :  { %1555 = vmatpush.msrb.mxu0 %v2088_v3  ;;  %1575 = vmatpush.msrb.mxu1 %v3568_v12 }
 0x403   :  { %1595 = vmatpush.msrb.mxu2 %v3569_v22  ;;  %1615 = vmatpush.msra.mxu3 %v3570_v27 }
 0x404   :  { %1556 = vmatpush.msrb.mxu0 %v2089_v5  ;;  %1576 = vmatpush.msrb.mxu1 %v3572_v9 }
 0x405   :  { %1596 = vmatpush.msrb.mxu2 %v3573_v10  ;;  %1616 = vmatpush.msra.mxu3 %v3591_v38 }
 0x406   :  { %1557 = vmatpush.msrb.mxu0 %v2090_v45  ;;  %1577 = vmatpush.msrb.mxu1 %v3592_v49 }
 0x407   :  { %1597 = vmatpush.msrb.mxu2 %v3593_v50  ;;  %1617 = vmatpush.msra.mxu3 %v3594_v52 }
 0x408   :  { %1558 = vmatpush.msrb.mxu0 %v2091_v16  ;;  %1578 = vmatpush.msrb.mxu1 %v3595_v20 }
 0x409   :  { %1598 = vmatpush.msrb.mxu2 %v3596_v41  ;;  %1618 = vmatpush.msra.mxu3 %v3597_v4  ;;  %v1717_v4 = vld [vmem:[#allocation12 + $0x70] sm:$0xff] }
 0x40a   :  { %1559 = vmatpush.msrb.mxu0 %v2092_v44  ;;  %1579 = vmatpush.msrb.mxu1 %v3598_v29  ;;  %v1716_v44 = vld [vmem:[#allocation12 + $0x68] sm:$0xff]  ;;  %v1715_v29 = vld [vmem:[#allocation12 + $0x60] sm:$0xff] }
 0x40b   :  { %1599 = vmatpush.msrb.mxu2 %v3599_v36  ;;  %1619 = vmatpush.msra.mxu3 %v3600_v47  ;;  %v1714_v36 = vld [vmem:[#allocation12 + $0x58] sm:$0xff] }
 0x467   :  { %v1249_v62 = vpop.f32.mrf.mxu0  ;;  %v1269_v17 = vpop.f32.mrf.mxu1 }
 0x468   :  { %v1312_v51 = vadd.f32 %v1249_v62, %v3601_v11  ;;  %v1313_v32 = vadd.f32 %v1269_v17, %v3602_v23  ;;  %v1713_v17 = vld [vmem:[#allocation12 + $0x50] sm:$0xff]  ;;  %v3606_v23 = vld [vmem:[#allocation57_spill] sm:$0xff] }
 0x469   :  { %v3605_v11 = vld [vmem:[#allocation38_spill] sm:$0xff] }
 0x46a   :  { %v1846_v1 = vmul.f32 -1.442695, %v1312_v51  ;;  %v1847_v55 = vmul.f32 -1.442695, %v1313_v32 }
 0x46c   :  { %1965 = vpow2.f32 %v1846_v1  ;;  %v1712_v1 = vld [vmem:[#allocation12 + $0x48] sm:$0xff] }
 0x46d   :  { %1967 = vpow2.f32 %v1847_v55 }
 0x46e   :  { %v1309_v59 = vpop.f32.mrf.mxu3  ;;  %v1289_v13 = vpop.f32.mrf.mxu2 }
 0x46f   :  { %v1315_v12 = vadd.f32 %v1309_v59, %v3603_v2  ;;  %v1314_v43 = vadd.f32 %v1289_v13, %v3604_v30  ;;  %v1711_v2 = vld [vmem:[#allocation12 + $0x40] sm:$0xff] }
 0x471   :  { %v1848_v22 = vmul.f32 -1.442695, %v1315_v12  ;;  %v1710_v12 = vld [vmem:[#allocation12 + $0x38] sm:$0xff] }
 0x472   :  { %v1966_v27 = vpop.eup %1965 }
 0x473   :  { %v1968_v9 = vpop.eup %1967  ;;  %v1319_v10 = vadd.f32 1.0, %v1966_v27  ;;  %1969 = vpow2.f32 %v1848_v22  ;;  %v1709_v22 = vld [vmem:[#allocation12 + $0x30] sm:$0xff] }
 0x474   :  { %v1338_v61 = vadd.f32 1.0, %v1968_v9  ;;  %v3607_v9 = vld [vmem:[#allocation49_spill] sm:$0xff] }
 0x475   :  { %1971 = vrcp.f32 %v1319_v10  ;;  %v1331_v53 = vand.u32 2147483648, %v1319_v10  ;;  %v1329_v7 = vand.u32 2147483647, %v1319_v10  ;;  %vm1325_vm14 = vweird.f32 %v1319_v10 }
 0x476   :  { %1973 = vrcp.f32 %v1338_v61  ;;  %v1350_v8 = vand.u32 2147483648, %v1338_v61  ;;  %v1348_v31 = vand.u32 2147483647, %v1338_v61  ;;  %vm1344_vm15 = vweird.f32 %v1338_v61 }
 0x477   :  { %v1332_v15 = vor.u32 1.1754944e-38, %v1331_v53  ;;  %vm1330_vm2 = vcmp.eq.f32.partialorder %v1329_v7, 8.507059e+37  ;;  %v1703_v53 = vld [vmem:[#allocation12] sm:$0xff]  ;;  %v3608_v7 = vld [vmem:[#allocation58_spill] sm:$0xff] }
 0x478   :  { %v1351_v25 = vor.u32 1.1754944e-38, %v1350_v8  ;;  %vm1349_vm3 = vcmp.eq.f32.partialorder %v1348_v31, 8.507059e+37 }
 0x479   :  { %v1970_v24 = vpop.eup %1969 }
 0x47a   :  { %v1358_v46 = vadd.f32 1.0, %v1970_v24  ;;  %v1707_v24 = vld [vmem:[#allocation12 + $0x20] sm:$0xff] }
 0x47b   :  { %v1972_v40 = vpop.eup %1971 }
 0x47c   :  { %v1974_v60 = vpop.eup %1973  ;;  %v1321_v35 = vmul.f32 %v1972_v40, %v1319_v10  ;;  %1975 = vrcp.f32 %v1358_v46  ;;  %vm1326_vm12 = vweird.f32 %v1972_v40  ;;  %v1370_v45 = vand.u32 2147483648, %v1358_v46 }
 0x47d   :  { %v1340_v42 = vmul.f32 %v1974_v60, %v1338_v61  ;;  %1977 = vtanh.f32 %v1314_v43  ;;  %vm1345_vm13 = vweird.f32 %v1974_v60  ;;  %vm1327_vm0 = vmor %vm1325_vm14, %vm1326_vm12  ;;  %vm1364_vm5 = vweird.f32 %v1358_v46  ;;  %v1708_v61 = vld [vmem:[#allocation12 + $0x28] sm:$0xff] }
 0x47e   :  { %v1322_v33 = vsub.f32 1.0, %v1321_v35  ;;  %vm1346_vm1 = vmor %vm1344_vm15, %vm1345_vm13  ;;  %v1368_v49 = vand.u32 2147483647, %v1358_v46  ;;  %v1371_v52 = vor.u32 1.1754944e-38, %v1370_v45  ;;  %v1705_v35 = vld [vmem:[#allocation12 + $0x10] sm:$0xff] }
 0x47f   :  { %v1341_v14 = vsub.f32 1.0, %v1340_v42  ;;  %v1704_v42 = vld [vmem:[#allocation12 + $0x8] sm:$0xff] }
 0x480   :  { %v1323_v37 = vmul.f32 %v1972_v40, %v1322_v33  ;;  %vm1369_vm7 = vcmp.eq.f32.partialorder %v1368_v49, 8.507059e+37 }
 0x481   :  { %v1342_v26 = vmul.f32 %v1974_v60, %v1341_v14 }
 0x482   :  { %v1976_v48 = vpop.eup %1975  ;;  %v1324_v21 = vadd.f32 %v1972_v40, %v1323_v37 }
 0x483   :  { %v1343_v18 = vadd.f32 %v1974_v60, %v1342_v26  ;;  %v1360_v6 = vmul.f32 %v1976_v48, %v1358_v46  ;;  %v1978_v57 = vpop.eup %1977  ;;  %vm1365_vm4 = vweird.f32 %v1976_v48 }
 0x484   :  { %v1328_v34 = vsel %vm1327_vm0, %v1972_v40, %v1324_v21  ;;  %vm1366_vm6 = vmor %vm1364_vm5, %vm1365_vm4 }
 0x485   :  { %v1333_v19 = vsel %vm1330_vm2, %v1332_v15, %v1328_v34  ;;  %v1347_v54 = vsel %vm1346_vm1, %v1974_v60, %v1343_v18  ;;  %v1361_v56 = vsub.f32 1.0, %v1360_v6  ;;  %v1706_v60 = vld [vmem:[#allocation12 + $0x18] sm:$0xff] }
 0x486   :  { %v1352_v58 = vsel %vm1349_vm3, %v1351_v25, %v1347_v54  ;;  %v1375_v63 = vmul.f32 %v1978_v57, %v1333_v19 }
 0x487   :  { %v1374_v0 = vmul.f32 %v1352_v58, %v3245_v39  ;;  %v1362_v3 = vmul.f32 %v1976_v48, %v1361_v56  ;;  %v1718_v39 = vld [vmem:[#allocation12 + $0x78] sm:$0xff] }
 0x489   :  { %v3307_v5 = vadd.f32 %v1375_v63, %v1374_v0  ;;  %v1363_v38 = vadd.f32 %v1976_v48, %v1362_v3 }
 0x48b   :  { %1979 = vtanh.f32 %v3307_v5  ;;  %v1367_v50 = vsel %vm1366_vm6, %v1976_v48, %v1363_v38 }
 0x48c   :  { %v1372_v20 = vsel %vm1369_vm7, %v1371_v52, %v1367_v50 }
 0x491   :  { %v1980_v16 = vpop.eup %1979 }
 0x492   :  { %v3310_v41 = vmul.f32 %v1980_v16, %v1372_v20 }
 0x494   :  { %1404 = vmatmul.f32.vlgmr.msra.gmra.mxu0 %v3310_v41  ;;  %1424 = vmatmul.f32.vlgmr.msra.gmra.mxu1 %v3310_v41 }
 0x495   :  { %1444 = vmatmul.f32.vlgmr.msra.gmra.mxu2 %v3310_v41  ;;  %1464 = vmatmul.f32.vlgmr.msrb.gmra.mxu3 %v3310_v41 }
 0x496   :  { %1723 = vmatpush.msra.mxu0 %v1718_v39 }
 0x498   :  { %1724 = vmatpush.msra.mxu0 %v1717_v4 }
 0x49a   :  { %1725 = vmatpush.msra.mxu0 %v1716_v44 }
 0x49c   :  { %1726 = vmatpush.msra.mxu0 %v1715_v29 }
 0x49e   :  { %1727 = vmatpush.msra.mxu0 %v1714_v36 }
 0x4a0   :  { %1728 = vmatpush.msra.mxu0 %v1713_v17 }
 0x4a2   :  { %1729 = vmatpush.msra.mxu0 %v1712_v1  ;;  %v3610_v1 = vld [vmem:[#allocation30_spill] sm:$0xff] }
 0x4a4   :  { %1730 = vmatpush.msra.mxu0 %v1711_v2 }
 0x4a6   :  { %1731 = vmatpush.msra.mxu0 %v1710_v12 }
 0x4a8   :  { %1732 = vmatpush.msra.mxu0 %v1709_v22  ;;  %v3613_v22 = vld [vmem:[#allocation41_spill] sm:$0xff] }
 0x4aa   :  { %1733 = vmatpush.msra.mxu0 %v1708_v61 }
 0x4ac   :  { %1734 = vmatpush.msra.mxu0 %v1707_v24  ;;  %v3335_v24 = vld [vmem:[%s3365_s5] ss:$0 sm:$0xff]  ;;  %s2305_s5 = smov [#allocation14]  }
 0x4ad   :  { %s1790_s9 = sshll.u32 %s2305_s5, 4  ;;  %s1791_s9 = int_to_ptr.vmem [resolvable:$true] %s1790_s9 }
 0x4ae   :  { %1735 = vmatpush.msra.mxu0 %v1706_v60 }
 0x4b0   :  { %1736 = vmatpush.msra.mxu0 %v1705_v35 }
 0x4b2   :  { %1737 = vmatpush.msra.mxu0 %v1704_v42 }
 0x4b4   :  { %1738 = vmatpush.msra.mxu0 %v1703_v53 }
 0x511   :  { %v1405_v47 = vpop.f32.mrf.mxu0  ;;  %v1425_v62 = vpop.f32.mrf.mxu1 }
 0x512   :  { %v1468_v51 = vadd.f32 %v1405_v47, %v3605_v11  ;;  %v1469_v32 = vadd.f32 %v1425_v62, %v3606_v23 }
 0x514   :  { %v1849_v55 = vmul.f32 -1.442695, %v1468_v51  ;;  %v1850_v59 = vmul.f32 -1.442695, %v1469_v32 }
 0x516   :  { %1981 = vpow2.f32 %v1849_v55  ;;  %v3611_v55 = vld [vmem:[#allocation34_spill] sm:$0xff] }
 0x517   :  { %1983 = vpow2.f32 %v1850_v59  ;;  %v3612_v59 = vld [vmem:[#allocation40_spill] sm:$0xff] }
 0x518   :  { %v1465_v27 = vpop.f32.mrf.mxu3  ;;  %v1445_v33 = vpop.f32.mrf.mxu2 }
 0x519   :  { %v1471_v10 = vadd.f32 %v1465_v27, %v3607_v9  ;;  %v1470_v26 = vadd.f32 %v1445_v33, %v3608_v7  ;;  %v3614_v9 = vld [vmem:[#allocation59_spill] sm:$0xff] }
 0x51b   :  { %v1851_v13 = vmul.f32 -1.442695, %v1471_v10 }
 0x51c   :  { %v1982_v46 = vpop.eup %1981 }
 0x51d   :  { %v1984_v40 = vpop.eup %1983  ;;  %v1475_v30 = vadd.f32 1.0, %v1982_v46  ;;  %1985 = vpow2.f32 %v1851_v13 }
 0x51e   :  { %v1494_v43 = vadd.f32 1.0, %v1984_v40 }
 0x51f   :  { %1987 = vrcp.f32 %v1475_v30  ;;  %v1487_v6 = vand.u32 2147483648, %v1475_v30  ;;  %v1485_v57 = vand.u32 2147483647, %v1475_v30  ;;  %vm1481_vm10 = vweird.f32 %v1475_v30 }
 0x520   :  { %1989 = vrcp.f32 %v1494_v43  ;;  %v1506_v25 = vand.u32 2147483648, %v1494_v43  ;;  %v1504_v54 = vand.u32 2147483647, %v1494_v43  ;;  %vm1500_vm11 = vweird.f32 %v1494_v43 }
 0x521   :  { %v1488_v63 = vor.u32 1.1754944e-38, %v1487_v6  ;;  %vm1486_vm14 = vcmp.eq.f32.partialorder %v1485_v57, 8.507059e+37 }
 0x522   :  { %v1507_v38 = vor.u32 1.1754944e-38, %v1506_v25  ;;  %vm1505_vm15 = vcmp.eq.f32.partialorder %v1504_v54, 8.507059e+37 }
 0x523   :  { %v1986_v14 = vpop.eup %1985 }
 0x524   :  { %v1514_v8 = vadd.f32 1.0, %v1986_v14 }
 0x525   :  { %v1988_v37 = vpop.eup %1987 }
 0x526   :  { %v1990_v31 = vpop.eup %1989  ;;  %v1477_v48 = vmul.f32 %v1988_v37, %v1475_v30  ;;  %1991 = vrcp.f32 %v1514_v8  ;;  %vm1482_vm8 = vweird.f32 %v1988_v37  ;;  %v1526_v47 = vand.u32 2147483648, %v1514_v8 }
 0x527   :  { %v1496_v21 = vmul.f32 %v1990_v31, %v1494_v43  ;;  %1993 = vtanh.f32 %v1470_v26  ;;  %vm1501_vm9 = vweird.f32 %v1990_v31  ;;  %vm1483_vm12 = vmor %vm1481_vm10, %vm1482_vm8  ;;  %vm1520_vm1 = vweird.f32 %v1514_v8 }
 0x528   :  { %v1478_v15 = vsub.f32 1.0, %v1477_v48  ;;  %vm1502_vm13 = vmor %vm1500_vm11, %vm1501_vm9  ;;  %v1524_v62 = vand.u32 2147483647, %v1514_v8  ;;  %v1527_v11 = vor.u32 1.1754944e-38, %v1526_v47 }
 0x529   :  { %v1497_v18 = vsub.f32 1.0, %v1496_v21 }
 0x52a   :  { %v1479_v34 = vmul.f32 %v1988_v37, %v1478_v15  ;;  %vm1525_vm3 = vcmp.eq.f32.partialorder %v1524_v62, 8.507059e+37 }
 0x52b   :  { %v1498_v19 = vmul.f32 %v1990_v31, %v1497_v18 }
 0x52c   :  { %v1992_v56 = vpop.eup %1991  ;;  %v1480_v58 = vadd.f32 %v1988_v37, %v1479_v34 }
 0x52d   :  { %v1499_v0 = vadd.f32 %v1990_v31, %v1498_v19  ;;  %v1516_v3 = vmul.f32 %v1992_v56, %v1514_v8  ;;  %v1994_v49 = vpop.eup %1993  ;;  %vm1521_vm0 = vweird.f32 %v1992_v56 }
 0x52e   :  { %v1484_v45 = vsel %vm1483_vm12, %v1988_v37, %v1480_v58  ;;  %vm1522_vm2 = vmor %vm1520_vm1, %vm1521_vm0 }
 0x52f   :  { %v1489_v50 = vsel %vm1486_vm14, %v1488_v63, %v1484_v45  ;;  %v1503_v52 = vsel %vm1502_vm13, %v1990_v31, %v1499_v0  ;;  %v1517_v16 = vsub.f32 1.0, %v1516_v3  ;;  %v3616_v31 = vld [vmem:[#allocation60_spill] sm:$0xff] }
 0x530   :  { %v1508_v20 = vsel %vm1505_vm15, %v1507_v38, %v1503_v52  ;;  %v1531_v39 = vmul.f32 %v1994_v49, %v1489_v50 }
 0x531   :  { %v1530_v4 = vmul.f32 %v1508_v20, %v3307_v5  ;;  %v1518_v44 = vmul.f32 %v1992_v56, %v1517_v16  ;;  %v3609_v5 = vld [vmem:[#allocation61_spill] sm:$0xff] }
 0x533   :  { %v3321_v29 = vadd.f32 %v1531_v39, %v1530_v4  ;;  %v1519_v36 = vadd.f32 %v1992_v56, %v1518_v44 }
 0x535   :  { %1995 = vtanh.f32 %v3321_v29  ;;  %v1523_v17 = vsel %vm1522_vm2, %v1992_v56, %v1519_v36 }
 0x536   :  { %v1528_v23 = vsel %vm1525_vm3, %v1527_v11, %v1523_v17 }
 0x53b   :  { %v1996_v51 = vpop.eup %1995 }
 0x53c   :  { %v1534_v32 = vmul.f32 %v1996_v51, %v1528_v23 }
 0x53e   :  { %1560 = vmatmul.f32.vlgmr.msrb.gmra.mxu0 %v1534_v32  ;;  %1580 = vmatmul.f32.vlgmr.msrb.gmra.mxu1 %v1534_v32 }
 0x53f   :  { %1600 = vmatmul.f32.vlgmr.msrb.gmra.mxu2 %v1534_v32  ;;  %1620 = vmatmul.f32.vlgmr.msra.gmra.mxu3 %v1534_v32 }
 0x546   :  { %1739 = vmatmul.f32.vlgmr.msra.gmra.mxu0 %v3609_v5 }
 0x54e   :  { %1742 = vmatmul.f32.gmra.mxu0 %v3610_v1 }
 0x556   :  { %1745 = vmatmul.f32.gmra.mxu0 %v3611_v55 }
 0x55e   :  { %1748 = vmatmul.f32.gmra.mxu0 %v3612_v59 }
 0x566   :  { %1751 = vmatmul.f32.gmra.mxu0 %v3248_v28  ;;  %v3615_v28 = vld [vmem:[#allocation52_spill] sm:$0xff] }
 0x56e   :  { %1754 = vmatmul.f32.gmra.mxu0 %v3310_v41 }
 0x576   :  { %1757 = vmatmul.f32.gmra.mxu0 %v1534_v32 }
 0x5bb   :  { %v1561_v2 = vpop.f32.mrf.mxu0  ;;  %v1581_v12 = vpop.f32.mrf.mxu1 }
 0x5bc   :  { %v1624_v27 = vadd.f32 %v1561_v2, %v3613_v22  ;;  %v1625_v10 = vadd.f32 %v1581_v12, %v3614_v9 }
 0x5be   :  { %v1852_v61 = vmul.f32 -1.442695, %v1624_v27  ;;  %v1853_v13 = vmul.f32 -1.442695, %v1625_v10 }
 0x5c0   :  { %1997 = vpow2.f32 %v1852_v61 }
 0x5c1   :  { %1999 = vpow2.f32 %v1853_v13 }
 0x5c2   :  { %v1621_v46 = vpop.f32.mrf.mxu3  ;;  %v1601_v53 = vpop.f32.mrf.mxu2 }
 0x5c3   :  { %v1627_v40 = vadd.f32 %v1621_v46, %v3615_v28  ;;  %v1740_v41 = vpop.f32.mrf.mxu0  ;;  %v1626_v48 = vadd.f32 %v1601_v53, %v3616_v31 }
 0x5c4   :  { %v1741_v30 = vadd.f32 %v3335_v24, %v1740_v41 }
 0x5c5   :  { %v1854_v43 = vmul.f32 -1.442695, %v1627_v40 }
 0x5c6   :  { %v1998_v60 = vpop.eup %1997  ;;  %1764 = vst [vmem:[#allocation13] sm:$0xff] %v1741_v30 }
 0x5c7   :  { %v2000_v35 = vpop.eup %1999  ;;  %v1631_v42 = vadd.f32 1.0, %v1998_v60  ;;  %2001 = vpow2.f32 %v1854_v43 }
 0x5c8   :  { %v1650_v33 = vadd.f32 1.0, %v2000_v35 }
 0x5c9   :  { %2003 = vrcp.f32 %v1631_v42  ;;  %v1641_v34 = vand.u32 2147483647, %v1631_v42  ;;  %v1643_v57 = vand.u32 2147483648, %v1631_v42  ;;  %vm1637_vm6 = vweird.f32 %v1631_v42 }
 0x5ca   :  { %2005 = vrcp.f32 %v1650_v33  ;;  %v1662_v54 = vand.u32 2147483648, %v1650_v33  ;;  %v1660_v0 = vand.u32 2147483647, %v1650_v33  ;;  %vm1656_vm7 = vweird.f32 %v1650_v33 }
 0x5cb   :  { %v1743_v14 = vpop.f32.mrf.mxu0  ;;  %v1644_v45 = vor.u32 1.1754944e-38, %v1643_v57  ;;  %vm1642_vm10 = vcmp.eq.f32.partialorder %v1641_v34, 8.507059e+37 }
 0x5cc   :  { %v1744_v8 = vadd.f32 %v3335_v24, %v1743_v14  ;;  %v1663_v52 = vor.u32 1.1754944e-38, %v1662_v54  ;;  %vm1661_vm11 = vcmp.eq.f32.partialorder %v1660_v0, 8.507059e+37 }
 0x5cd   :  { %v2002_v37 = vpop.eup %2001 }
 0x5ce   :  { %v1670_v7 = vadd.f32 1.0, %v2002_v37  ;;  %1765 = vst [vmem:[#allocation13 + $0x8] sm:$0xff] %v1744_v8 }
 0x5cf   :  { %v2004_v26 = vpop.eup %2003 }
 0x5d0   :  { %v2006_v21 = vpop.eup %2005  ;;  %v1633_v15 = vmul.f32 %v2004_v26, %v1631_v42  ;;  %2007 = vrcp.f32 %v1670_v7  ;;  %vm1638_vm4 = vweird.f32 %v2004_v26  ;;  %v1682_v5 = vand.u32 2147483648, %v1670_v7 }
 0x5d1   :  { %v1652_v18 = vmul.f32 %v2006_v21, %v1650_v33  ;;  %2009 = vtanh.f32 %v1626_v48  ;;  %vm1657_vm5 = vweird.f32 %v2006_v21  ;;  %vm1639_vm8 = vmor %vm1637_vm6, %vm1638_vm4  ;;  %vm1676_vm13 = vweird.f32 %v1670_v7 }
 0x5d2   :  { %v1634_v6 = vsub.f32 1.0, %v1633_v15  ;;  %vm1658_vm9 = vmor %vm1656_vm7, %vm1657_vm5  ;;  %v1680_v1 = vand.u32 2147483647, %v1670_v7  ;;  %v1683_v2 = vor.u32 1.1754944e-38, %v1682_v5 }
 0x5d3   :  { %v1653_v25 = vsub.f32 1.0, %v1652_v18  ;;  %v1746_v19 = vpop.f32.mrf.mxu0 }
 0x5d4   :  { %v1635_v56 = vmul.f32 %v2004_v26, %v1634_v6  ;;  %v1747_v58 = vadd.f32 %v3335_v24, %v1746_v19  ;;  %vm1681_vm15 = vcmp.eq.f32.partialorder %v1680_v1, 8.507059e+37 }
 0x5d5   :  { %v1654_v63 = vmul.f32 %v2006_v21, %v1653_v25 }
 0x5d6   :  { %v2008_v3 = vpop.eup %2007  ;;  %v1636_v38 = vadd.f32 %v2004_v26, %v1635_v56  ;;  %1766 = vst [vmem:[#allocation13 + $0x10] sm:$0xff] %v1747_v58 }
 0x5d7   :  { %v1655_v49 = vadd.f32 %v2006_v21, %v1654_v63  ;;  %v1672_v50 = vmul.f32 %v2008_v3, %v1670_v7  ;;  %v2010_v20 = vpop.eup %2009  ;;  %vm1677_vm12 = vweird.f32 %v2008_v3 }
 0x5d8   :  { %v1640_v16 = vsel %vm1639_vm8, %v2004_v26, %v1636_v38  ;;  %vm1678_vm14 = vmor %vm1676_vm13, %vm1677_vm12 }
 0x5d9   :  { %v1645_v39 = vsel %vm1642_vm10, %v1644_v45, %v1640_v16  ;;  %v1659_v4 = vsel %vm1658_vm9, %v2006_v21, %v1655_v49  ;;  %v1673_v44 = vsub.f32 1.0, %v1672_v50 }
 0x5da   :  { %v1664_v36 = vsel %vm1661_vm11, %v1663_v52, %v1659_v4  ;;  %v1687_v47 = vmul.f32 %v2010_v20, %v1645_v39 }
 0x5db   :  { %v1686_v62 = vmul.f32 %v1664_v36, %v3321_v29  ;;  %v1749_v17 = vpop.f32.mrf.mxu0  ;;  %v1674_v11 = vmul.f32 %v2008_v3, %v1673_v44 }
 0x5dc   :  { %v1750_v51 = vadd.f32 %v3335_v24, %v1749_v17 }
 0x5dd   :  { %v1688_v23 = vadd.f32 %v1687_v47, %v1686_v62  ;;  %v1675_v32 = vadd.f32 %v2008_v3, %v1674_v11 }
 0x5de   :  { %1767 = vst [vmem:[#allocation13 + $0x18] sm:$0xff] %v1750_v51 }
 0x5df   :  { %1694 = vst [vmem:[#allocation16] sm:$0xff] %v1688_v23  ;;  %2011 = vtanh.f32 %v1688_v23  ;;  %v1679_v55 = vsel %vm1678_vm14, %v2008_v3, %v1675_v32 }
 0x5e0   :  { %v1684_v22 = vsel %vm1681_vm15, %v1683_v2, %v1679_v55 }
 0x5e3   :  { %v1752_v59 = vpop.f32.mrf.mxu0 }
 0x5e4   :  { %v1753_v12 = vadd.f32 %v3335_v24, %v1752_v59 }
 0x5e5   :  { %v2012_v29 = vpop.eup %2011 }
 0x5e6   :  { %1768 = vst [vmem:[#allocation13 + $0x20] sm:$0xff] %v1753_v12  ;;  %v1690_v27 = vmul.f32 %v2012_v29, %v1684_v22 }
 0x5e8   :  { %1760 = vmatmul.f32.gmra.mxu0 %v1690_v27  ;;  %1693 = vst [vmem:[#allocation14] sm:$0xff] %v1690_v27 }
 0x5e9   :  { %1795 = dma.vmem_to_hbm [thread:$0]  %s1791_s9, 128, %s1793_s12, [#allocation15]  }
 0x5ea   :  { %1806 = dma.vmem_to_hbm [thread:$0]  %s1802_s14, 128, %s1804_s17, [#allocation15]  }
 0x5eb   :  { %v1755_v9 = vpop.f32.mrf.mxu0 }
 0x5ec   :  { %v1756_v10 = vadd.f32 %v3335_v24, %v1755_v9 }
 0x5ee   :  { %1769 = vst [vmem:[#allocation13 + $0x28] sm:$0xff] %v1756_v10 }
 0x5f3   :  { %v1758_v61 = vpop.f32.mrf.mxu0 }
 0x5f4   :  { %v1759_v13 = vadd.f32 %v3335_v24, %v1758_v61 }
 0x5f6   :  { %1770 = vst [vmem:[#allocation13 + $0x30] sm:$0xff] %v1759_v13 }
 0x665   :  { %v1761_v46 = vpop.f32.mrf.mxu0 }
 0x666   :  { %v1762_v28 = vadd.f32 %v3335_v24, %v1761_v46 }
 0x668   :  { %1771 = vst [vmem:[#allocation13 + $0x38] sm:$0xff] %v1762_v28 }
 0x669   :  { %1784 = dma.vmem_to_hbm [thread:$0]  %s1777_s18, 1024, %s1779_s20, [#allocation6], %s2300_s23, %s2300_s23, %s2301_s24  }
 0x66a   :  { %2291 = dma.done.wait [#allocation6], 1024  }
 0x66b   :  { %2292 = vsyncadd [#allocation6], 4294966272 }
 0x66c   :  { %2293 = dma.done.wait [#allocation15], 256  }
 0x66d   :  { %2294 = vsyncadd [#allocation15], 4294967040 }
 0x66e   :  { %1819 = vsyncpa [#allocation5], 1 }
 0x66f   :  { %1820 = vsyncpa [#allocation8], 1 }
 0x670   :  { %1821 = vsyncpa [#allocation11], 1 }
 0x671   :  { %1822 = vsyncpa [#allocation6], 1 }
 0x672   :  { %1823 = vsyncpa [#allocation15], 1 }

</bundles_post_ra>
